<compile_context>
chip_gen: v7x
topology: tpu7x:2x2x1
jax: 0.10.0
libtpu: 0.0.40
codegen_flags: <defaults>
</compile_context>

<pallas_src>
import jax
import jax.numpy as jnp
from jax.experimental import pallas as pl
from jax.experimental.pallas import tpu as pltpu

# ----------------------------- configuration --------------------------------
VOCAB_SIZE   = 256
EMB_DIM      = 128
HIDDEN_SIZE  = 128
N_LAYERS     = 2
SEQ_LEN      = 8
BATCH_SIZE   = 8
EMB_MAX_NORM = 3.0
DROPOUT_RATE = 0.0     # chosen 0.0 -> dropout is identity (deterministic)
WEIGHT_TYING = True

assert N_LAYERS == 2, "fused kernel below is written for exactly 2 GRU layers"
assert WEIGHT_TYING and EMB_DIM == HIDDEN_SIZE, \
    "kernel reuses the embedding table as the tied Linear weight"


# ----------------------------- fused Pallas kernel ---------------------------
def fused_dgru_kernel(ids_ref, h_init_ref, emb_ref,
                      wih0_ref, whh0_ref, b0_ref, bhn0_ref,
                      w1_hbm_ref, b1_ref, bhn1_ref, lin_b_ref,
                      out_ref, hlast_ref,
                      gi0_scr, y1_scr, w1_scr, dma_sem):
    """Single-invocation fused dGRU (embedding + 2 GRU layers + tied Linear).

    ids_ref    : (T*B, 1) int32      token ids, time-major flattened
    h_init_ref : (L, B, H)           initial hidden states
    emb_ref    : (V, E)              embedding table == tied linear weight
    wih0_ref   : (E, 3H)   whh0_ref: (H, 3H)        layer-0 weights (transposed)
    b0_ref     : (1, 3H)  [b_ir+b_hr, b_iz+b_hz, b_in]  (r/z biases pre-folded)
    bhn0_ref   : (1, H)   b_hn (must stay inside r * (...))
    w1_hbm_ref : (2, H, 3H) in HBM   [wih1^T, whh1^T]  (manual async DMA)
    b1_ref     : (1, 3H), bhn1_ref: (1, H)             layer-1 biases
    lin_b_ref  : (1, V)              linear bias
    out_ref    : (T*B, V)            logits (lane-dense, V=256)
    hlast_ref  : (L, B, H)           final hidden per layer
    gi0_scr    : (T*B, 3H) VMEM      hoisted layer-0 input projection
    y1_scr     : (T*B, H)  VMEM      layer-1 output sequence
    w1_scr     : (2, H, 3H) VMEM     DMA landing buffer for layer-1 weights
    dma_sem    : DMA semaphore

    PyTorch GRU gate order (r, z, n):
        r  = sigmoid(W_ir x + b_ir + W_hr h + b_hr)
        z  = sigmoid(W_iz x + b_iz + W_hz h + b_hz)
        n  = tanh   (W_in x + b_in + r * (W_hn h + b_hn))
        h' = (1 - z) * n + z * h   ==   n + z * (h - n)
    """
    TB, H = y1_scr.shape
    B = h_init_ref.shape[1]
    T = TB // B
    H2 = 2 * H
    V = emb_ref.shape[0]

    # ---- 0. kick off layer-1 weight DMA; hidden behind embedding + layer 0 --
    w1_copy = pltpu.make_async_copy(w1_hbm_ref, w1_scr, dma_sem)
    w1_copy.start()

    # ---- 1. embedding gather (one-hot MXU matmul) + max-norm renorm ---------
    onehot = (jax.lax.broadcasted_iota(jnp.int32, (TB, V), 1)
              == ids_ref[...]).astype(jnp.float32)                  # (TB, V)
    x = jnp.dot(onehot, emb_ref[...],
                preferred_element_type=jnp.float32)                 # (TB, E)
    norm = jnp.sqrt(jnp.sum(x * x, axis=-1, keepdims=True))
    x = x * jnp.where(norm > EMB_MAX_NORM, EMB_MAX_NORM / (norm + 1e-7), 1.0)
    # F.dropout(p=0.0) == identity.

    # ---- 2. hoisted layer-0 input projection for all T steps ----------------
    gi0_scr[...] = (jnp.dot(x, wih0_ref[...],
                            preferred_element_type=jnp.float32) + b0_ref[...])

    # hoisted broadcasts (JAX does not CSE broadcast_in_dim inside the loop)
    bhn0_b = jnp.broadcast_to(bhn0_ref[...], (B, H))

    def gru_cell(gi, gh, bhn_b, h):
        rz = jax.nn.sigmoid(gi[:, :H2] + gh[:, :H2])       # one wide EUP call
        r = rz[:, :H]
        z = rz[:, H:]
        n = jnp.tanh(gi[:, H2:] + r * (gh[:, H2:] + bhn_b))
        return n + z * (h - n)                              # = (1-z)*n + z*h

    def step0(t, h):
        row = pl.multiple_of(t * B, B)
        gi = gi0_scr[pl.ds(row, B), :]                      # (B, 3H)
        gh = jnp.dot(h, whh0_ref[...], preferred_element_type=jnp.float32)
        return gru_cell(gi, gh, bhn0_b, h)

    # ---- 3. prologue: layer-0 step 0 (overlaps the layer-1 weight DMA) ------
    h0 = step0(0, h_init_ref[0])

    # ---- 4. layer-1 weights now needed ---------------------------------------
    w1_copy.wait()
    b1_b = jnp.broadcast_to(b1_ref[...], (B, 3 * H))
    bhn1_b = jnp.broadcast_to(bhn1_ref[...], (B, H))

    def step1(t, x1, h):
        gi = jnp.dot(x1, w1_scr[0], preferred_element_type=jnp.float32) + b1_b
        gh = jnp.dot(h, w1_scr[1], preferred_element_type=jnp.float32)
        h_new = gru_cell(gi, gh, bhn1_b, h)
        row = pl.multiple_of(t * B, B)
        y1_scr[pl.ds(row, B), :] = h_new                    # stays in VMEM
        return h_new

    # ---- 5. wavefront: layer-0 step t+1 || layer-1 step t (independent) -----
    def wave(t, carry):
        h0_c, h1_c, y_prev = carry
        h0_n = step0(t + 1, h0_c)       # layer-0 advances one step ahead
        h1_n = step1(t, y_prev, h1_c)   # layer-1 consumes last layer-0 output
        return (h0_n, h1_n, h0_n)

    h0, h1, y_prev = jax.lax.fori_loop(
        0, T - 1, wave, (h0, h_init_ref[1], h0), unroll=True)

    # ---- 6. epilogue: last layer-1 step --------------------------------------
    h1 = step1(T - 1, y_prev, h1)

    hlast_ref[0] = h0
    hlast_ref[1] = h1

    # ---- 7. final Linear (weight tying): logits = y1 @ emb^T + b -------------
    # (inter/post-GRU dropout has p=0.0 -> identity)
    logits = jax.lax.dot_general(
        y1_scr[...], emb_ref[...],
        dimension_numbers=(((1,), (1,)), ((), ())),
        preferred_element_type=jnp.float32)
    out_ref[...] = (logits + lin_b_ref[...]).astype(out_ref.dtype)


# ----------------------------- wrapper ---------------------------------------
def _prep_layer(params, layer):
    H = HIDDEN_SIZE
    wih = params[f"wih_{layer}"]          # (3H, In)
    whh = params[f"whh_{layer}"]          # (3H, H)
    bih = params[f"bih_{layer}"]          # (3H,)
    bhh = params[f"bhh_{layer}"]          # (3H,)
    # pre-fold b_hh for the r/z slices into the input-projection bias
    b_comb = bih.at[:2 * H].add(bhh[:2 * H]).reshape(1, 3 * H)
    bhn = bhh[2 * H:].reshape(1, H)
    return wih.T, whh.T, b_comb, bhn


@jax.jit
def dgru_forward(token_ids, hidden, params):
    """token_ids: (T, B) int32; hidden: (n_layers, B, H).

    Returns (out, hidden_out): out (T, B, vocab), hidden_out (n_layers, B, H).
    """
    T, B = token_ids.shape
    H = HIDDEN_SIZE
    V = VOCAB_SIZE
    TB = T * B

    wih0_t, whh0_t, b0, bhn0 = _prep_layer(params, 0)
    wih1_t, whh1_t, b1, bhn1 = _prep_layer(params, 1)
    w1_packed = jnp.stack([wih1_t, whh1_t], axis=0)       # (2, H, 3H)

    ids = token_ids.reshape(TB, 1).astype(jnp.int32)
    emb = params["embedding"].astype(jnp.float32)          # (V, E) == tied lin_w
    lin_b = params["lin_b"].reshape(1, V)

    vmem = pl.BlockSpec(memory_space=pltpu.MemorySpace.VMEM)
    hbm = pl.BlockSpec(memory_space=pl.ANY)

    logits_flat, h_last = pl.pallas_call(
        fused_dgru_kernel,
        out_shape=(jax.ShapeDtypeStruct((TB, V), jnp.float32),
                   jax.ShapeDtypeStruct((N_LAYERS, B, H), jnp.float32)),
        in_specs=[vmem,   # ids
                  vmem,   # hidden
                  vmem,   # embedding table (also tied linear weight)
                  vmem, vmem, vmem, vmem,   # layer-0 weights/biases
                  hbm,                      # packed layer-1 weights (manual DMA)
                  vmem, vmem,               # layer-1 biases
                  vmem],                    # linear bias
        out_specs=(vmem, vmem),
        scratch_shapes=[pltpu.VMEM((TB, 3 * H), jnp.float32),      # gi0
                        pltpu.VMEM((TB, H), jnp.float32),          # layer-1 out
                        pltpu.VMEM((2, H, 3 * H), jnp.float32),    # layer-1 w buf
                        pltpu.SemaphoreType.DMA(())],
    )(ids, hidden, emb, wih0_t, whh0_t, b0, bhn0, w1_packed, b1, bhn1, lin_b)

    # NOTE: self.softmax (LogSoftmax) is defined in __init__ but never used in
    # forward() of the reference module, so it is intentionally not applied.
    return logits_flat.reshape(T, B, V), h_last


# ----------------------------- pure-JAX reference ----------------------------
_PREC = jax.lax.Precision.HIGHEST


def gru_ref_layer(x_seq, h0, wih, whh, bih, bhh):
    H = h0.shape[-1]

    def step(h, x):
        gi = jnp.dot(x, wih.T, precision=_PREC) + bih
        gh = jnp.dot(h, whh.T, precision=_PREC) + bhh
        r = jax.nn.sigmoid(gi[:, :H] + gh[:, :H])
        z = jax.nn.sigmoid(gi[:, H:2 * H] + gh[:, H:2 * H])
        n = jnp.tanh(gi[:, 2 * H:] + r * gh[:, 2 * H:])
        h_new = (1.0 - z) * n + z * h
        return h_new, h_new

    hT, ys = jax.lax.scan(step, h0, x_seq)
    return ys, hT


def dgru_forward_ref(token_ids, hidden, params):
    emb_w = params["embedding"]
    rows = jnp.take(emb_w, token_ids, axis=0)
    norms = jnp.linalg.norm(rows, axis=-1, keepdims=True)
    scale = jnp.where(norms > EMB_MAX_NORM, EMB_MAX_NORM / (norms + 1e-7), 1.0)
    x = rows * scale
    h_finals = []
    for layer in range(N_LAYERS):
        x, h_last = gru_ref_layer(
            x, hidden[layer],
            params[f"wih_{layer}"], params[f"whh_{layer}"],
            params[f"bih_{layer}"], params[f"bhh_{layer}"])
        h_finals.append(h_last)
    hidden_out = jnp.stack(h_finals, axis=0)
    out = jnp.dot(x, params["lin_w_t"], precision=_PREC) + params["lin_b"]
    return out, hidden_out


# ----------------------------- parameter init --------------------------------
def init_params(key):
    params = {}
    keys = jax.random.split(key, 3 + 4 * N_LAYERS)
    k_it = iter(keys)

    # word2vec-style embedding table (deterministic synthetic init)
    params["embedding"] = 0.5 * jax.random.normal(
        next(k_it), (VOCAB_SIZE, EMB_DIM), dtype=jnp.float32)

    bound = 1.0 / jnp.sqrt(HIDDEN_SIZE)
    for layer in range(N_LAYERS):
        in_size = EMB_DIM if layer == 0 else HIDDEN_SIZE
        params[f"wih_{layer}"] = jax.random.uniform(
            next(k_it), (3 * HIDDEN_SIZE, in_size), jnp.float32, -bound, bound)
        params[f"whh_{layer}"] = jax.random.uniform(
            next(k_it), (3 * HIDDEN_SIZE, HIDDEN_SIZE), jnp.float32, -bound, bound)
        params[f"bih_{layer}"] = jax.random.uniform(
            next(k_it), (3 * HIDDEN_SIZE,), jnp.float32, -bound, bound)
        params[f"bhh_{layer}"] = jax.random.uniform(
            next(k_it), (3 * HIDDEN_SIZE,), jnp.float32, -bound, bound)

    if WEIGHT_TYING:
        # linear.weight.data.copy_(embedding.weight.data) -> (vocab, hidden)
        lin_w = params["embedding"]
    else:
        lin_w = jax.random.uniform(
            next(k_it), (VOCAB_SIZE, HIDDEN_SIZE), jnp.float32, -bound, bound)
    params["lin_w_t"] = lin_w.T                              # (H, vocab)
    params["lin_b"] = jax.random.uniform(
        next(k_it), (VOCAB_SIZE,), jnp.float32, -bound, bound)
    return params


# ----------------------------- main -------------------------------------------
if __name__ == "__main__":
    root = jax.random.PRNGKey(0)
    k_param, k_tok = jax.random.split(root)

    params = init_params(k_param)

    # input: (seq_len, batch) int token ids ; hidden: initHidden() -> zeros
    token_ids = jax.random.randint(
        k_tok, (SEQ_LEN, BATCH_SIZE), 0, VOCAB_SIZE, dtype=jnp.int32)
    hidden0 = jnp.zeros((N_LAYERS, BATCH_SIZE, HIDDEN_SIZE), jnp.float32)

    out, hidden_out = dgru_forward(token_ids, hidden0, params)
    out = jax.block_until_ready(out)
    hidden_out = jax.block_until_ready(hidden_out)

    # sanity check against a pure-JAX reference
    out_ref, hidden_ref = dgru_forward_ref(token_ids, hidden0, params)
    assert out.shape == (SEQ_LEN, BATCH_SIZE, VOCAB_SIZE)
    assert hidden_out.shape == (N_LAYERS, BATCH_SIZE, HIDDEN_SIZE)
    assert jnp.allclose(out, out_ref, atol=1e-3, rtol=1e-3), (
        float(jnp.max(jnp.abs(out - out_ref))))
    assert jnp.allclose(hidden_out, hidden_ref, atol=1e-3, rtol=1e-3), (
        float(jnp.max(jnp.abs(hidden_out - hidden_ref))))

    print("KERNEL_OK")
</pallas_src>

<mosaic_0001>
module attributes {stable_mosaic.version = 11 : i64} {
  func.func @fused_dgru_kernel(%arg0: memref<64x1xi32, #tpu.memory_space<vmem>>, %arg1: memref<2x8x128xf32, #tpu.memory_space<vmem>>, %arg2: memref<256x128xf32, #tpu.memory_space<vmem>>, %arg3: memref<128x384xf32, #tpu.memory_space<vmem>>, %arg4: memref<128x384xf32, #tpu.memory_space<vmem>>, %arg5: memref<1x384xf32, #tpu.memory_space<vmem>>, %arg6: memref<1x128xf32, #tpu.memory_space<vmem>>, %arg7: memref<2x128x384xf32, #tpu.memory_space<any>>, %arg8: memref<1x384xf32, #tpu.memory_space<vmem>>, %arg9: memref<1x128xf32, #tpu.memory_space<vmem>>, %arg10: memref<1x256xf32, #tpu.memory_space<vmem>>, %arg11: memref<64x256xf32, #tpu.memory_space<vmem>>, %arg12: memref<2x8x128xf32, #tpu.memory_space<vmem>>, %arg13: memref<64x384xf32, #tpu.memory_space<vmem>>, %arg14: memref<64x128xf32, #tpu.memory_space<vmem>>, %arg15: memref<2x128x384xf32, #tpu.memory_space<vmem>>, %arg16: memref<!tpu.dma_semaphore, #tpu.memory_space<semaphore_mem>>) attributes {dimension_semantics = [], scalar_prefetch = 0 : i64, scratch_operands = 4 : i64, tpu.core_type = #tpu.core_type<tc>} {
    tpu.enqueue_dma source(%arg7 : memref<2x128x384xf32, #tpu.memory_space<any>>) target(%arg15 : memref<2x128x384xf32, #tpu.memory_space<vmem>>) target_semaphore(%arg16 : memref<!tpu.dma_semaphore, #tpu.memory_space<semaphore_mem>>)
    %0 = tpu.iota {dimensions = array<i32: 1>} : vector<64x256xi32>
    %c0 = arith.constant 0 : index
    %c0_0 = arith.constant 0 : index
    %1 = vector.load %arg0[%c0, %c0_0] : memref<64x1xi32, #tpu.memory_space<vmem>>, vector<64x1xi32>
    %2 = vector.broadcast %1 : vector<64x1xi32> to vector<64x256xi32>
    %3 = arith.cmpi eq, %0, %2 : vector<64x256xi32>
    %4 = arith.extui %3 : vector<64x256xi1> to vector<64x256xi32>
    %5 = arith.sitofp %4 : vector<64x256xi32> to vector<64x256xf32>
    %c0_1 = arith.constant 0 : index
    %c0_2 = arith.constant 0 : index
    %6 = vector.load %arg2[%c0_1, %c0_2] : memref<256x128xf32, #tpu.memory_space<vmem>>, vector<256x128xf32>
    %cst = arith.constant dense<0.000000e+00> : vector<64x128xf32>
    %7 = tpu.matmul %5, %6, %cst {dimension_numbers = #tpu.dot_dimension_numbers<[1], [0], [0], [1], [0, 0, 1, 1], [], []>} : vector<64x256xf32>, vector<256x128xf32>, vector<64x128xf32> -> vector<64x128xf32>
    %8 = arith.mulf %7, %7 : vector<64x128xf32>
    %cst_3 = arith.constant dense<0.000000e+00> : vector<64xf32>
    %9 = vector.multi_reduction <add>, %8, %cst_3 [1] : vector<64x128xf32> to vector<64xf32>
    %10 = vector.shape_cast %9 : vector<64xf32> to vector<64x1xf32>
    %11 = math.sqrt %10 : vector<64x1xf32>
    %cst_4 = arith.constant 3.000000e+00 : f32
    %12 = vector.broadcast %cst_4 : f32 to vector<64x1xf32>
    %13 = arith.cmpf ogt, %11, %12 : vector<64x1xf32>
    %cst_5 = arith.constant 1.000000e-07 : f32
    %14 = vector.broadcast %cst_5 : f32 to vector<64x1xf32>
    %15 = arith.addf %11, %14 : vector<64x1xf32>
    %cst_6 = arith.constant 3.000000e+00 : f32
    %16 = vector.broadcast %cst_6 : f32 to vector<64x1xf32>
    %17 = arith.divf %16, %15 : vector<64x1xf32>
    %cst_7 = arith.constant 1.000000e+00 : f32
    %18 = vector.broadcast %cst_7 : f32 to vector<64x1xf32>
    %19 = arith.select %13, %17, %18 : vector<64x1xi1>, vector<64x1xf32>
    %20 = vector.broadcast %19 : vector<64x1xf32> to vector<64x128xf32>
    %21 = arith.mulf %7, %20 : vector<64x128xf32>
    %c0_8 = arith.constant 0 : index
    %c0_9 = arith.constant 0 : index
    %22 = vector.load %arg3[%c0_8, %c0_9] : memref<128x384xf32, #tpu.memory_space<vmem>>, vector<128x384xf32>
    %cst_10 = arith.constant dense<0.000000e+00> : vector<64x384xf32>
    %23 = tpu.matmul %21, %22, %cst_10 {dimension_numbers = #tpu.dot_dimension_numbers<[1], [0], [0], [1], [0, 0, 1, 1], [], []>} : vector<64x128xf32>, vector<128x384xf32>, vector<64x384xf32> -> vector<64x384xf32>
    %c0_11 = arith.constant 0 : index
    %c0_12 = arith.constant 0 : index
    %24 = vector.load %arg5[%c0_11, %c0_12] : memref<1x384xf32, #tpu.memory_space<vmem>>, vector<1x384xf32>
    %25 = vector.broadcast %24 : vector<1x384xf32> to vector<64x384xf32>
    %26 = arith.addf %23, %25 : vector<64x384xf32>
    %c0_13 = arith.constant 0 : index
    %c0_14 = arith.constant 0 : index
    %27 = vector.load %arg13[%c0_13, %c0_14] : memref<64x384xf32, #tpu.memory_space<vmem>>, vector<64x384xf32>
    tpu.vector_store %arg13[%c0_13, %c0_14], %26 {strides = array<i32>} : memref<64x384xf32, #tpu.memory_space<vmem>>, vector<64x384xf32>,
    %c0_15 = arith.constant 0 : index
    %c0_16 = arith.constant 0 : index
    %28 = vector.load %arg6[%c0_15, %c0_16] : memref<1x128xf32, #tpu.memory_space<vmem>>, vector<1x128xf32>
    %29 = vector.shape_cast %28 : vector<1x128xf32> to vector<1x128xf32>
    %30 = vector.broadcast %29 : vector<1x128xf32> to vector<8x128xf32>
    %c0_17 = arith.constant 0 : index
    %c0_18 = arith.constant 0 : index
    %c0_19 = arith.constant 0 : index
    %31 = vector.load %arg1[%c0_17, %c0_18, %c0_19] : memref<2x8x128xf32, #tpu.memory_space<vmem>>, vector<1x8x128xf32>
    %32 = vector.shape_cast %31 : vector<1x8x128xf32> to vector<8x128xf32>
    %c0_i32 = arith.constant 0 : i32
    %33 = tpu.assume_multiple %c0_i32, 8 : i32
    %34 = arith.index_cast %33 : i32 to index
    %c0_20 = arith.constant 0 : index
    %35 = vector.load %arg13[%34, %c0_20] : memref<64x384xf32, #tpu.memory_space<vmem>>, vector<8x384xf32>
    %c0_21 = arith.constant 0 : index
    %c0_22 = arith.constant 0 : index
    %36 = vector.load %arg4[%c0_21, %c0_22] : memref<128x384xf32, #tpu.memory_space<vmem>>, vector<128x384xf32>
    %cst_23 = arith.constant dense<0.000000e+00> : vector<8x384xf32>
    %37 = tpu.matmul %32, %36, %cst_23 {dimension_numbers = #tpu.dot_dimension_numbers<[1], [0], [0], [1], [0, 0, 1, 1], [], []>} : vector<8x128xf32>, vector<128x384xf32>, vector<8x384xf32> -> vector<8x384xf32>
    %38 = vector.extract_strided_slice %35 {offsets = [0, 0], sizes = [8, 256], strides = [1, 1]} : vector<8x384xf32> to vector<8x256xf32>
    %39 = vector.extract_strided_slice %37 {offsets = [0, 0], sizes = [8, 256], strides = [1, 1]} : vector<8x384xf32> to vector<8x256xf32>
    %40 = arith.addf %38, %39 : vector<8x256xf32>
    %41 = arith.negf %40 : vector<8x256xf32>
    %42 = math.exp %41 : vector<8x256xf32>
    %cst_24 = arith.constant 1.000000e+00 : f32
    %43 = vector.broadcast %cst_24 : f32 to vector<8x256xf32>
    %44 = arith.addf %43, %42 : vector<8x256xf32>
    %45 = arith.divf %43, %44 : vector<8x256xf32>
    %46 = vector.extract_strided_slice %45 {offsets = [0, 0], sizes = [8, 128], strides = [1, 1]} : vector<8x256xf32> to vector<8x128xf32>
    %47 = vector.extract_strided_slice %45 {offsets = [0, 128], sizes = [8, 128], strides = [1, 1]} : vector<8x256xf32> to vector<8x128xf32>
    %48 = vector.extract_strided_slice %35 {offsets = [0, 256], sizes = [8, 128], strides = [1, 1]} : vector<8x384xf32> to vector<8x128xf32>
    %49 = vector.extract_strided_slice %37 {offsets = [0, 256], sizes = [8, 128], strides = [1, 1]} : vector<8x384xf32> to vector<8x128xf32>
    %50 = arith.addf %49, %30 : vector<8x128xf32>
    %51 = arith.mulf %46, %50 : vector<8x128xf32>
    %52 = arith.addf %48, %51 : vector<8x128xf32>
    %53 = math.tanh %52 : vector<8x128xf32>
    %54 = arith.subf %32, %53 : vector<8x128xf32>
    %55 = arith.mulf %47, %54 : vector<8x128xf32>
    %56 = arith.addf %53, %55 : vector<8x128xf32>
    tpu.wait_dma2 semaphore(%arg16 : memref<!tpu.dma_semaphore, #tpu.memory_space<semaphore_mem>>) src(%arg7 : memref<2x128x384xf32, #tpu.memory_space<any>>) dst(%arg15 : memref<2x128x384xf32, #tpu.memory_space<vmem>>)
    %c0_25 = arith.constant 0 : index
    %c0_26 = arith.constant 0 : index
    %57 = vector.load %arg8[%c0_25, %c0_26] : memref<1x384xf32, #tpu.memory_space<vmem>>, vector<1x384xf32>
    %58 = vector.shape_cast %57 : vector<1x384xf32> to vector<1x384xf32>
    %59 = vector.broadcast %58 : vector<1x384xf32> to vector<8x384xf32>
    %c0_27 = arith.constant 0 : index
    %c0_28 = arith.constant 0 : index
    %60 = vector.load %arg9[%c0_27, %c0_28] : memref<1x128xf32, #tpu.memory_space<vmem>>, vector<1x128xf32>
    %61 = vector.shape_cast %60 : vector<1x128xf32> to vector<1x128xf32>
    %62 = vector.broadcast %61 : vector<1x128xf32> to vector<8x128xf32>
    %c1 = arith.constant 1 : index
    %c0_29 = arith.constant 0 : index
    %c0_30 = arith.constant 0 : index
    %63 = vector.load %arg1[%c1, %c0_29, %c0_30] : memref<2x8x128xf32, #tpu.memory_space<vmem>>, vector<1x8x128xf32>
    %64 = vector.shape_cast %63 : vector<1x8x128xf32> to vector<8x128xf32>
    %c0_i32_31 = arith.constant 0 : i32
    %c1_i32 = arith.constant 1 : i32
    %65 = arith.addi %c0_i32_31, %c1_i32 : i32
    %c8_i32 = arith.constant 8 : i32
    %66 = arith.muli %65, %c8_i32 : i32
    %67 = tpu.assume_multiple %66, 8 : i32
    %68 = arith.index_cast %67 : i32 to index
    %c0_32 = arith.constant 0 : index
    %69 = vector.load %arg13[%68, %c0_32] : memref<64x384xf32, #tpu.memory_space<vmem>>, vector<8x384xf32>
    %c0_33 = arith.constant 0 : index
    %c0_34 = arith.constant 0 : index
    %70 = vector.load %arg4[%c0_33, %c0_34] : memref<128x384xf32, #tpu.memory_space<vmem>>, vector<128x384xf32>
    %cst_35 = arith.constant dense<0.000000e+00> : vector<8x384xf32>
    %71 = tpu.matmul %56, %70, %cst_35 {dimension_numbers = #tpu.dot_dimension_numbers<[1], [0], [0], [1], [0, 0, 1, 1], [], []>} : vector<8x128xf32>, vector<128x384xf32>, vector<8x384xf32> -> vector<8x384xf32>
    %72 = vector.extract_strided_slice %69 {offsets = [0, 0], sizes = [8, 256], strides = [1, 1]} : vector<8x384xf32> to vector<8x256xf32>
    %73 = vector.extract_strided_slice %71 {offsets = [0, 0], sizes = [8, 256], strides = [1, 1]} : vector<8x384xf32> to vector<8x256xf32>
    %74 = arith.addf %72, %73 : vector<8x256xf32>
    %75 = arith.negf %74 : vector<8x256xf32>
    %76 = math.exp %75 : vector<8x256xf32>
    %cst_36 = arith.constant 1.000000e+00 : f32
    %77 = vector.broadcast %cst_36 : f32 to vector<8x256xf32>
    %78 = arith.addf %77, %76 : vector<8x256xf32>
    %79 = arith.divf %77, %78 : vector<8x256xf32>
    %80 = vector.extract_strided_slice %79 {offsets = [0, 0], sizes = [8, 128], strides = [1, 1]} : vector<8x256xf32> to vector<8x128xf32>
    %81 = vector.extract_strided_slice %79 {offsets = [0, 128], sizes = [8, 128], strides = [1, 1]} : vector<8x256xf32> to vector<8x128xf32>
    %82 = vector.extract_strided_slice %69 {offsets = [0, 256], sizes = [8, 128], strides = [1, 1]} : vector<8x384xf32> to vector<8x128xf32>
    %83 = vector.extract_strided_slice %71 {offsets = [0, 256], sizes = [8, 128], strides = [1, 1]} : vector<8x384xf32> to vector<8x128xf32>
    %84 = arith.addf %83, %30 : vector<8x128xf32>
    %85 = arith.mulf %80, %84 : vector<8x128xf32>
    %86 = arith.addf %82, %85 : vector<8x128xf32>
    %87 = math.tanh %86 : vector<8x128xf32>
    %88 = arith.subf %56, %87 : vector<8x128xf32>
    %89 = arith.mulf %81, %88 : vector<8x128xf32>
    %90 = arith.addf %87, %89 : vector<8x128xf32>
    %c0_37 = arith.constant 0 : index
    %c0_38 = arith.constant 0 : index
    %c0_39 = arith.constant 0 : index
    %91 = vector.load %arg15[%c0_37, %c0_38, %c0_39] : memref<2x128x384xf32, #tpu.memory_space<vmem>>, vector<1x128x384xf32>
    %92 = vector.shape_cast %91 : vector<1x128x384xf32> to vector<128x384xf32>
    %cst_40 = arith.constant dense<0.000000e+00> : vector<8x384xf32>
    %93 = tpu.matmul %56, %92, %cst_40 {dimension_numbers = #tpu.dot_dimension_numbers<[1], [0], [0], [1], [0, 0, 1, 1], [], []>} : vector<8x128xf32>, vector<128x384xf32>, vector<8x384xf32> -> vector<8x384xf32>
    %94 = arith.addf %93, %59 : vector<8x384xf32>
    %c1_41 = arith.constant 1 : index
    %c0_42 = arith.constant 0 : index
    %c0_43 = arith.constant 0 : index
    %95 = vector.load %arg15[%c1_41, %c0_42, %c0_43] : memref<2x128x384xf32, #tpu.memory_space<vmem>>, vector<1x128x384xf32>
    %96 = vector.shape_cast %95 : vector<1x128x384xf32> to vector<128x384xf32>
    %cst_44 = arith.constant dense<0.000000e+00> : vector<8x384xf32>
    %97 = tpu.matmul %64, %96, %cst_44 {dimension_numbers = #tpu.dot_dimension_numbers<[1], [0], [0], [1], [0, 0, 1, 1], [], []>} : vector<8x128xf32>, vector<128x384xf32>, vector<8x384xf32> -> vector<8x384xf32>
    %98 = vector.extract_strided_slice %94 {offsets = [0, 0], sizes = [8, 256], strides = [1, 1]} : vector<8x384xf32> to vector<8x256xf32>
    %99 = vector.extract_strided_slice %97 {offsets = [0, 0], sizes = [8, 256], strides = [1, 1]} : vector<8x384xf32> to vector<8x256xf32>
    %100 = arith.addf %98, %99 : vector<8x256xf32>
    %101 = arith.negf %100 : vector<8x256xf32>
    %102 = math.exp %101 : vector<8x256xf32>
    %cst_45 = arith.constant 1.000000e+00 : f32
    %103 = vector.broadcast %cst_45 : f32 to vector<8x256xf32>
    %104 = arith.addf %103, %102 : vector<8x256xf32>
    %105 = arith.divf %103, %104 : vector<8x256xf32>
    %106 = vector.extract_strided_slice %105 {offsets = [0, 0], sizes = [8, 128], strides = [1, 1]} : vector<8x256xf32> to vector<8x128xf32>
    %107 = vector.extract_strided_slice %105 {offsets = [0, 128], sizes = [8, 128], strides = [1, 1]} : vector<8x256xf32> to vector<8x128xf32>
    %108 = vector.extract_strided_slice %94 {offsets = [0, 256], sizes = [8, 128], strides = [1, 1]} : vector<8x384xf32> to vector<8x128xf32>
    %109 = vector.extract_strided_slice %97 {offsets = [0, 256], sizes = [8, 128], strides = [1, 1]} : vector<8x384xf32> to vector<8x128xf32>
    %110 = arith.addf %109, %62 : vector<8x128xf32>
    %111 = arith.mulf %106, %110 : vector<8x128xf32>
    %112 = arith.addf %108, %111 : vector<8x128xf32>
    %113 = math.tanh %112 : vector<8x128xf32>
    %114 = arith.subf %64, %113 : vector<8x128xf32>
    %115 = arith.mulf %107, %114 : vector<8x128xf32>
    %116 = arith.addf %113, %115 : vector<8x128xf32>
    %c8_i32_46 = arith.constant 8 : i32
    %117 = arith.muli %c0_i32_31, %c8_i32_46 : i32
    %118 = tpu.assume_multiple %117, 8 : i32
    %119 = arith.index_cast %118 : i32 to index
    %c0_47 = arith.constant 0 : index
    %120 = vector.load %arg14[%119, %c0_47] : memref<64x128xf32, #tpu.memory_space<vmem>>, vector<8x128xf32>
    tpu.vector_store %arg14[%119, %c0_47], %116 {strides = array<i32>} : memref<64x128xf32, #tpu.memory_space<vmem>>, vector<8x128xf32>,
    %c1_i32_48 = arith.constant 1 : i32
    %c1_i32_49 = arith.constant 1 : i32
    %121 = arith.addi %c1_i32_48, %c1_i32_49 : i32
    %c8_i32_50 = arith.constant 8 : i32
    %122 = arith.muli %121, %c8_i32_50 : i32
    %123 = tpu.assume_multiple %122, 8 : i32
    %124 = arith.index_cast %123 : i32 to index
    %c0_51 = arith.constant 0 : index
    %125 = vector.load %arg13[%124, %c0_51] : memref<64x384xf32, #tpu.memory_space<vmem>>, vector<8x384xf32>
    %c0_52 = arith.constant 0 : index
    %c0_53 = arith.constant 0 : index
    %126 = vector.load %arg4[%c0_52, %c0_53] : memref<128x384xf32, #tpu.memory_space<vmem>>, vector<128x384xf32>
    %cst_54 = arith.constant dense<0.000000e+00> : vector<8x384xf32>
    %127 = tpu.matmul %90, %126, %cst_54 {dimension_numbers = #tpu.dot_dimension_numbers<[1], [0], [0], [1], [0, 0, 1, 1], [], []>} : vector<8x128xf32>, vector<128x384xf32>, vector<8x384xf32> -> vector<8x384xf32>
    %128 = vector.extract_strided_slice %125 {offsets = [0, 0], sizes = [8, 256], strides = [1, 1]} : vector<8x384xf32> to vector<8x256xf32>
    %129 = vector.extract_strided_slice %127 {offsets = [0, 0], sizes = [8, 256], strides = [1, 1]} : vector<8x384xf32> to vector<8x256xf32>
    %130 = arith.addf %128, %129 : vector<8x256xf32>
    %131 = arith.negf %130 : vector<8x256xf32>
    %132 = math.exp %131 : vector<8x256xf32>
    %cst_55 = arith.constant 1.000000e+00 : f32
    %133 = vector.broadcast %cst_55 : f32 to vector<8x256xf32>
    %134 = arith.addf %133, %132 : vector<8x256xf32>
    %135 = arith.divf %133, %134 : vector<8x256xf32>
    %136 = vector.extract_strided_slice %135 {offsets = [0, 0], sizes = [8, 128], strides = [1, 1]} : vector<8x256xf32> to vector<8x128xf32>
    %137 = vector.extract_strided_slice %135 {offsets = [0, 128], sizes = [8, 128], strides = [1, 1]} : vector<8x256xf32> to vector<8x128xf32>
    %138 = vector.extract_strided_slice %125 {offsets = [0, 256], sizes = [8, 128], strides = [1, 1]} : vector<8x384xf32> to vector<8x128xf32>
    %139 = vector.extract_strided_slice %127 {offsets = [0, 256], sizes = [8, 128], strides = [1, 1]} : vector<8x384xf32> to vector<8x128xf32>
    %140 = arith.addf %139, %30 : vector<8x128xf32>
    %141 = arith.mulf %136, %140 : vector<8x128xf32>
    %142 = arith.addf %138, %141 : vector<8x128xf32>
    %143 = math.tanh %142 : vector<8x128xf32>
    %144 = arith.subf %90, %143 : vector<8x128xf32>
    %145 = arith.mulf %137, %144 : vector<8x128xf32>
    %146 = arith.addf %143, %145 : vector<8x128xf32>
    %c0_56 = arith.constant 0 : index
    %c0_57 = arith.constant 0 : index
    %c0_58 = arith.constant 0 : index
    %147 = vector.load %arg15[%c0_56, %c0_57, %c0_58] : memref<2x128x384xf32, #tpu.memory_space<vmem>>, vector<1x128x384xf32>
    %148 = vector.shape_cast %147 : vector<1x128x384xf32> to vector<128x384xf32>
    %cst_59 = arith.constant dense<0.000000e+00> : vector<8x384xf32>
    %149 = tpu.matmul %90, %148, %cst_59 {dimension_numbers = #tpu.dot_dimension_numbers<[1], [0], [0], [1], [0, 0, 1, 1], [], []>} : vector<8x128xf32>, vector<128x384xf32>, vector<8x384xf32> -> vector<8x384xf32>
    %150 = arith.addf %149, %59 : vector<8x384xf32>
    %c1_60 = arith.constant 1 : index
    %c0_61 = arith.constant 0 : index
    %c0_62 = arith.constant 0 : index
    %151 = vector.load %arg15[%c1_60, %c0_61, %c0_62] : memref<2x128x384xf32, #tpu.memory_space<vmem>>, vector<1x128x384xf32>
    %152 = vector.shape_cast %151 : vector<1x128x384xf32> to vector<128x384xf32>
    %cst_63 = arith.constant dense<0.000000e+00> : vector<8x384xf32>
    %153 = tpu.matmul %116, %152, %cst_63 {dimension_numbers = #tpu.dot_dimension_numbers<[1], [0], [0], [1], [0, 0, 1, 1], [], []>} : vector<8x128xf32>, vector<128x384xf32>, vector<8x384xf32> -> vector<8x384xf32>
    %154 = vector.extract_strided_slice %150 {offsets = [0, 0], sizes = [8, 256], strides = [1, 1]} : vector<8x384xf32> to vector<8x256xf32>
    %155 = vector.extract_strided_slice %153 {offsets = [0, 0], sizes = [8, 256], strides = [1, 1]} : vector<8x384xf32> to vector<8x256xf32>
    %156 = arith.addf %154, %155 : vector<8x256xf32>
    %157 = arith.negf %156 : vector<8x256xf32>
    %158 = math.exp %157 : vector<8x256xf32>
    %cst_64 = arith.constant 1.000000e+00 : f32
    %159 = vector.broadcast %cst_64 : f32 to vector<8x256xf32>
    %160 = arith.addf %159, %158 : vector<8x256xf32>
    %161 = arith.divf %159, %160 : vector<8x256xf32>
    %162 = vector.extract_strided_slice %161 {offsets = [0, 0], sizes = [8, 128], strides = [1, 1]} : vector<8x256xf32> to vector<8x128xf32>
    %163 = vector.extract_strided_slice %161 {offsets = [0, 128], sizes = [8, 128], strides = [1, 1]} : vector<8x256xf32> to vector<8x128xf32>
    %164 = vector.extract_strided_slice %150 {offsets = [0, 256], sizes = [8, 128], strides = [1, 1]} : vector<8x384xf32> to vector<8x128xf32>
    %165 = vector.extract_strided_slice %153 {offsets = [0, 256], sizes = [8, 128], strides = [1, 1]} : vector<8x384xf32> to vector<8x128xf32>
    %166 = arith.addf %165, %62 : vector<8x128xf32>
    %167 = arith.mulf %162, %166 : vector<8x128xf32>
    %168 = arith.addf %164, %167 : vector<8x128xf32>
    %169 = math.tanh %168 : vector<8x128xf32>
    %170 = arith.subf %116, %169 : vector<8x128xf32>
    %171 = arith.mulf %163, %170 : vector<8x128xf32>
    %172 = arith.addf %169, %171 : vector<8x128xf32>
    %c8_i32_65 = arith.constant 8 : i32
    %173 = arith.muli %c1_i32_48, %c8_i32_65 : i32
    %174 = tpu.assume_multiple %173, 8 : i32
    %175 = arith.index_cast %174 : i32 to index
    %c0_66 = arith.constant 0 : index
    %176 = vector.load %arg14[%175, %c0_66] : memref<64x128xf32, #tpu.memory_space<vmem>>, vector<8x128xf32>
    tpu.vector_store %arg14[%175, %c0_66], %172 {strides = array<i32>} : memref<64x128xf32, #tpu.memory_space<vmem>>, vector<8x128xf32>,
    %c2_i32 = arith.constant 2 : i32
    %c1_i32_67 = arith.constant 1 : i32
    %177 = arith.addi %c2_i32, %c1_i32_67 : i32
    %c8_i32_68 = arith.constant 8 : i32
    %178 = arith.muli %177, %c8_i32_68 : i32
    %179 = tpu.assume_multiple %178, 8 : i32
    %180 = arith.index_cast %179 : i32 to index
    %c0_69 = arith.constant 0 : index
    %181 = vector.load %arg13[%180, %c0_69] : memref<64x384xf32, #tpu.memory_space<vmem>>, vector<8x384xf32>
    %c0_70 = arith.constant 0 : index
    %c0_71 = arith.constant 0 : index
    %182 = vector.load %arg4[%c0_70, %c0_71] : memref<128x384xf32, #tpu.memory_space<vmem>>, vector<128x384xf32>
    %cst_72 = arith.constant dense<0.000000e+00> : vector<8x384xf32>
    %183 = tpu.matmul %146, %182, %cst_72 {dimension_numbers = #tpu.dot_dimension_numbers<[1], [0], [0], [1], [0, 0, 1, 1], [], []>} : vector<8x128xf32>, vector<128x384xf32>, vector<8x384xf32> -> vector<8x384xf32>
    %184 = vector.extract_strided_slice %181 {offsets = [0, 0], sizes = [8, 256], strides = [1, 1]} : vector<8x384xf32> to vector<8x256xf32>
    %185 = vector.extract_strided_slice %183 {offsets = [0, 0], sizes = [8, 256], strides = [1, 1]} : vector<8x384xf32> to vector<8x256xf32>
    %186 = arith.addf %184, %185 : vector<8x256xf32>
    %187 = arith.negf %186 : vector<8x256xf32>
    %188 = math.exp %187 : vector<8x256xf32>
    %cst_73 = arith.constant 1.000000e+00 : f32
    %189 = vector.broadcast %cst_73 : f32 to vector<8x256xf32>
    %190 = arith.addf %189, %188 : vector<8x256xf32>
    %191 = arith.divf %189, %190 : vector<8x256xf32>
    %192 = vector.extract_strided_slice %191 {offsets = [0, 0], sizes = [8, 128], strides = [1, 1]} : vector<8x256xf32> to vector<8x128xf32>
    %193 = vector.extract_strided_slice %191 {offsets = [0, 128], sizes = [8, 128], strides = [1, 1]} : vector<8x256xf32> to vector<8x128xf32>
    %194 = vector.extract_strided_slice %181 {offsets = [0, 256], sizes = [8, 128], strides = [1, 1]} : vector<8x384xf32> to vector<8x128xf32>
    %195 = vector.extract_strided_slice %183 {offsets = [0, 256], sizes = [8, 128], strides = [1, 1]} : vector<8x384xf32> to vector<8x128xf32>
    %196 = arith.addf %195, %30 : vector<8x128xf32>
    %197 = arith.mulf %192, %196 : vector<8x128xf32>
    %198 = arith.addf %194, %197 : vector<8x128xf32>
    %199 = math.tanh %198 : vector<8x128xf32>
    %200 = arith.subf %146, %199 : vector<8x128xf32>
    %201 = arith.mulf %193, %200 : vector<8x128xf32>
    %202 = arith.addf %199, %201 : vector<8x128xf32>
    %c0_74 = arith.constant 0 : index
    %c0_75 = arith.constant 0 : index
    %c0_76 = arith.constant 0 : index
    %203 = vector.load %arg15[%c0_74, %c0_75, %c0_76] : memref<2x128x384xf32, #tpu.memory_space<vmem>>, vector<1x128x384xf32>
    %204 = vector.shape_cast %203 : vector<1x128x384xf32> to vector<128x384xf32>
    %cst_77 = arith.constant dense<0.000000e+00> : vector<8x384xf32>
    %205 = tpu.matmul %146, %204, %cst_77 {dimension_numbers = #tpu.dot_dimension_numbers<[1], [0], [0], [1], [0, 0, 1, 1], [], []>} : vector<8x128xf32>, vector<128x384xf32>, vector<8x384xf32> -> vector<8x384xf32>
    %206 = arith.addf %205, %59 : vector<8x384xf32>
    %c1_78 = arith.constant 1 : index
    %c0_79 = arith.constant 0 : index
    %c0_80 = arith.constant 0 : index
    %207 = vector.load %arg15[%c1_78, %c0_79, %c0_80] : memref<2x128x384xf32, #tpu.memory_space<vmem>>, vector<1x128x384xf32>
    %208 = vector.shape_cast %207 : vector<1x128x384xf32> to vector<128x384xf32>
    %cst_81 = arith.constant dense<0.000000e+00> : vector<8x384xf32>
    %209 = tpu.matmul %172, %208, %cst_81 {dimension_numbers = #tpu.dot_dimension_numbers<[1], [0], [0], [1], [0, 0, 1, 1], [], []>} : vector<8x128xf32>, vector<128x384xf32>, vector<8x384xf32> -> vector<8x384xf32>
    %210 = vector.extract_strided_slice %206 {offsets = [0, 0], sizes = [8, 256], strides = [1, 1]} : vector<8x384xf32> to vector<8x256xf32>
    %211 = vector.extract_strided_slice %209 {offsets = [0, 0], sizes = [8, 256], strides = [1, 1]} : vector<8x384xf32> to vector<8x256xf32>
    %212 = arith.addf %210, %211 : vector<8x256xf32>
    %213 = arith.negf %212 : vector<8x256xf32>
    %214 = math.exp %213 : vector<8x256xf32>
    %cst_82 = arith.constant 1.000000e+00 : f32
    %215 = vector.broadcast %cst_82 : f32 to vector<8x256xf32>
    %216 = arith.addf %215, %214 : vector<8x256xf32>
    %217 = arith.divf %215, %216 : vector<8x256xf32>
    %218 = vector.extract_strided_slice %217 {offsets = [0, 0], sizes = [8, 128], strides = [1, 1]} : vector<8x256xf32> to vector<8x128xf32>
    %219 = vector.extract_strided_slice %217 {offsets = [0, 128], sizes = [8, 128], strides = [1, 1]} : vector<8x256xf32> to vector<8x128xf32>
    %220 = vector.extract_strided_slice %206 {offsets = [0, 256], sizes = [8, 128], strides = [1, 1]} : vector<8x384xf32> to vector<8x128xf32>
    %221 = vector.extract_strided_slice %209 {offsets = [0, 256], sizes = [8, 128], strides = [1, 1]} : vector<8x384xf32> to vector<8x128xf32>
    %222 = arith.addf %221, %62 : vector<8x128xf32>
    %223 = arith.mulf %218, %222 : vector<8x128xf32>
    %224 = arith.addf %220, %223 : vector<8x128xf32>
    %225 = math.tanh %224 : vector<8x128xf32>
    %226 = arith.subf %172, %225 : vector<8x128xf32>
    %227 = arith.mulf %219, %226 : vector<8x128xf32>
    %228 = arith.addf %225, %227 : vector<8x128xf32>
    %c8_i32_83 = arith.constant 8 : i32
    %229 = arith.muli %c2_i32, %c8_i32_83 : i32
    %230 = tpu.assume_multiple %229, 8 : i32
    %231 = arith.index_cast %230 : i32 to index
    %c0_84 = arith.constant 0 : index
    %232 = vector.load %arg14[%231, %c0_84] : memref<64x128xf32, #tpu.memory_space<vmem>>, vector<8x128xf32>
    tpu.vector_store %arg14[%231, %c0_84], %228 {strides = array<i32>} : memref<64x128xf32, #tpu.memory_space<vmem>>, vector<8x128xf32>,
    %c3_i32 = arith.constant 3 : i32
    %c1_i32_85 = arith.constant 1 : i32
    %233 = arith.addi %c3_i32, %c1_i32_85 : i32
    %c8_i32_86 = arith.constant 8 : i32
    %234 = arith.muli %233, %c8_i32_86 : i32
    %235 = tpu.assume_multiple %234, 8 : i32
    %236 = arith.index_cast %235 : i32 to index
    %c0_87 = arith.constant 0 : index
    %237 = vector.load %arg13[%236, %c0_87] : memref<64x384xf32, #tpu.memory_space<vmem>>, vector<8x384xf32>
    %c0_88 = arith.constant 0 : index
    %c0_89 = arith.constant 0 : index
    %238 = vector.load %arg4[%c0_88, %c0_89] : memref<128x384xf32, #tpu.memory_space<vmem>>, vector<128x384xf32>
    %cst_90 = arith.constant dense<0.000000e+00> : vector<8x384xf32>
    %239 = tpu.matmul %202, %238, %cst_90 {dimension_numbers = #tpu.dot_dimension_numbers<[1], [0], [0], [1], [0, 0, 1, 1], [], []>} : vector<8x128xf32>, vector<128x384xf32>, vector<8x384xf32> -> vector<8x384xf32>
    %240 = vector.extract_strided_slice %237 {offsets = [0, 0], sizes = [8, 256], strides = [1, 1]} : vector<8x384xf32> to vector<8x256xf32>
    %241 = vector.extract_strided_slice %239 {offsets = [0, 0], sizes = [8, 256], strides = [1, 1]} : vector<8x384xf32> to vector<8x256xf32>
    %242 = arith.addf %240, %241 : vector<8x256xf32>
    %243 = arith.negf %242 : vector<8x256xf32>
    %244 = math.exp %243 : vector<8x256xf32>
    %cst_91 = arith.constant 1.000000e+00 : f32
    %245 = vector.broadcast %cst_91 : f32 to vector<8x256xf32>
    %246 = arith.addf %245, %244 : vector<8x256xf32>
    %247 = arith.divf %245, %246 : vector<8x256xf32>
    %248 = vector.extract_strided_slice %247 {offsets = [0, 0], sizes = [8, 128], strides = [1, 1]} : vector<8x256xf32> to vector<8x128xf32>
    %249 = vector.extract_strided_slice %247 {offsets = [0, 128], sizes = [8, 128], strides = [1, 1]} : vector<8x256xf32> to vector<8x128xf32>
    %250 = vector.extract_strided_slice %237 {offsets = [0, 256], sizes = [8, 128], strides = [1, 1]} : vector<8x384xf32> to vector<8x128xf32>
    %251 = vector.extract_strided_slice %239 {offsets = [0, 256], sizes = [8, 128], strides = [1, 1]} : vector<8x384xf32> to vector<8x128xf32>
    %252 = arith.addf %251, %30 : vector<8x128xf32>
    %253 = arith.mulf %248, %252 : vector<8x128xf32>
    %254 = arith.addf %250, %253 : vector<8x128xf32>
    %255 = math.tanh %254 : vector<8x128xf32>
    %256 = arith.subf %202, %255 : vector<8x128xf32>
    %257 = arith.mulf %249, %256 : vector<8x128xf32>
    %258 = arith.addf %255, %257 : vector<8x128xf32>
    %c0_92 = arith.constant 0 : index
    %c0_93 = arith.constant 0 : index
    %c0_94 = arith.constant 0 : index
    %259 = vector.load %arg15[%c0_92, %c0_93, %c0_94] : memref<2x128x384xf32, #tpu.memory_space<vmem>>, vector<1x128x384xf32>
    %260 = vector.shape_cast %259 : vector<1x128x384xf32> to vector<128x384xf32>
    %cst_95 = arith.constant dense<0.000000e+00> : vector<8x384xf32>
    %261 = tpu.matmul %202, %260, %cst_95 {dimension_numbers = #tpu.dot_dimension_numbers<[1], [0], [0], [1], [0, 0, 1, 1], [], []>} : vector<8x128xf32>, vector<128x384xf32>, vector<8x384xf32> -> vector<8x384xf32>
    %262 = arith.addf %261, %59 : vector<8x384xf32>
    %c1_96 = arith.constant 1 : index
    %c0_97 = arith.constant 0 : index
    %c0_98 = arith.constant 0 : index
    %263 = vector.load %arg15[%c1_96, %c0_97, %c0_98] : memref<2x128x384xf32, #tpu.memory_space<vmem>>, vector<1x128x384xf32>
    %264 = vector.shape_cast %263 : vector<1x128x384xf32> to vector<128x384xf32>
    %cst_99 = arith.constant dense<0.000000e+00> : vector<8x384xf32>
    %265 = tpu.matmul %228, %264, %cst_99 {dimension_numbers = #tpu.dot_dimension_numbers<[1], [0], [0], [1], [0, 0, 1, 1], [], []>} : vector<8x128xf32>, vector<128x384xf32>, vector<8x384xf32> -> vector<8x384xf32>
    %266 = vector.extract_strided_slice %262 {offsets = [0, 0], sizes = [8, 256], strides = [1, 1]} : vector<8x384xf32> to vector<8x256xf32>
    %267 = vector.extract_strided_slice %265 {offsets = [0, 0], sizes = [8, 256], strides = [1, 1]} : vector<8x384xf32> to vector<8x256xf32>
    %268 = arith.addf %266, %267 : vector<8x256xf32>
    %269 = arith.negf %268 : vector<8x256xf32>
    %270 = math.exp %269 : vector<8x256xf32>
    %cst_100 = arith.constant 1.000000e+00 : f32
    %271 = vector.broadcast %cst_100 : f32 to vector<8x256xf32>
    %272 = arith.addf %271, %270 : vector<8x256xf32>
    %273 = arith.divf %271, %272 : vector<8x256xf32>
    %274 = vector.extract_strided_slice %273 {offsets = [0, 0], sizes = [8, 128], strides = [1, 1]} : vector<8x256xf32> to vector<8x128xf32>
    %275 = vector.extract_strided_slice %273 {offsets = [0, 128], sizes = [8, 128], strides = [1, 1]} : vector<8x256xf32> to vector<8x128xf32>
    %276 = vector.extract_strided_slice %262 {offsets = [0, 256], sizes = [8, 128], strides = [1, 1]} : vector<8x384xf32> to vector<8x128xf32>
    %277 = vector.extract_strided_slice %265 {offsets = [0, 256], sizes = [8, 128], strides = [1, 1]} : vector<8x384xf32> to vector<8x128xf32>
    %278 = arith.addf %277, %62 : vector<8x128xf32>
    %279 = arith.mulf %274, %278 : vector<8x128xf32>
    %280 = arith.addf %276, %279 : vector<8x128xf32>
    %281 = math.tanh %280 : vector<8x128xf32>
    %282 = arith.subf %228, %281 : vector<8x128xf32>
    %283 = arith.mulf %275, %282 : vector<8x128xf32>
    %284 = arith.addf %281, %283 : vector<8x128xf32>
    %c8_i32_101 = arith.constant 8 : i32
    %285 = arith.muli %c3_i32, %c8_i32_101 : i32
    %286 = tpu.assume_multiple %285, 8 : i32
    %287 = arith.index_cast %286 : i32 to index
    %c0_102 = arith.constant 0 : index
    %288 = vector.load %arg14[%287, %c0_102] : memref<64x128xf32, #tpu.memory_space<vmem>>, vector<8x128xf32>
    tpu.vector_store %arg14[%287, %c0_102], %284 {strides = array<i32>} : memref<64x128xf32, #tpu.memory_space<vmem>>, vector<8x128xf32>,
    %c4_i32 = arith.constant 4 : i32
    %c1_i32_103 = arith.constant 1 : i32
    %289 = arith.addi %c4_i32, %c1_i32_103 : i32
    %c8_i32_104 = arith.constant 8 : i32
    %290 = arith.muli %289, %c8_i32_104 : i32
    %291 = tpu.assume_multiple %290, 8 : i32
    %292 = arith.index_cast %291 : i32 to index
    %c0_105 = arith.constant 0 : index
    %293 = vector.load %arg13[%292, %c0_105] : memref<64x384xf32, #tpu.memory_space<vmem>>, vector<8x384xf32>
    %c0_106 = arith.constant 0 : index
    %c0_107 = arith.constant 0 : index
    %294 = vector.load %arg4[%c0_106, %c0_107] : memref<128x384xf32, #tpu.memory_space<vmem>>, vector<128x384xf32>
    %cst_108 = arith.constant dense<0.000000e+00> : vector<8x384xf32>
    %295 = tpu.matmul %258, %294, %cst_108 {dimension_numbers = #tpu.dot_dimension_numbers<[1], [0], [0], [1], [0, 0, 1, 1], [], []>} : vector<8x128xf32>, vector<128x384xf32>, vector<8x384xf32> -> vector<8x384xf32>
    %296 = vector.extract_strided_slice %293 {offsets = [0, 0], sizes = [8, 256], strides = [1, 1]} : vector<8x384xf32> to vector<8x256xf32>
    %297 = vector.extract_strided_slice %295 {offsets = [0, 0], sizes = [8, 256], strides = [1, 1]} : vector<8x384xf32> to vector<8x256xf32>
    %298 = arith.addf %296, %297 : vector<8x256xf32>
    %299 = arith.negf %298 : vector<8x256xf32>
    %300 = math.exp %299 : vector<8x256xf32>
    %cst_109 = arith.constant 1.000000e+00 : f32
    %301 = vector.broadcast %cst_109 : f32 to vector<8x256xf32>
    %302 = arith.addf %301, %300 : vector<8x256xf32>
    %303 = arith.divf %301, %302 : vector<8x256xf32>
    %304 = vector.extract_strided_slice %303 {offsets = [0, 0], sizes = [8, 128], strides = [1, 1]} : vector<8x256xf32> to vector<8x128xf32>
    %305 = vector.extract_strided_slice %303 {offsets = [0, 128], sizes = [8, 128], strides = [1, 1]} : vector<8x256xf32> to vector<8x128xf32>
    %306 = vector.extract_strided_slice %293 {offsets = [0, 256], sizes = [8, 128], strides = [1, 1]} : vector<8x384xf32> to vector<8x128xf32>
    %307 = vector.extract_strided_slice %295 {offsets = [0, 256], sizes = [8, 128], strides = [1, 1]} : vector<8x384xf32> to vector<8x128xf32>
    %308 = arith.addf %307, %30 : vector<8x128xf32>
    %309 = arith.mulf %304, %308 : vector<8x128xf32>
    %310 = arith.addf %306, %309 : vector<8x128xf32>
    %311 = math.tanh %310 : vector<8x128xf32>
    %312 = arith.subf %258, %311 : vector<8x128xf32>
    %313 = arith.mulf %305, %312 : vector<8x128xf32>
    %314 = arith.addf %311, %313 : vector<8x128xf32>
    %c0_110 = arith.constant 0 : index
    %c0_111 = arith.constant 0 : index
    %c0_112 = arith.constant 0 : index
    %315 = vector.load %arg15[%c0_110, %c0_111, %c0_112] : memref<2x128x384xf32, #tpu.memory_space<vmem>>, vector<1x128x384xf32>
    %316 = vector.shape_cast %315 : vector<1x128x384xf32> to vector<128x384xf32>
    %cst_113 = arith.constant dense<0.000000e+00> : vector<8x384xf32>
    %317 = tpu.matmul %258, %316, %cst_113 {dimension_numbers = #tpu.dot_dimension_numbers<[1], [0], [0], [1], [0, 0, 1, 1], [], []>} : vector<8x128xf32>, vector<128x384xf32>, vector<8x384xf32> -> vector<8x384xf32>
    %318 = arith.addf %317, %59 : vector<8x384xf32>
    %c1_114 = arith.constant 1 : index
    %c0_115 = arith.constant 0 : index
    %c0_116 = arith.constant 0 : index
    %319 = vector.load %arg15[%c1_114, %c0_115, %c0_116] : memref<2x128x384xf32, #tpu.memory_space<vmem>>, vector<1x128x384xf32>
    %320 = vector.shape_cast %319 : vector<1x128x384xf32> to vector<128x384xf32>
    %cst_117 = arith.constant dense<0.000000e+00> : vector<8x384xf32>
    %321 = tpu.matmul %284, %320, %cst_117 {dimension_numbers = #tpu.dot_dimension_numbers<[1], [0], [0], [1], [0, 0, 1, 1], [], []>} : vector<8x128xf32>, vector<128x384xf32>, vector<8x384xf32> -> vector<8x384xf32>
    %322 = vector.extract_strided_slice %318 {offsets = [0, 0], sizes = [8, 256], strides = [1, 1]} : vector<8x384xf32> to vector<8x256xf32>
    %323 = vector.extract_strided_slice %321 {offsets = [0, 0], sizes = [8, 256], strides = [1, 1]} : vector<8x384xf32> to vector<8x256xf32>
    %324 = arith.addf %322, %323 : vector<8x256xf32>
    %325 = arith.negf %324 : vector<8x256xf32>
    %326 = math.exp %325 : vector<8x256xf32>
    %cst_118 = arith.constant 1.000000e+00 : f32
    %327 = vector.broadcast %cst_118 : f32 to vector<8x256xf32>
    %328 = arith.addf %327, %326 : vector<8x256xf32>
    %329 = arith.divf %327, %328 : vector<8x256xf32>
    %330 = vector.extract_strided_slice %329 {offsets = [0, 0], sizes = [8, 128], strides = [1, 1]} : vector<8x256xf32> to vector<8x128xf32>
    %331 = vector.extract_strided_slice %329 {offsets = [0, 128], sizes = [8, 128], strides = [1, 1]} : vector<8x256xf32> to vector<8x128xf32>
    %332 = vector.extract_strided_slice %318 {offsets = [0, 256], sizes = [8, 128], strides = [1, 1]} : vector<8x384xf32> to vector<8x128xf32>
    %333 = vector.extract_strided_slice %321 {offsets = [0, 256], sizes = [8, 128], strides = [1, 1]} : vector<8x384xf32> to vector<8x128xf32>
    %334 = arith.addf %333, %62 : vector<8x128xf32>
    %335 = arith.mulf %330, %334 : vector<8x128xf32>
    %336 = arith.addf %332, %335 : vector<8x128xf32>
    %337 = math.tanh %336 : vector<8x128xf32>
    %338 = arith.subf %284, %337 : vector<8x128xf32>
    %339 = arith.mulf %331, %338 : vector<8x128xf32>
    %340 = arith.addf %337, %339 : vector<8x128xf32>
    %c8_i32_119 = arith.constant 8 : i32
    %341 = arith.muli %c4_i32, %c8_i32_119 : i32
    %342 = tpu.assume_multiple %341, 8 : i32
    %343 = arith.index_cast %342 : i32 to index
    %c0_120 = arith.constant 0 : index
    %344 = vector.load %arg14[%343, %c0_120] : memref<64x128xf32, #tpu.memory_space<vmem>>, vector<8x128xf32>
    tpu.vector_store %arg14[%343, %c0_120], %340 {strides = array<i32>} : memref<64x128xf32, #tpu.memory_space<vmem>>, vector<8x128xf32>,
    %c5_i32 = arith.constant 5 : i32
    %c1_i32_121 = arith.constant 1 : i32
    %345 = arith.addi %c5_i32, %c1_i32_121 : i32
    %c8_i32_122 = arith.constant 8 : i32
    %346 = arith.muli %345, %c8_i32_122 : i32
    %347 = tpu.assume_multiple %346, 8 : i32
    %348 = arith.index_cast %347 : i32 to index
    %c0_123 = arith.constant 0 : index
    %349 = vector.load %arg13[%348, %c0_123] : memref<64x384xf32, #tpu.memory_space<vmem>>, vector<8x384xf32>
    %c0_124 = arith.constant 0 : index
    %c0_125 = arith.constant 0 : index
    %350 = vector.load %arg4[%c0_124, %c0_125] : memref<128x384xf32, #tpu.memory_space<vmem>>, vector<128x384xf32>
    %cst_126 = arith.constant dense<0.000000e+00> : vector<8x384xf32>
    %351 = tpu.matmul %314, %350, %cst_126 {dimension_numbers = #tpu.dot_dimension_numbers<[1], [0], [0], [1], [0, 0, 1, 1], [], []>} : vector<8x128xf32>, vector<128x384xf32>, vector<8x384xf32> -> vector<8x384xf32>
    %352 = vector.extract_strided_slice %349 {offsets = [0, 0], sizes = [8, 256], strides = [1, 1]} : vector<8x384xf32> to vector<8x256xf32>
    %353 = vector.extract_strided_slice %351 {offsets = [0, 0], sizes = [8, 256], strides = [1, 1]} : vector<8x384xf32> to vector<8x256xf32>
    %354 = arith.addf %352, %353 : vector<8x256xf32>
    %355 = arith.negf %354 : vector<8x256xf32>
    %356 = math.exp %355 : vector<8x256xf32>
    %cst_127 = arith.constant 1.000000e+00 : f32
    %357 = vector.broadcast %cst_127 : f32 to vector<8x256xf32>
    %358 = arith.addf %357, %356 : vector<8x256xf32>
    %359 = arith.divf %357, %358 : vector<8x256xf32>
    %360 = vector.extract_strided_slice %359 {offsets = [0, 0], sizes = [8, 128], strides = [1, 1]} : vector<8x256xf32> to vector<8x128xf32>
    %361 = vector.extract_strided_slice %359 {offsets = [0, 128], sizes = [8, 128], strides = [1, 1]} : vector<8x256xf32> to vector<8x128xf32>
    %362 = vector.extract_strided_slice %349 {offsets = [0, 256], sizes = [8, 128], strides = [1, 1]} : vector<8x384xf32> to vector<8x128xf32>
    %363 = vector.extract_strided_slice %351 {offsets = [0, 256], sizes = [8, 128], strides = [1, 1]} : vector<8x384xf32> to vector<8x128xf32>
    %364 = arith.addf %363, %30 : vector<8x128xf32>
    %365 = arith.mulf %360, %364 : vector<8x128xf32>
    %366 = arith.addf %362, %365 : vector<8x128xf32>
    %367 = math.tanh %366 : vector<8x128xf32>
    %368 = arith.subf %314, %367 : vector<8x128xf32>
    %369 = arith.mulf %361, %368 : vector<8x128xf32>
    %370 = arith.addf %367, %369 : vector<8x128xf32>
    %c0_128 = arith.constant 0 : index
    %c0_129 = arith.constant 0 : index
    %c0_130 = arith.constant 0 : index
    %371 = vector.load %arg15[%c0_128, %c0_129, %c0_130] : memref<2x128x384xf32, #tpu.memory_space<vmem>>, vector<1x128x384xf32>
    %372 = vector.shape_cast %371 : vector<1x128x384xf32> to vector<128x384xf32>
    %cst_131 = arith.constant dense<0.000000e+00> : vector<8x384xf32>
    %373 = tpu.matmul %314, %372, %cst_131 {dimension_numbers = #tpu.dot_dimension_numbers<[1], [0], [0], [1], [0, 0, 1, 1], [], []>} : vector<8x128xf32>, vector<128x384xf32>, vector<8x384xf32> -> vector<8x384xf32>
    %374 = arith.addf %373, %59 : vector<8x384xf32>
    %c1_132 = arith.constant 1 : index
    %c0_133 = arith.constant 0 : index
    %c0_134 = arith.constant 0 : index
    %375 = vector.load %arg15[%c1_132, %c0_133, %c0_134] : memref<2x128x384xf32, #tpu.memory_space<vmem>>, vector<1x128x384xf32>
    %376 = vector.shape_cast %375 : vector<1x128x384xf32> to vector<128x384xf32>
    %cst_135 = arith.constant dense<0.000000e+00> : vector<8x384xf32>
    %377 = tpu.matmul %340, %376, %cst_135 {dimension_numbers = #tpu.dot_dimension_numbers<[1], [0], [0], [1], [0, 0, 1, 1], [], []>} : vector<8x128xf32>, vector<128x384xf32>, vector<8x384xf32> -> vector<8x384xf32>
    %378 = vector.extract_strided_slice %374 {offsets = [0, 0], sizes = [8, 256], strides = [1, 1]} : vector<8x384xf32> to vector<8x256xf32>
    %379 = vector.extract_strided_slice %377 {offsets = [0, 0], sizes = [8, 256], strides = [1, 1]} : vector<8x384xf32> to vector<8x256xf32>
    %380 = arith.addf %378, %379 : vector<8x256xf32>
    %381 = arith.negf %380 : vector<8x256xf32>
    %382 = math.exp %381 : vector<8x256xf32>
    %cst_136 = arith.constant 1.000000e+00 : f32
    %383 = vector.broadcast %cst_136 : f32 to vector<8x256xf32>
    %384 = arith.addf %383, %382 : vector<8x256xf32>
    %385 = arith.divf %383, %384 : vector<8x256xf32>
    %386 = vector.extract_strided_slice %385 {offsets = [0, 0], sizes = [8, 128], strides = [1, 1]} : vector<8x256xf32> to vector<8x128xf32>
    %387 = vector.extract_strided_slice %385 {offsets = [0, 128], sizes = [8, 128], strides = [1, 1]} : vector<8x256xf32> to vector<8x128xf32>
    %388 = vector.extract_strided_slice %374 {offsets = [0, 256], sizes = [8, 128], strides = [1, 1]} : vector<8x384xf32> to vector<8x128xf32>
    %389 = vector.extract_strided_slice %377 {offsets = [0, 256], sizes = [8, 128], strides = [1, 1]} : vector<8x384xf32> to vector<8x128xf32>
    %390 = arith.addf %389, %62 : vector<8x128xf32>
    %391 = arith.mulf %386, %390 : vector<8x128xf32>
    %392 = arith.addf %388, %391 : vector<8x128xf32>
    %393 = math.tanh %392 : vector<8x128xf32>
    %394 = arith.subf %340, %393 : vector<8x128xf32>
    %395 = arith.mulf %387, %394 : vector<8x128xf32>
    %396 = arith.addf %393, %395 : vector<8x128xf32>
    %c8_i32_137 = arith.constant 8 : i32
    %397 = arith.muli %c5_i32, %c8_i32_137 : i32
    %398 = tpu.assume_multiple %397, 8 : i32
    %399 = arith.index_cast %398 : i32 to index
    %c0_138 = arith.constant 0 : index
    %400 = vector.load %arg14[%399, %c0_138] : memref<64x128xf32, #tpu.memory_space<vmem>>, vector<8x128xf32>
    tpu.vector_store %arg14[%399, %c0_138], %396 {strides = array<i32>} : memref<64x128xf32, #tpu.memory_space<vmem>>, vector<8x128xf32>,
    %c6_i32 = arith.constant 6 : i32
    %c1_i32_139 = arith.constant 1 : i32
    %401 = arith.addi %c6_i32, %c1_i32_139 : i32
    %c8_i32_140 = arith.constant 8 : i32
    %402 = arith.muli %401, %c8_i32_140 : i32
    %403 = tpu.assume_multiple %402, 8 : i32
    %404 = arith.index_cast %403 : i32 to index
    %c0_141 = arith.constant 0 : index
    %405 = vector.load %arg13[%404, %c0_141] : memref<64x384xf32, #tpu.memory_space<vmem>>, vector<8x384xf32>
    %c0_142 = arith.constant 0 : index
    %c0_143 = arith.constant 0 : index
    %406 = vector.load %arg4[%c0_142, %c0_143] : memref<128x384xf32, #tpu.memory_space<vmem>>, vector<128x384xf32>
    %cst_144 = arith.constant dense<0.000000e+00> : vector<8x384xf32>
    %407 = tpu.matmul %370, %406, %cst_144 {dimension_numbers = #tpu.dot_dimension_numbers<[1], [0], [0], [1], [0, 0, 1, 1], [], []>} : vector<8x128xf32>, vector<128x384xf32>, vector<8x384xf32> -> vector<8x384xf32>
    %408 = vector.extract_strided_slice %405 {offsets = [0, 0], sizes = [8, 256], strides = [1, 1]} : vector<8x384xf32> to vector<8x256xf32>
    %409 = vector.extract_strided_slice %407 {offsets = [0, 0], sizes = [8, 256], strides = [1, 1]} : vector<8x384xf32> to vector<8x256xf32>
    %410 = arith.addf %408, %409 : vector<8x256xf32>
    %411 = arith.negf %410 : vector<8x256xf32>
    %412 = math.exp %411 : vector<8x256xf32>
    %cst_145 = arith.constant 1.000000e+00 : f32
    %413 = vector.broadcast %cst_145 : f32 to vector<8x256xf32>
    %414 = arith.addf %413, %412 : vector<8x256xf32>
    %415 = arith.divf %413, %414 : vector<8x256xf32>
    %416 = vector.extract_strided_slice %415 {offsets = [0, 0], sizes = [8, 128], strides = [1, 1]} : vector<8x256xf32> to vector<8x128xf32>
    %417 = vector.extract_strided_slice %415 {offsets = [0, 128], sizes = [8, 128], strides = [1, 1]} : vector<8x256xf32> to vector<8x128xf32>
    %418 = vector.extract_strided_slice %405 {offsets = [0, 256], sizes = [8, 128], strides = [1, 1]} : vector<8x384xf32> to vector<8x128xf32>
    %419 = vector.extract_strided_slice %407 {offsets = [0, 256], sizes = [8, 128], strides = [1, 1]} : vector<8x384xf32> to vector<8x128xf32>
    %420 = arith.addf %419, %30 : vector<8x128xf32>
    %421 = arith.mulf %416, %420 : vector<8x128xf32>
    %422 = arith.addf %418, %421 : vector<8x128xf32>
    %423 = math.tanh %422 : vector<8x128xf32>
    %424 = arith.subf %370, %423 : vector<8x128xf32>
    %425 = arith.mulf %417, %424 : vector<8x128xf32>
    %426 = arith.addf %423, %425 : vector<8x128xf32>
    %c0_146 = arith.constant 0 : index
    %c0_147 = arith.constant 0 : index
    %c0_148 = arith.constant 0 : index
    %427 = vector.load %arg15[%c0_146, %c0_147, %c0_148] : memref<2x128x384xf32, #tpu.memory_space<vmem>>, vector<1x128x384xf32>
    %428 = vector.shape_cast %427 : vector<1x128x384xf32> to vector<128x384xf32>
    %cst_149 = arith.constant dense<0.000000e+00> : vector<8x384xf32>
    %429 = tpu.matmul %370, %428, %cst_149 {dimension_numbers = #tpu.dot_dimension_numbers<[1], [0], [0], [1], [0, 0, 1, 1], [], []>} : vector<8x128xf32>, vector<128x384xf32>, vector<8x384xf32> -> vector<8x384xf32>
    %430 = arith.addf %429, %59 : vector<8x384xf32>
    %c1_150 = arith.constant 1 : index
    %c0_151 = arith.constant 0 : index
    %c0_152 = arith.constant 0 : index
    %431 = vector.load %arg15[%c1_150, %c0_151, %c0_152] : memref<2x128x384xf32, #tpu.memory_space<vmem>>, vector<1x128x384xf32>
    %432 = vector.shape_cast %431 : vector<1x128x384xf32> to vector<128x384xf32>
    %cst_153 = arith.constant dense<0.000000e+00> : vector<8x384xf32>
    %433 = tpu.matmul %396, %432, %cst_153 {dimension_numbers = #tpu.dot_dimension_numbers<[1], [0], [0], [1], [0, 0, 1, 1], [], []>} : vector<8x128xf32>, vector<128x384xf32>, vector<8x384xf32> -> vector<8x384xf32>
    %434 = vector.extract_strided_slice %430 {offsets = [0, 0], sizes = [8, 256], strides = [1, 1]} : vector<8x384xf32> to vector<8x256xf32>
    %435 = vector.extract_strided_slice %433 {offsets = [0, 0], sizes = [8, 256], strides = [1, 1]} : vector<8x384xf32> to vector<8x256xf32>
    %436 = arith.addf %434, %435 : vector<8x256xf32>
    %437 = arith.negf %436 : vector<8x256xf32>
    %438 = math.exp %437 : vector<8x256xf32>
    %cst_154 = arith.constant 1.000000e+00 : f32
    %439 = vector.broadcast %cst_154 : f32 to vector<8x256xf32>
    %440 = arith.addf %439, %438 : vector<8x256xf32>
    %441 = arith.divf %439, %440 : vector<8x256xf32>
    %442 = vector.extract_strided_slice %441 {offsets = [0, 0], sizes = [8, 128], strides = [1, 1]} : vector<8x256xf32> to vector<8x128xf32>
    %443 = vector.extract_strided_slice %441 {offsets = [0, 128], sizes = [8, 128], strides = [1, 1]} : vector<8x256xf32> to vector<8x128xf32>
    %444 = vector.extract_strided_slice %430 {offsets = [0, 256], sizes = [8, 128], strides = [1, 1]} : vector<8x384xf32> to vector<8x128xf32>
    %445 = vector.extract_strided_slice %433 {offsets = [0, 256], sizes = [8, 128], strides = [1, 1]} : vector<8x384xf32> to vector<8x128xf32>
    %446 = arith.addf %445, %62 : vector<8x128xf32>
    %447 = arith.mulf %442, %446 : vector<8x128xf32>
    %448 = arith.addf %444, %447 : vector<8x128xf32>
    %449 = math.tanh %448 : vector<8x128xf32>
    %450 = arith.subf %396, %449 : vector<8x128xf32>
    %451 = arith.mulf %443, %450 : vector<8x128xf32>
    %452 = arith.addf %449, %451 : vector<8x128xf32>
    %c8_i32_155 = arith.constant 8 : i32
    %453 = arith.muli %c6_i32, %c8_i32_155 : i32
    %454 = tpu.assume_multiple %453, 8 : i32
    %455 = arith.index_cast %454 : i32 to index
    %c0_156 = arith.constant 0 : index
    %456 = vector.load %arg14[%455, %c0_156] : memref<64x128xf32, #tpu.memory_space<vmem>>, vector<8x128xf32>
    tpu.vector_store %arg14[%455, %c0_156], %452 {strides = array<i32>} : memref<64x128xf32, #tpu.memory_space<vmem>>, vector<8x128xf32>,
    %c7_i32 = arith.constant 7 : i32
    %c0_157 = arith.constant 0 : index
    %c0_158 = arith.constant 0 : index
    %c0_159 = arith.constant 0 : index
    %457 = vector.load %arg15[%c0_157, %c0_158, %c0_159] : memref<2x128x384xf32, #tpu.memory_space<vmem>>, vector<1x128x384xf32>
    %458 = vector.shape_cast %457 : vector<1x128x384xf32> to vector<128x384xf32>
    %cst_160 = arith.constant dense<0.000000e+00> : vector<8x384xf32>
    %459 = tpu.matmul %426, %458, %cst_160 {dimension_numbers = #tpu.dot_dimension_numbers<[1], [0], [0], [1], [0, 0, 1, 1], [], []>} : vector<8x128xf32>, vector<128x384xf32>, vector<8x384xf32> -> vector<8x384xf32>
    %460 = arith.addf %459, %59 : vector<8x384xf32>
    %c1_161 = arith.constant 1 : index
    %c0_162 = arith.constant 0 : index
    %c0_163 = arith.constant 0 : index
    %461 = vector.load %arg15[%c1_161, %c0_162, %c0_163] : memref<2x128x384xf32, #tpu.memory_space<vmem>>, vector<1x128x384xf32>
    %462 = vector.shape_cast %461 : vector<1x128x384xf32> to vector<128x384xf32>
    %cst_164 = arith.constant dense<0.000000e+00> : vector<8x384xf32>
    %463 = tpu.matmul %452, %462, %cst_164 {dimension_numbers = #tpu.dot_dimension_numbers<[1], [0], [0], [1], [0, 0, 1, 1], [], []>} : vector<8x128xf32>, vector<128x384xf32>, vector<8x384xf32> -> vector<8x384xf32>
    %464 = vector.extract_strided_slice %460 {offsets = [0, 0], sizes = [8, 256], strides = [1, 1]} : vector<8x384xf32> to vector<8x256xf32>
    %465 = vector.extract_strided_slice %463 {offsets = [0, 0], sizes = [8, 256], strides = [1, 1]} : vector<8x384xf32> to vector<8x256xf32>
    %466 = arith.addf %464, %465 : vector<8x256xf32>
    %467 = arith.negf %466 : vector<8x256xf32>
    %468 = math.exp %467 : vector<8x256xf32>
    %cst_165 = arith.constant 1.000000e+00 : f32
    %469 = vector.broadcast %cst_165 : f32 to vector<8x256xf32>
    %470 = arith.addf %469, %468 : vector<8x256xf32>
    %471 = arith.divf %469, %470 : vector<8x256xf32>
    %472 = vector.extract_strided_slice %471 {offsets = [0, 0], sizes = [8, 128], strides = [1, 1]} : vector<8x256xf32> to vector<8x128xf32>
    %473 = vector.extract_strided_slice %471 {offsets = [0, 128], sizes = [8, 128], strides = [1, 1]} : vector<8x256xf32> to vector<8x128xf32>
    %474 = vector.extract_strided_slice %460 {offsets = [0, 256], sizes = [8, 128], strides = [1, 1]} : vector<8x384xf32> to vector<8x128xf32>
    %475 = vector.extract_strided_slice %463 {offsets = [0, 256], sizes = [8, 128], strides = [1, 1]} : vector<8x384xf32> to vector<8x128xf32>
    %476 = arith.addf %475, %62 : vector<8x128xf32>
    %477 = arith.mulf %472, %476 : vector<8x128xf32>
    %478 = arith.addf %474, %477 : vector<8x128xf32>
    %479 = math.tanh %478 : vector<8x128xf32>
    %480 = arith.subf %452, %479 : vector<8x128xf32>
    %481 = arith.mulf %473, %480 : vector<8x128xf32>
    %482 = arith.addf %479, %481 : vector<8x128xf32>
    %c56_i32 = arith.constant 56 : i32
    %483 = tpu.assume_multiple %c56_i32, 8 : i32
    %484 = arith.index_cast %483 : i32 to index
    %c0_166 = arith.constant 0 : index
    %485 = vector.load %arg14[%484, %c0_166] : memref<64x128xf32, #tpu.memory_space<vmem>>, vector<8x128xf32>
    tpu.vector_store %arg14[%484, %c0_166], %482 {strides = array<i32>} : memref<64x128xf32, #tpu.memory_space<vmem>>, vector<8x128xf32>,
    %c0_167 = arith.constant 0 : index
    %c0_168 = arith.constant 0 : index
    %c0_169 = arith.constant 0 : index
    %486 = vector.load %arg12[%c0_167, %c0_168, %c0_169] : memref<2x8x128xf32, #tpu.memory_space<vmem>>, vector<1x8x128xf32>
    %487 = vector.shape_cast %486 : vector<1x8x128xf32> to vector<8x128xf32>
    %488 = vector.shape_cast %426 : vector<8x128xf32> to vector<1x8x128xf32>
    tpu.vector_store %arg12[%c0_167, %c0_168, %c0_169], %488 {strides = array<i32>} : memref<2x8x128xf32, #tpu.memory_space<vmem>>, vector<1x8x128xf32>,
    %c1_170 = arith.constant 1 : index
    %c0_171 = arith.constant 0 : index
    %c0_172 = arith.constant 0 : index
    %489 = vector.load %arg12[%c1_170, %c0_171, %c0_172] : memref<2x8x128xf32, #tpu.memory_space<vmem>>, vector<1x8x128xf32>
    %490 = vector.shape_cast %489 : vector<1x8x128xf32> to vector<8x128xf32>
    %491 = vector.shape_cast %482 : vector<8x128xf32> to vector<1x8x128xf32>
    tpu.vector_store %arg12[%c1_170, %c0_171, %c0_172], %491 {strides = array<i32>} : memref<2x8x128xf32, #tpu.memory_space<vmem>>, vector<1x8x128xf32>,
    %c0_173 = arith.constant 0 : index
    %c0_174 = arith.constant 0 : index
    %492 = vector.load %arg14[%c0_173, %c0_174] : memref<64x128xf32, #tpu.memory_space<vmem>>, vector<64x128xf32>
    %c0_175 = arith.constant 0 : index
    %c0_176 = arith.constant 0 : index
    %493 = vector.load %arg2[%c0_175, %c0_176] : memref<256x128xf32, #tpu.memory_space<vmem>>, vector<256x128xf32>
    %cst_177 = arith.constant dense<0.000000e+00> : vector<64x256xf32>
    %494 = tpu.matmul %492, %493, %cst_177 {dimension_numbers = #tpu.dot_dimension_numbers<[1], [1], [0], [0], [0, 0, 1, 0], [], []>} : vector<64x128xf32>, vector<256x128xf32>, vector<64x256xf32> -> vector<64x256xf32>
    %c0_178 = arith.constant 0 : index
    %c0_179 = arith.constant 0 : index
    %495 = vector.load %arg10[%c0_178, %c0_179] : memref<1x256xf32, #tpu.memory_space<vmem>>, vector<1x256xf32>
    %496 = vector.broadcast %495 : vector<1x256xf32> to vector<64x256xf32>
    %497 = arith.addf %494, %496 : vector<64x256xf32>
    %c0_180 = arith.constant 0 : index
    %c0_181 = arith.constant 0 : index
    %498 = vector.load %arg11[%c0_180, %c0_181] : memref<64x256xf32, #tpu.memory_space<vmem>>, vector<64x256xf32>
    tpu.vector_store %arg11[%c0_180, %c0_181], %497 {strides = array<i32>} : memref<64x256xf32, #tpu.memory_space<vmem>>, vector<64x256xf32>,
    return
  }
}

</mosaic_0001>

<bundles_post_ra>
// kernel: dgru_forward.1
= control target key start
LH: loop header
LB: loop body
LE: loop exit
PB: predicated region body
PF: predicated region fallthrough
CT: control target
= control target key end

     0   :  { %18 = vsyncpa [#allocation7], 0  ;;  %s12430_s0 = inlined_call_operand.vmem [shape: s32[64,1], index: 0, kind: input, shape index: {}]   ;;  %s12431_s1 = inlined_call_operand.vmem [shape: f32[2,8,128], index: 1, kind: input, shape index: {}]   ;;  %s12432_s2 = inlined_call_operand.vmem [shape: f32[256,128], index: 2, kind: input, shape index: {}]   ;;  %s12433_s3 = inlined_call_operand.vmem [shape: f32[128,384], index: 3, kind: input, shape index: {}]   ;;  %s12434_s4 = inlined_call_operand.vmem [shape: f32[128,384], index: 4, kind: input, shape index: {}]   ;;  %s12435_s5 = inlined_call_operand.vmem [shape: f32[1,384], index: 5, kind: input, shape index: {}]   ;;  %s12436_s6 = inlined_call_operand.vmem [shape: f32[1,128], index: 6, kind: input, shape index: {}]   ;;  %s12437_s7 = inlined_call_operand.vmem [shape: f32[2,128,384], index: 7, kind: input, shape index: {}]   ;;  %s12438_s8 = inlined_call_operand.vmem [shape: f32[1,384], index: 8, kind: input, shape index: {}]   ;;  %s12439_s9 = inlined_call_operand.vmem [shape: f32[1,128], index: 9, kind: input, shape index: {}]   ;;  %s12440_s10 = inlined_call_operand.vmem [shape: f32[1,256], index: 10, kind: input, shape index: {}]   ;;  %s12441_s11 = inlined_call_operand.hbm [shape: f32[64,256], index: 11, kind: output, shape index: {0}]   ;;  %s12442_s12 = inlined_call_operand.hbm [shape: f32[2,8,128], index: 12, kind: output, shape index: {1}]  }
   0x1   :  { %19 = vsyncpa [#allocation9], 0  ;;  %v9499_v0 = vld [vmem:[%s12437_s7] sm:$0xff]  ;;  %v9504_v1 = vld [vmem:[%s12437_s7 + $0x8] sm:$0xff] }
   0x2   :  { %v9509_v2 = vld [vmem:[%s12437_s7 + $0x10] sm:$0xff]  ;;  %v9514_v3 = vld [vmem:[%s12437_s7 + $0x18] sm:$0xff]  ;;  %v9519_v4 = vld [vmem:[%s12437_s7 + $0x20] sm:$0xff] }
   0x3   :  { %v9524_v5 = vld [vmem:[%s12437_s7 + $0x28] sm:$0xff]  ;;  %v9529_v6 = vld [vmem:[%s12437_s7 + $0x30] sm:$0xff]  ;;  %v9534_v7 = vld [vmem:[%s12437_s7 + $0x38] sm:$0xff] }
   0x4   :  { %v9539_v8 = vld [vmem:[%s12437_s7 + $0x40] sm:$0xff]  ;;  %v9544_v9 = vld [vmem:[%s12437_s7 + $0x48] sm:$0xff]  ;;  %v9549_v10 = vld [vmem:[%s12437_s7 + $0x50] sm:$0xff] }
   0x5   :  { %v9554_v11 = vld [vmem:[%s12437_s7 + $0x58] sm:$0xff]  ;;  %v9559_v12 = vld [vmem:[%s12437_s7 + $0x60] sm:$0xff]  ;;  %v9564_v13 = vld [vmem:[%s12437_s7 + $0x68] sm:$0xff] }
   0x6   :  { %v9569_v14 = vld [vmem:[%s12437_s7 + $0x70] sm:$0xff]  ;;  %v9574_v15 = vld [vmem:[%s12437_s7 + $0x78] sm:$0xff]  ;;  %v9579_v16 = vld [vmem:[%s12437_s7 + $0x80] sm:$0xff] }
   0x7   :  { %v9584_v17 = vld [vmem:[%s12437_s7 + $0x88] sm:$0xff]  ;;  %v9589_v18 = vld [vmem:[%s12437_s7 + $0x90] sm:$0xff]  ;;  %v9594_v19 = vld [vmem:[%s12437_s7 + $0x98] sm:$0xff] }
   0x8   :  { %v9599_v20 = vld [vmem:[%s12437_s7 + $0xa0] sm:$0xff]  ;;  %v9604_v21 = vld [vmem:[%s12437_s7 + $0xa8] sm:$0xff]  ;;  %v9609_v22 = vld [vmem:[%s12437_s7 + $0xb0] sm:$0xff] }
   0x9   :  { %12584 = vst [vmem:[#allocation14_spill] sm:$0xff] %v9599_v20  ;;  %v9614_v23 = vld [vmem:[%s12437_s7 + $0xb8] sm:$0xff]  ;;  %v9619_v24 = vld [vmem:[%s12437_s7 + $0xc0] sm:$0xff]  ;;  %v9624_v25 = vld [vmem:[%s12437_s7 + $0xc8] sm:$0xff] }
   0xa   :  { %12585 = vst [vmem:[#allocation15_spill] sm:$0xff] %v9614_v23  ;;  %v9629_v26 = vld [vmem:[%s12437_s7 + $0xd0] sm:$0xff]  ;;  %v9634_v27 = vld [vmem:[%s12437_s7 + $0xd8] sm:$0xff]  ;;  %v9639_v28 = vld [vmem:[%s12437_s7 + $0xe0] sm:$0xff] }
   0xb   :  { %12586 = vst [vmem:[#allocation16_spill] sm:$0xff] %v9629_v26  ;;  %v9644_v29 = vld [vmem:[%s12437_s7 + $0xe8] sm:$0xff]  ;;  %v9649_v30 = vld [vmem:[%s12437_s7 + $0xf0] sm:$0xff]  ;;  %v9654_v31 = vld [vmem:[%s12437_s7 + $0xf8] sm:$0xff] }
   0xc   :  { %12587 = vst [vmem:[#allocation17_spill] sm:$0xff] %v9644_v29  ;;  %12588 = vst [vmem:[#allocation18_spill] sm:$0xff] %v9649_v30  ;;  %v9659_v32 = vld [vmem:[%s12437_s7 + $0x100] sm:$0xff]  ;;  %v9664_v33 = vld [vmem:[%s12437_s7 + $0x108] sm:$0xff] }
   0xd   :  { %12589 = vst [vmem:[#allocation19_spill] sm:$0xff] %v9659_v32  ;;  %12590 = vst [vmem:[#allocation20_spill] sm:$0xff] %v9664_v33  ;;  %v9669_v34 = vld [vmem:[%s12437_s7 + $0x110] sm:$0xff]  ;;  %v9674_v35 = vld [vmem:[%s12437_s7 + $0x118] sm:$0xff] }
   0xe   :  { %12591 = vst [vmem:[#allocation21_spill] sm:$0xff] %v9674_v35  ;;  %v9679_v36 = vld [vmem:[%s12437_s7 + $0x120] sm:$0xff]  ;;  %v9684_v37 = vld [vmem:[%s12437_s7 + $0x128] sm:$0xff]  ;;  %v9689_v38 = vld [vmem:[%s12437_s7 + $0x130] sm:$0xff] }
   0xf   :  { %12592 = vst [vmem:[#allocation22_spill] sm:$0xff] %v9679_v36  ;;  %12593 = vst [vmem:[#allocation23_spill] sm:$0xff] %v9684_v37  ;;  %v9694_v39 = vld [vmem:[%s12437_s7 + $0x138] sm:$0xff]  ;;  %v9699_v40 = vld [vmem:[%s12437_s7 + $0x140] sm:$0xff] }
  0x10   :  { %12594 = vst [vmem:[#allocation24_spill] sm:$0xff] %v9689_v38  ;;  %12595 = vst [vmem:[#allocation25_spill] sm:$0xff] %v9694_v39  ;;  %v9704_v41 = vld [vmem:[%s12437_s7 + $0x148] sm:$0xff]  ;;  %v9709_v42 = vld [vmem:[%s12437_s7 + $0x150] sm:$0xff] }
  0x11   :  { %12596 = vst [vmem:[#allocation26_spill] sm:$0xff] %v9699_v40  ;;  %12597 = vst [vmem:[#allocation27_spill] sm:$0xff] %v9704_v41  ;;  %v9714_v43 = vld [vmem:[%s12437_s7 + $0x158] sm:$0xff]  ;;  %v9719_v44 = vld [vmem:[%s12437_s7 + $0x160] sm:$0xff] }
  0x12   :  { %12598 = vst [vmem:[#allocation28_spill] sm:$0xff] %v9709_v42  ;;  %12599 = vst [vmem:[#allocation29_spill] sm:$0xff] %v9714_v43  ;;  %v9724_v45 = vld [vmem:[%s12437_s7 + $0x168] sm:$0xff]  ;;  %v9729_v46 = vld [vmem:[%s12437_s7 + $0x170] sm:$0xff] }
  0x13   :  { %12600 = vst [vmem:[#allocation30_spill] sm:$0xff] %v9719_v44  ;;  %12601 = vst [vmem:[#allocation31_spill] sm:$0xff] %v9724_v45  ;;  %v9734_v47 = vld [vmem:[%s12437_s7 + $0x178] sm:$0xff]  ;;  %v9739_v48 = vld [vmem:[%s12437_s7 + $0x180] sm:$0xff] }
  0x14   :  { %12602 = vst [vmem:[#allocation32_spill] sm:$0xff] %v9729_v46  ;;  %12603 = vst [vmem:[#allocation33_spill] sm:$0xff] %v9734_v47  ;;  %v9744_v49 = vld [vmem:[%s12437_s7 + $0x188] sm:$0xff]  ;;  %v9749_v50 = vld [vmem:[%s12437_s7 + $0x190] sm:$0xff] }
  0x15   :  { %12604 = vst [vmem:[#allocation34_spill] sm:$0xff] %v9739_v48  ;;  %12605 = vst [vmem:[#allocation35_spill] sm:$0xff] %v9744_v49  ;;  %v9754_v51 = vld [vmem:[%s12437_s7 + $0x198] sm:$0xff]  ;;  %v9759_v52 = vld [vmem:[%s12437_s7 + $0x1a0] sm:$0xff] }
  0x16   :  { %12606 = vst [vmem:[#allocation36_spill] sm:$0xff] %v9749_v50  ;;  %12607 = vst [vmem:[#allocation37_spill] sm:$0xff] %v9754_v51  ;;  %v9764_v53 = vld [vmem:[%s12437_s7 + $0x1a8] sm:$0xff]  ;;  %v9769_v54 = vld [vmem:[%s12437_s7 + $0x1b0] sm:$0xff] }
  0x17   :  { %12608 = vst [vmem:[#allocation38_spill] sm:$0xff] %v9759_v52  ;;  %12609 = vst [vmem:[#allocation39_spill] sm:$0xff] %v9764_v53  ;;  %v9774_v55 = vld [vmem:[%s12437_s7 + $0x1b8] sm:$0xff]  ;;  %v9779_v56 = vld [vmem:[%s12437_s7 + $0x1c0] sm:$0xff] }
  0x18   :  { %12610 = vst [vmem:[#allocation40_spill] sm:$0xff] %v9769_v54  ;;  %12611 = vst [vmem:[#allocation41_spill] sm:$0xff] %v9774_v55  ;;  %v9784_v57 = vld [vmem:[%s12437_s7 + $0x1c8] sm:$0xff]  ;;  %v9789_v58 = vld [vmem:[%s12437_s7 + $0x1d0] sm:$0xff] }
  0x19   :  { %12612 = vst [vmem:[#allocation42_spill] sm:$0xff] %v9779_v56  ;;  %12613 = vst [vmem:[#allocation43_spill] sm:$0xff] %v9784_v57  ;;  %v9794_v59 = vld [vmem:[%s12437_s7 + $0x1d8] sm:$0xff]  ;;  %v9799_v60 = vld [vmem:[%s12437_s7 + $0x1e0] sm:$0xff] }
  0x1a   :  { %12614 = vst [vmem:[#allocation44_spill] sm:$0xff] %v9789_v58  ;;  %12615 = vst [vmem:[#allocation45_spill] sm:$0xff] %v9794_v59  ;;  %v9804_v61 = vld [vmem:[%s12437_s7 + $0x1e8] sm:$0xff]  ;;  %v9809_v62 = vld [vmem:[%s12437_s7 + $0x1f0] sm:$0xff] }
  0x1b   :  { %12616 = vst [vmem:[#allocation46_spill] sm:$0xff] %v9799_v60  ;;  %12617 = vst [vmem:[#allocation47_spill] sm:$0xff] %v9804_v61  ;;  %v9814_v63 = vld [vmem:[%s12437_s7 + $0x1f8] sm:$0xff]  ;;  %v9819_v59 = vld [vmem:[%s12437_s7 + $0x200] sm:$0xff]  ;;  %v9420_v60 = vmov 0  }
  0x1c   :  { %12618 = vst [vmem:[#allocation48_spill] sm:$0xff] %v9809_v62  ;;  %12619 = vst [vmem:[#allocation49_spill] sm:$0xff] %v9814_v63  ;;  %v9824_v56 = vld [vmem:[%s12437_s7 + $0x208] sm:$0xff]  ;;  %v9829_v53 = vld [vmem:[%s12437_s7 + $0x210] sm:$0xff]  ;;  %9175 = vset.pattern.permute.xlu1 %v9420_v60  ;;  %9174 = vset.pattern.permute.xlu0 %v9420_v60 }
  0x1d   :  { %12620 = vst [vmem:[#allocation50_spill] sm:$0xff] %v9819_v59  ;;  %12621 = vst [vmem:[#allocation51_spill] sm:$0xff] %v9824_v56  ;;  %v9834_v62 = vld [vmem:[%s12437_s7 + $0x218] sm:$0xff]  ;;  %v9839_v50 = vld [vmem:[%s12437_s7 + $0x220] sm:$0xff] }
  0x1e   :  { %12622 = vst [vmem:[#allocation52_spill] sm:$0xff] %v9829_v53  ;;  %12623 = vst [vmem:[#allocation53_spill] sm:$0xff] %v9834_v62  ;;  %v9844_v63 = vld [vmem:[%s12437_s7 + $0x228] sm:$0xff]  ;;  %v9849_v56 = vld [vmem:[%s12437_s7 + $0x230] sm:$0xff] }
  0x1f   :  { %12624 = vst [vmem:[#allocation54_spill] sm:$0xff] %v9839_v50  ;;  %12625 = vst [vmem:[#allocation55_spill] sm:$0xff] %v9844_v63  ;;  %v9854_v53 = vld [vmem:[%s12437_s7 + $0x238] sm:$0xff]  ;;  %v9859_v62 = vld [vmem:[%s12437_s7 + $0x240] sm:$0xff] }
  0x20   :  { %12626 = vst [vmem:[#allocation56_spill] sm:$0xff] %v9849_v56  ;;  %12627 = vst [vmem:[#allocation57_spill] sm:$0xff] %v9854_v53  ;;  %v9864_v50 = vld [vmem:[%s12437_s7 + $0x248] sm:$0xff]  ;;  %v9869_v63 = vld [vmem:[%s12437_s7 + $0x250] sm:$0xff] }
  0x21   :  { %12628 = vst [vmem:[#allocation58_spill] sm:$0xff] %v9859_v62  ;;  %12629 = vst [vmem:[#allocation59_spill] sm:$0xff] %v9864_v50  ;;  %v9874_v56 = vld [vmem:[%s12437_s7 + $0x258] sm:$0xff]  ;;  %v9879_v53 = vld [vmem:[%s12437_s7 + $0x260] sm:$0xff] }
  0x22   :  { %12630 = vst [vmem:[#allocation60_spill] sm:$0xff] %v9869_v63  ;;  %12631 = vst [vmem:[#allocation61_spill] sm:$0xff] %v9874_v56  ;;  %v9884_v62 = vld [vmem:[%s12437_s7 + $0x268] sm:$0xff]  ;;  %v9889_v50 = vld [vmem:[%s12437_s7 + $0x270] sm:$0xff] }
  0x23   :  { %12632 = vst [vmem:[#allocation62_spill] sm:$0xff] %v9879_v53  ;;  %12633 = vst [vmem:[#allocation63_spill] sm:$0xff] %v9884_v62  ;;  %v9894_v63 = vld [vmem:[%s12437_s7 + $0x278] sm:$0xff]  ;;  %v9899_v56 = vld [vmem:[%s12437_s7 + $0x280] sm:$0xff] }
  0x24   :  { %12634 = vst [vmem:[#allocation64_spill] sm:$0xff] %v9889_v50  ;;  %12635 = vst [vmem:[#allocation65_spill] sm:$0xff] %v9894_v63  ;;  %v9904_v53 = vld [vmem:[%s12437_s7 + $0x288] sm:$0xff]  ;;  %v9909_v62 = vld [vmem:[%s12437_s7 + $0x290] sm:$0xff] }
  0x25   :  { %12636 = vst [vmem:[#allocation66_spill] sm:$0xff] %v9899_v56  ;;  %12637 = vst [vmem:[#allocation67_spill] sm:$0xff] %v9904_v53  ;;  %v9914_v50 = vld [vmem:[%s12437_s7 + $0x298] sm:$0xff]  ;;  %v9919_v63 = vld [vmem:[%s12437_s7 + $0x2a0] sm:$0xff] }
  0x26   :  { %12638 = vst [vmem:[#allocation68_spill] sm:$0xff] %v9909_v62  ;;  %12639 = vst [vmem:[#allocation69_spill] sm:$0xff] %v9914_v50  ;;  %v9924_v56 = vld [vmem:[%s12437_s7 + $0x2a8] sm:$0xff]  ;;  %v9929_v53 = vld [vmem:[%s12437_s7 + $0x2b0] sm:$0xff] }
  0x27   :  { %12640 = vst [vmem:[#allocation70_spill] sm:$0xff] %v9919_v63  ;;  %12641 = vst [vmem:[#allocation71_spill] sm:$0xff] %v9924_v56  ;;  %v9934_v62 = vld [vmem:[%s12437_s7 + $0x2b8] sm:$0xff]  ;;  %v9939_v50 = vld [vmem:[%s12437_s7 + $0x2c0] sm:$0xff] }
  0x28   :  { %12642 = vst [vmem:[#allocation72_spill] sm:$0xff] %v9929_v53  ;;  %12643 = vst [vmem:[#allocation73_spill] sm:$0xff] %v9934_v62  ;;  %v9944_v63 = vld [vmem:[%s12437_s7 + $0x2c8] sm:$0xff]  ;;  %v9949_v56 = vld [vmem:[%s12437_s7 + $0x2d0] sm:$0xff] }
  0x29   :  { %12644 = vst [vmem:[#allocation74_spill] sm:$0xff] %v9939_v50  ;;  %12645 = vst [vmem:[#allocation75_spill] sm:$0xff] %v9944_v63  ;;  %v9954_v53 = vld [vmem:[%s12437_s7 + $0x2d8] sm:$0xff]  ;;  %v9959_v62 = vld [vmem:[%s12437_s7 + $0x2e0] sm:$0xff] }
  0x2a   :  { %12646 = vst [vmem:[#allocation76_spill] sm:$0xff] %v9949_v56  ;;  %12647 = vst [vmem:[#allocation77_spill] sm:$0xff] %v9954_v53  ;;  %v9964_v50 = vld [vmem:[%s12437_s7 + $0x2e8] sm:$0xff]  ;;  %v9969_v63 = vld [vmem:[%s12437_s7 + $0x2f0] sm:$0xff] }
  0x2b   :  { %12648 = vst [vmem:[#allocation78_spill] sm:$0xff] %v9959_v62  ;;  %12649 = vst [vmem:[#allocation79_spill] sm:$0xff] %v9964_v50  ;;  %v9974_v56 = vld [vmem:[%s12437_s7 + $0x2f8] sm:$0xff]  ;;  %v277_v53 = vld [vmem:[%s12430_s0 + $0x10] sm:$0xff] }
  0x2c   :  { %12650 = vst [vmem:[#allocation80_spill] sm:$0xff] %v9969_v63  ;;  %12651 = vst [vmem:[#allocation81_spill] sm:$0xff] %v9974_v56  ;;  %v275_v62 = vld [vmem:[%s12430_s0] sm:$0xff]  ;;  %290 = vperm.xlu1 %9175, %v277_v53   ;;  %v278_v50 = vld [vmem:[%s12430_s0 + $0x18] sm:$0xff] }
  0x2d   :  { %284 = vperm.xlu0 %9174, %v275_v62   ;;  %v276_v56 = vld [vmem:[%s12430_s0 + $0x8] sm:$0xff] }
  0x2e   :  { %271 = vsyncadd [#allocation5], 12288  ;;  %v371_v63 = vld [vmem:[%s12432_s2 + $0x80] sm:$0xff]  ;;  %v372_v59 = vld [vmem:[%s12432_s2 + $0x88] sm:$0xff] }
  0x2f   :  { %v355_v53 = vld [vmem:[%s12432_s2] sm:$0xff]  ;;  %v7627_v60 = vpack.c.bf16 %v372_v59, %v371_v63  ;;  %v356_v62 = vld [vmem:[%s12432_s2 + $0x8] sm:$0xff]  ;;  %v373_v61 = vld [vmem:[%s12432_s2 + $0x90] sm:$0xff] }
  0x30   :  { %v374_v47 = vld [vmem:[%s12432_s2 + $0x98] sm:$0xff]  ;;  %v7629_v44 = vpack.c.bf16 %v356_v62, %v355_v53  ;;  %v357_v54 = vld [vmem:[%s12432_s2 + $0x10] sm:$0xff]  ;;  %293 = vperm.xlu1 %9175, %v278_v50   ;;  %v375_v63 = vld [vmem:[%s12432_s2 + $0xa0] sm:$0xff] }
  0x31   :  { %v7631_v57 = vpack.c.bf16 %v374_v47, %v373_v61  ;;  %v358_v59 = vld [vmem:[%s12432_s2 + $0x18] sm:$0xff]  ;;  %287 = vperm.xlu0 %9174, %v276_v56   ;;  %v376_v58 = vld [vmem:[%s12432_s2 + $0xa8] sm:$0xff]  ;;  %v279_v61 = vld [vmem:[%s12430_s0 + $0x20] sm:$0xff]  ;;  %7628 = vmatprep.subr.bf16.mxu0 %v7627_v60 }
  0x32   :  { %v280_v47 = vld [vmem:[%s12430_s0 + $0x28] sm:$0xff]  ;;  %7630 = vmatpush3.bf16.msra.mxu0 %v7629_v44  ;;  %v7633_v50 = vpack.c.bf16 %v358_v59, %v357_v54  ;;  %v7635_v56 = vpack.c.bf16 %v376_v58, %v375_v63  ;;  %v359_v53 = vld [vmem:[%s12432_s2 + $0x20] sm:$0xff]  ;;  %v377_v55 = vld [vmem:[%s12432_s2 + $0xb0] sm:$0xff] }
  0x33   :  { %7632 = vmatprep.subr.bf16.mxu0 %v7631_v57  ;;  %v360_v62 = vld [vmem:[%s12432_s2 + $0x28] sm:$0xff]  ;;  %v378_v44 = vld [vmem:[%s12432_s2 + $0xb8] sm:$0xff]  ;;  %v281_v57 = vld [vmem:[%s12430_s0 + $0x30] sm:$0xff] }
  0x34   :  { %299 = vperm.xlu1 %9175, %v280_v47   ;;  %v282_v54 = vld [vmem:[%s12430_s0 + $0x38] sm:$0xff]  ;;  %v7637_v58 = vpack.c.bf16 %v360_v62, %v359_v53  ;;  %v7639_v60 = vpack.c.bf16 %v378_v44, %v377_v55  ;;  %v361_v59 = vld [vmem:[%s12432_s2 + $0x30] sm:$0xff]  ;;  %v379_v47 = vld [vmem:[%s12432_s2 + $0xc0] sm:$0xff] }
  0x35   :  { %296 = vperm.xlu0 %9174, %v279_v61   ;;  %v362_v63 = vld [vmem:[%s12432_s2 + $0x38] sm:$0xff]  ;;  %v380_v61 = vld [vmem:[%s12432_s2 + $0xc8] sm:$0xff]  ;;  %v381_v62 = vld [vmem:[%s12432_s2 + $0xd0] sm:$0xff] }
  0x36   :  { %7634 = vmatpush3.bf16.msra.mxu0 %v7633_v50  ;;  %v7641_v55 = vpack.c.bf16 %v362_v63, %v361_v59  ;;  %v7643_v50 = vpack.c.bf16 %v380_v61, %v379_v47  ;;  %v364_v53 = vld [vmem:[%s12432_s2 + $0x48] sm:$0xff]  ;;  %v382_v44 = vld [vmem:[%s12432_s2 + $0xd8] sm:$0xff]  ;;  %v383_v59 = vld [vmem:[%s12432_s2 + $0xe0] sm:$0xff] }
  0x37   :  { %7636 = vmatprep.subr.bf16.mxu0 %v7635_v56  ;;  %v363_v56 = vld [vmem:[%s12432_s2 + $0x40] sm:$0xff]  ;;  %v384_v63 = vld [vmem:[%s12432_s2 + $0xe8] sm:$0xff] }
  0x38   :  { %305 = vperm.xlu1 %9175, %v282_v54   ;;  %v7645_v54 = vpack.c.bf16 %v364_v53, %v363_v56  ;;  %v7651_v61 = vpack.c.bf16 %v384_v63, %v383_v59  ;;  %v385_v56 = vld [vmem:[%s12432_s2 + $0xf0] sm:$0xff]  ;;  %v386_v53 = vld [vmem:[%s12432_s2 + $0xf8] sm:$0xff] }
  0x39   :  { %302 = vperm.xlu0 %9174, %v281_v57   ;;  %v7647_v57 = vpack.c.bf16 %v382_v44, %v381_v62  ;;  %v7655_v44 = vpack.c.bf16 %v386_v53, %v385_v56 }
  0x3a   :  { %7638 = vmatpush3.bf16.msra.mxu0 %v7637_v58  ;;  %v365_v58 = vld [vmem:[%s12432_s2 + $0x50] sm:$0xff] }
  0x3b   :  { %7640 = vmatprep.subr.bf16.mxu0 %v7639_v60  ;;  %v366_v60 = vld [vmem:[%s12432_s2 + $0x58] sm:$0xff] }
  0x3c   :  { %v7649_v47 = vpack.c.bf16 %v366_v60, %v365_v58  ;;  %v12443_v60 = vlaneseq }
  0x3e   :  { %7642 = vmatpush3.bf16.msra.mxu0 %v7641_v55  ;;  %v367_v55 = vld [vmem:[%s12432_s2 + $0x60] sm:$0xff]  ;;  %v273_v59 = vand.u32 127, %v12443_v60 }
  0x3f   :  { %7644 = vmatprep.subr.bf16.mxu0 %v7643_v50  ;;  %v368_v50 = vld [vmem:[%s12432_s2 + $0x68] sm:$0xff] }
  0x40   :  { %v7653_v62 = vpack.c.bf16 %v368_v50, %v367_v55  ;;  %v274_v63 = vadd.s32 128, %v273_v59 }
  0x42   :  { %7646 = vmatpush3.bf16.msra.mxu0 %v7645_v54  ;;  %v369_v54 = vld [vmem:[%s12432_s2 + $0x70] sm:$0xff] }
  0x43   :  { %7648 = vmatprep.subr.bf16.mxu0 %v7647_v57  ;;  %v370_v57 = vld [vmem:[%s12432_s2 + $0x78] sm:$0xff] }
  0x44   :  { %v7657_v58 = vpack.c.bf16 %v370_v57, %v369_v54 }
  0x46   :  { %7650 = vmatpush3.bf16.msra.mxu0 %v7649_v47 }
  0x47   :  { %7652 = vmatprep.subr.bf16.mxu0 %v7651_v61  ;;  %v9421_v61 = vmov 1.0  }
  0x4a   :  { %7654 = vmatpush3.bf16.msra.mxu0 %v7653_v62 }
  0x4b   :  { %7656 = vmatprep.subr.bf16.mxu0 %v7655_v44 }
  0x4e   :  { %7658 = vmatpush3.bf16.msra.mxu0 %v7657_v58 }
  0xab   :  { %v291_v55 = vpop.permute.xlu1 %290 }
  0xac   :  { %v285_v47 = vpop.permute.xlu0 %284  ;;  %vm312_vm2 = vcmp.eq.s32.totalorder %v274_v63, %v291_v55  ;;  %vm311_vm5 = vcmp.eq.s32.totalorder %v273_v59, %v291_v55 }
  0xad   :  { %vm307_vm0 = vcmp.eq.s32.totalorder %v273_v59, %v285_v47  ;;  %vm308_vm1 = vcmp.eq.s32.totalorder %v274_v63, %v285_v47 }
  0xae   :  { %6155 = vmatprep.mubr.msk.f32.mxu0 %vm308_vm1, %v9421_v61 }
  0xaf   :  { %6156 = vmatmul.mubr.msk.f32.vlgmr.msra.gmra.mrb[0].mxu0 %vm307_vm0, %v9421_v61  ;;  %v294_v56 = vpop.permute.xlu1 %293 }
  0xb0   :  { %v288_v50 = vpop.permute.xlu0 %287  ;;  %vm314_vm6 = vcmp.eq.s32.totalorder %v274_v63, %v294_v56  ;;  %vm313_vm7 = vcmp.eq.s32.totalorder %v273_v59, %v294_v56 }
  0xb1   :  { %vm309_vm3 = vcmp.eq.s32.totalorder %v273_v59, %v288_v50  ;;  %vm310_vm4 = vcmp.eq.s32.totalorder %v274_v63, %v288_v50 }
  0xb2   :  { %6157 = vmatprep.mubr.msk.f32.mxu0 %vm310_vm4, %v9421_v61 }
  0xb3   :  { %6158 = vmatmul.mubr.msk.f32.gmra.mrb[2].mxu0 %vm309_vm3, %v9421_v61  ;;  %v300_v62 = vpop.permute.xlu1 %299 }
  0xb4   :  { %6159 = vmatprep.mubr.msk.f32.mxu0 %vm312_vm2, %v9421_v61  ;;  %v297_v53 = vpop.permute.xlu0 %296  ;;  %vm318_vm10 = vcmp.eq.s32.totalorder %v274_v63, %v300_v62  ;;  %vm317_vm11 = vcmp.eq.s32.totalorder %v273_v59, %v300_v62 }
  0xb5   :  { %vm316_vm8 = vcmp.eq.s32.totalorder %v274_v63, %v297_v53  ;;  %vm315_vm9 = vcmp.eq.s32.totalorder %v273_v59, %v297_v53 }
  0xb7   :  { %6160 = vmatmul.mubr.msk.f32.gmra.mrb[4].mxu0 %vm311_vm5, %v9421_v61  ;;  %v306_v54 = vpop.permute.xlu1 %305 }
  0xb8   :  { %6161 = vmatprep.mubr.msk.f32.mxu0 %vm314_vm6, %v9421_v61  ;;  %v303_v44 = vpop.permute.xlu0 %302  ;;  %vm322_vm14 = vcmp.eq.s32.totalorder %v274_v63, %v306_v54  ;;  %vm321_vm15 = vcmp.eq.s32.totalorder %v273_v59, %v306_v54 }
  0xb9   :  { %vm320_vm12 = vcmp.eq.s32.totalorder %v274_v63, %v303_v44  ;;  %vm319_vm13 = vcmp.eq.s32.totalorder %v273_v59, %v303_v44 }
  0xbb   :  { %6162 = vmatmul.mubr.msk.f32.gmra.mrb[6].mxu0 %vm313_vm7, %v9421_v61 }
  0xbc   :  { %6163 = vmatprep.mubr.msk.f32.mxu0 %vm316_vm8, %v9421_v61 }
  0xbf   :  { %6164 = vmatmul.mubr.msk.f32.gmra.mrb[8].mxu0 %vm315_vm9, %v9421_v61 }
  0xc0   :  { %6165 = vmatprep.mubr.msk.f32.mxu0 %vm318_vm10, %v9421_v61 }
  0xc3   :  { %6166 = vmatmul.mubr.msk.f32.gmra.mrb[10].mxu0 %vm317_vm11, %v9421_v61 }
  0xc4   :  { %6167 = vmatprep.mubr.msk.f32.mxu0 %vm320_vm12, %v9421_v61 }
  0xc7   :  { %6168 = vmatmul.mubr.msk.f32.gmra.mrb[12].mxu0 %vm319_vm13, %v9421_v61 }
  0xc8   :  { %6169 = vmatprep.mubr.msk.f32.mxu0 %vm322_vm14, %v9421_v61 }
  0xcb   :  { %6170 = vmatmul.mubr.msk.f32.gmra.mrb[14].mxu0 %vm321_vm15, %v9421_v61 }
 0x182   :  { %v6239_v57 = vpop.f32.mrb[0].mxu0 }
 0x183   :  { %v6240_v58 = vpop.f32.mrb[1].mxu0 }
 0x184   :  { %v10097_v47 = vadd.f32 %v6240_v58, %v6239_v57 }
 0x186   :  { %v6242_v55 = vpop.f32.mrb[2].mxu0  ;;  %v492_v50 = vmul.f32 %v10097_v47, %v10097_v47 }
 0x187   :  { %v6243_v56 = vpop.f32.mrb[3].mxu0 }
 0x188   :  { %v10101_v53 = vadd.f32 %v6243_v56, %v6242_v55  ;;  %500 = vadd.xlane.f32.xlu0 %v492_v50  ;;  %v621_v56 = vld [vmem:[%s12433_s3 + $0x8] sm:$0xff] }
 0x18a   :  { %v6245_v62 = vpop.f32.mrb[4].mxu0  ;;  %v493_v63 = vmul.f32 %v10101_v53, %v10101_v53 }
 0x18b   :  { %v6246_v44 = vpop.f32.mrb[5].mxu0 }
 0x18c   :  { %v10105_v60 = vadd.f32 %v6246_v44, %v6245_v62  ;;  %502 = vadd.xlane.f32.xlu1 %v493_v63  ;;  %v624_v62 = vld [vmem:[%s12433_s3 + $0x20] sm:$0xff] }
 0x18d   :  { %v7659_v44 = vpack.c.bf16 %v624_v62, %v621_v56  ;;  %v627_v62 = vld [vmem:[%s12433_s3 + $0x38] sm:$0xff] }
 0x18e   :  { %v6248_v59 = vpop.f32.mrb[6].mxu0  ;;  %v494_v61 = vmul.f32 %v10105_v60, %v10105_v60 }
 0x18f   :  { %v6249_v54 = vpop.f32.mrb[7].mxu0  ;;  %7660 = vmatprep.subr.bf16.mxu0 %v7659_v44  ;;  %v941_v44 = vld [vmem:[%s12434_s4] sm:$0xff] }
 0x190   :  { %v10109_v57 = vadd.f32 %v6249_v54, %v6248_v59  ;;  %504 = vadd.xlane.f32.xlu0 %v494_v61  ;;  %v620_v59 = vld [vmem:[%s12433_s3] sm:$0xff]  ;;  %v623_v61 = vld [vmem:[%s12433_s3 + $0x18] sm:$0xff] }
 0x191   :  { %v7661_v54 = vpack.c.bf16 %v623_v61, %v620_v59  ;;  %v630_v59 = vld [vmem:[%s12433_s3 + $0x50] sm:$0xff] }
 0x192   :  { %v6251_v58 = vpop.f32.mrb[8].mxu0  ;;  %v495_v55 = vmul.f32 %v10109_v57, %v10109_v57  ;;  %v7663_v51 = vpack.c.bf16 %v630_v59, %v627_v62 }
 0x193   :  { %v6252_v50 = vpop.f32.mrb[9].mxu0  ;;  %7662 = vmatpush1.bf16.msra.mxu0 %v7661_v54  ;;  %v944_v54 = vld [vmem:[%s12434_s4 + $0x18] sm:$0xff] }
 0x194   :  { %v10119_v63 = vadd.f32 %v6252_v50, %v6251_v58  ;;  %506 = vadd.xlane.f32.xlu0 %v495_v55  ;;  %v942_v58 = vld [vmem:[%s12434_s4 + $0x8] sm:$0xff]  ;;  %v945_v55 = vld [vmem:[%s12434_s4 + $0x20] sm:$0xff]  ;;  %v7725_v48 = vpack.c.bf16 %v944_v54, %v941_v44  ;;  %7664 = vmatprep.subr.bf16.mxu0 %v7663_v51  ;;  %v947_v44 = vld [vmem:[%s12434_s4 + $0x30] sm:$0xff] }
 0x195   :  { %v7723_v56 = vpack.c.bf16 %v945_v55, %v942_v58  ;;  %v626_v58 = vld [vmem:[%s12433_s3 + $0x30] sm:$0xff]  ;;  %v629_v55 = vld [vmem:[%s12433_s3 + $0x48] sm:$0xff]  ;;  %v636_v51 = vld [vmem:[%s12433_s3 + $0x80] sm:$0xff] }
 0x196   :  { %v6254_v41 = vpop.f32.mrb[10].mxu0  ;;  %v496_v38 = vmul.f32 %v10119_v63, %v10119_v63  ;;  %v7665_v52 = vpack.c.bf16 %v629_v55, %v626_v58  ;;  %v635_v55 = vld [vmem:[%s12433_s3 + $0x78] sm:$0xff] }
 0x197   :  { %v6255_v50 = vpop.f32.mrb[11].mxu0  ;;  %7724 = vmatprep.subr.bf16.mxu1 %v7723_v56  ;;  %v633_v56 = vld [vmem:[%s12433_s3 + $0x68] sm:$0xff] }
 0x198   :  { %v10144_v61 = vadd.f32 %v6255_v50, %v6254_v41  ;;  %508 = vadd.xlane.f32.xlu1 %v496_v38  ;;  %v948_v41 = vld [vmem:[%s12434_s4 + $0x38] sm:$0xff]  ;;  %v951_v50 = vld [vmem:[%s12434_s4 + $0x50] sm:$0xff]  ;;  %7726 = vmatpush1.bf16.msra.mxu1 %v7725_v48  ;;  %v7667_v58 = vpack.c.bf16 %v636_v51, %v633_v56  ;;  %v950_v48 = vld [vmem:[%s12434_s4 + $0x48] sm:$0xff] }
 0x199   :  { %7666 = vmatpush1.bf16.msra.mxu0 %v7665_v52  ;;  %v7727_v59 = vpack.c.bf16 %v951_v50, %v948_v41  ;;  %v632_v52 = vld [vmem:[%s12433_s3 + $0x60] sm:$0xff]  ;;  %v7729_v41 = vpack.c.bf16 %v950_v48, %v947_v44  ;;  %v642_v44 = vld [vmem:[%s12433_s3 + $0xb0] sm:$0xff] }
 0x19a   :  { %v6257_v49 = vpop.f32.mrb[12].mxu0  ;;  %v497_v38 = vmul.f32 %v10144_v61, %v10144_v61  ;;  %v7669_v50 = vpack.c.bf16 %v635_v55, %v632_v52  ;;  %7668 = vmatprep.subr.bf16.mxu0 %v7667_v58  ;;  %v953_v58 = vld [vmem:[%s12434_s4 + $0x60] sm:$0xff]  ;;  %v956_v55 = vld [vmem:[%s12434_s4 + $0x78] sm:$0xff] }
 0x19b   :  { %v6258_v62 = vpop.f32.mrb[13].mxu0  ;;  %7728 = vmatprep.subr.bf16.mxu1 %v7727_v59  ;;  %v639_v59 = vld [vmem:[%s12433_s3 + $0x98] sm:$0xff] }
 0x19c   :  { %v10172_v54 = vadd.f32 %v6258_v62, %v6257_v49  ;;  %510 = vadd.xlane.f32.xlu0 %v497_v38  ;;  %v954_v38 = vld [vmem:[%s12434_s4 + $0x68] sm:$0xff]  ;;  %v957_v62 = vld [vmem:[%s12434_s4 + $0x80] sm:$0xff]  ;;  %7730 = vmatpush1.bf16.msra.mxu1 %v7729_v41  ;;  %v7671_v52 = vpack.c.bf16 %v642_v44, %v639_v59  ;;  %v638_v41 = vld [vmem:[%s12433_s3 + $0x90] sm:$0xff] }
 0x19d   :  { %7670 = vmatpush1.bf16.msra.mxu0 %v7669_v50  ;;  %v7731_v51 = vpack.c.bf16 %v957_v62, %v954_v38  ;;  %v641_v50 = vld [vmem:[%s12433_s3 + $0xa8] sm:$0xff]  ;;  %v7733_v38 = vpack.c.bf16 %v956_v55, %v953_v58  ;;  %v648_v44 = vld [vmem:[%s12433_s3 + $0xe0] sm:$0xff]  ;;  %v959_v58 = vld [vmem:[%s12434_s4 + $0x90] sm:$0xff] }
 0x19e   :  { %v6260_v35 = vpop.f32.mrb[14].mxu0  ;;  %v498_v49 = vmul.f32 %v10172_v54, %v10172_v54  ;;  %v7673_v62 = vpack.c.bf16 %v641_v50, %v638_v41  ;;  %7672 = vmatprep.subr.bf16.mxu0 %v7671_v52  ;;  %v962_v55 = vld [vmem:[%s12434_s4 + $0xa8] sm:$0xff]  ;;  %v644_v41 = vld [vmem:[%s12433_s3 + $0xc0] sm:$0xff]  ;;  %v647_v50 = vld [vmem:[%s12433_s3 + $0xd8] sm:$0xff] }
 0x19f   :  { %v6261_v56 = vpop.f32.mrb[15].mxu0  ;;  %7732 = vmatprep.subr.bf16.mxu1 %v7731_v51  ;;  %v645_v51 = vld [vmem:[%s12433_s3 + $0xc8] sm:$0xff] }
 0x1a0   :  { %v10200_v48 = vadd.f32 %v6261_v56, %v6260_v35  ;;  %512 = vadd.xlane.f32.xlu1 %v498_v49  ;;  %v960_v49 = vld [vmem:[%s12434_s4 + $0x98] sm:$0xff]  ;;  %v963_v56 = vld [vmem:[%s12434_s4 + $0xb0] sm:$0xff]  ;;  %7734 = vmatpush1.bf16.msra.mxu1 %v7733_v38  ;;  %v7675_v52 = vpack.c.bf16 %v648_v44, %v645_v51  ;;  %v7737_v38 = vpack.c.bf16 %v962_v55, %v959_v58  ;;  %v965_v44 = vld [vmem:[%s12434_s4 + $0xc0] sm:$0xff] }
 0x1a1   :  { %7674 = vmatpush1.bf16.msra.mxu0 %v7673_v62  ;;  %v7735_v59 = vpack.c.bf16 %v963_v56, %v960_v49  ;;  %v7677_v62 = vpack.c.bf16 %v647_v50, %v644_v41  ;;  %v969_v49 = vld [vmem:[%s12434_s4 + $0xe0] sm:$0xff]  ;;  %v651_v51 = vld [vmem:[%s12433_s3 + $0xf8] sm:$0xff]  ;;  %v650_v55 = vld [vmem:[%s12433_s3 + $0xf0] sm:$0xff] }
 0x1a2   :  { %v499_v35 = vmul.f32 %v10200_v48, %v10200_v48  ;;  %7676 = vmatprep.subr.bf16.mxu0 %v7675_v52  ;;  %v968_v52 = vld [vmem:[%s12434_s4 + $0xd8] sm:$0xff]  ;;  %v653_v41 = vld [vmem:[%s12433_s3 + $0x108] sm:$0xff] }
 0x1a3   :  { %7736 = vmatprep.subr.bf16.mxu1 %v7735_v59  ;;  %v654_v59 = vld [vmem:[%s12433_s3 + $0x110] sm:$0xff]  ;;  %v7741_v50 = vpack.c.bf16 %v968_v52, %v965_v44  ;;  %v656_v52 = vld [vmem:[%s12433_s3 + $0x120] sm:$0xff] }
 0x1a4   :  { %514 = vadd.xlane.f32.xlu0 %v499_v35  ;;  %v966_v35 = vld [vmem:[%s12434_s4 + $0xc8] sm:$0xff]  ;;  %7738 = vmatpush1.bf16.msra.mxu1 %v7737_v38  ;;  %v7679_v58 = vpack.c.bf16 %v654_v59, %v651_v51  ;;  %v7681_v38 = vpack.c.bf16 %v653_v41, %v650_v55  ;;  %v971_v59 = vld [vmem:[%s12434_s4 + $0xf0] sm:$0xff]  ;;  %v659_v55 = vld [vmem:[%s12433_s3 + $0x138] sm:$0xff] }
 0x1a5   :  { %7678 = vmatpush1.bf16.msra.mxu0 %v7677_v62  ;;  %v7739_v56 = vpack.c.bf16 %v969_v49, %v966_v35  ;;  %v972_v62 = vld [vmem:[%s12434_s4 + $0xf8] sm:$0xff]  ;;  %v975_v35 = vld [vmem:[%s12434_s4 + $0x110] sm:$0xff]  ;;  %v657_v51 = vld [vmem:[%s12433_s3 + $0x128] sm:$0xff] }
 0x1a6   :  { %7680 = vmatprep.subr.bf16.mxu0 %v7679_v58  ;;  %v7743_v49 = vpack.c.bf16 %v975_v35, %v972_v62  ;;  %v974_v58 = vld [vmem:[%s12434_s4 + $0x108] sm:$0xff]  ;;  %v981_v62 = vld [vmem:[%s12434_s4 + $0x140] sm:$0xff] }
 0x1a7   :  { %7740 = vmatprep.subr.bf16.mxu1 %v7739_v56  ;;  %v660_v56 = vld [vmem:[%s12433_s3 + $0x140] sm:$0xff]  ;;  %v7745_v41 = vpack.c.bf16 %v974_v58, %v971_v59  ;;  %v662_v58 = vld [vmem:[%s12433_s3 + $0x150] sm:$0xff] }
 0x1a8   :  { %7742 = vmatpush1.bf16.msra.mxu1 %v7741_v50  ;;  %v7683_v44 = vpack.c.bf16 %v660_v56, %v657_v51  ;;  %v7685_v50 = vpack.c.bf16 %v659_v55, %v656_v52  ;;  %v663_v51 = vld [vmem:[%s12433_s3 + $0x158] sm:$0xff]  ;;  %v977_v56 = vld [vmem:[%s12434_s4 + $0x120] sm:$0xff]  ;;  %v665_v52 = vld [vmem:[%s12433_s3 + $0x168] sm:$0xff] }
 0x1a9   :  { %7682 = vmatpush1.bf16.msra.mxu0 %v7681_v38  ;;  %7744 = vmatprep.subr.bf16.mxu1 %v7743_v49  ;;  %v978_v38 = vld [vmem:[%s12434_s4 + $0x128] sm:$0xff]  ;;  %v666_v49 = vld [vmem:[%s12433_s3 + $0x170] sm:$0xff] }
 0x1aa   :  { %7684 = vmatprep.subr.bf16.mxu0 %v7683_v44  ;;  %v7747_v35 = vpack.c.bf16 %v981_v62, %v978_v38  ;;  %v7687_v59 = vpack.c.bf16 %v666_v49, %v663_v51  ;;  %v980_v44 = vld [vmem:[%s12434_s4 + $0x138] sm:$0xff]  ;;  %v987_v38 = vld [vmem:[%s12434_s4 + $0x170] sm:$0xff] }
 0x1ab   :  { %v7749_v55 = vpack.c.bf16 %v980_v44, %v977_v56  ;;  %v622_v51 = vld [vmem:[%s12433_s3 + $0x10] sm:$0xff] }
 0x1ac   :  { %7746 = vmatpush1.bf16.msra.mxu1 %v7745_v41  ;;  %v7689_v41 = vpack.c.bf16 %v665_v52, %v662_v58  ;;  %v983_v49 = vld [vmem:[%s12434_s4 + $0x150] sm:$0xff]  ;;  %v12444_v58 = vmov 0.0   ;;  %v10335_v52 = vld [vmem:[%s12431_s1] sm:$0xff] }
 0x1ad   :  { %7686 = vmatpush1.bf16.msra.mxu0 %v7685_v50  ;;  %7748 = vmatprep.subr.bf16.mxu1 %v7747_v35  ;;  %v984_v50 = vld [vmem:[%s12434_s4 + $0x158] sm:$0xff]  ;;  %v625_v35 = vld [vmem:[%s12433_s3 + $0x28] sm:$0xff] }
 0x1ae   :  { %7688 = vmatprep.subr.bf16.mxu0 %v7687_v59  ;;  %v7751_v62 = vpack.c.bf16 %v987_v38, %v984_v50  ;;  %v10324_v56 = vpack.c.bf16 %v625_v35, %v622_v51  ;;  %v986_v59 = vld [vmem:[%s12434_s4 + $0x168] sm:$0xff]  ;;  %749 = vmatprep.mubr.f32.mxu0 %v12444_v58 }
 0x1af   :  { %v7753_v44 = vpack.c.bf16 %v986_v59, %v983_v49  ;;  %1053 = vmatprep.mubr.f32.mxu1 %v12444_v58 }
 0x1b0   :  { %7750 = vmatpush1.bf16.msra.mxu1 %v7749_v55 }
 0x1b1   :  { %7690 = vmatpush1.bf16.msra.mxu0 %v7689_v41  ;;  %7752 = vmatprep.subr.bf16.mxu1 %v7751_v62 }
 0x1b2   :  { %7692 = vmatprep.subr.bf16.mxu0 %v10324_v56 }
 0x1b4   :  { %7754 = vmatpush1.bf16.msra.mxu1 %v7753_v44 }
 0x1b7   :  { %1054 = vmatmul.mubr.f32.vlgmr.msra.gmra.mrb[0].mxu1 %v10335_v52 }
 0x215   :  { %v501_v55 = vpop.xlane.xlu0 %500 }
 0x216   :  { %9176 = vrsqrt.f32 %v501_v55  ;;  %vm518_vm0 = vcmp.eq.f32.partialorder %v501_v55, inf  ;;  %v521_v35 = vand.u32 2147483648, %v501_v55  ;;  %vm520_vm1 = vcmp.eq.f32.partialorder %v501_v55, 0.0 }
 0x219   :  { %v503_v41 = vpop.xlane.xlu1 %502 }
 0x21a   :  { %9178 = vrsqrt.f32 %v503_v41  ;;  %vm525_vm2 = vcmp.eq.f32.partialorder %v503_v41, inf  ;;  %v528_v42 = vand.u32 2147483648, %v503_v41  ;;  %vm527_vm3 = vcmp.eq.f32.partialorder %v503_v41, 0.0 }
 0x21d   :  { %v505_v50 = vpop.xlane.xlu0 %504 }
 0x21e   :  { %9180 = vrsqrt.f32 %v505_v50  ;;  %vm532_vm4 = vcmp.eq.f32.partialorder %v505_v50, inf  ;;  %vm534_vm5 = vcmp.eq.f32.partialorder %v505_v50, 0.0 }
 0x220   :  { %v9177_v38 = vpop.eup %9176 }
 0x221   :  { %v517_v62 = vmul.f32 %v9177_v38, %v501_v55  ;;  %v507_v51 = vpop.xlane.xlu0 %506 }
 0x222   :  { %9182 = vrsqrt.f32 %v507_v51  ;;  %vm539_vm6 = vcmp.eq.f32.partialorder %v507_v51, inf  ;;  %vm541_vm7 = vcmp.eq.f32.partialorder %v507_v51, 0.0 }
 0x223   :  { %v519_v49 = vsel %vm518_vm0, %v501_v55, %v517_v62  ;;  %v535_v62 = vand.u32 2147483648, %v505_v50 }
 0x224   :  { %v9179_v59 = vpop.eup %9178  ;;  %v522_v44 = vsel %vm520_vm1, %v521_v35, %v519_v49 }
 0x225   :  { %v580_v58 = vadd.f32 1e-07, %v522_v44  ;;  %v524_v32 = vmul.f32 %v9179_v59, %v503_v41  ;;  %v509_v45 = vpop.xlane.xlu1 %508  ;;  %vm572_vm10 = vcmp.gt.f32.partialorder %v522_v44, 3.0  ;;  %v637_v44 = vld [vmem:[%s12433_s3 + $0x88] sm:$0xff] }
 0x226   :  { %9184 = vrsqrt.f32 %v509_v45  ;;  %vm546_vm8 = vcmp.eq.f32.partialorder %v509_v45, inf  ;;  %vm548_vm9 = vcmp.eq.f32.partialorder %v509_v45, 0.0 }
 0x227   :  { %9186 = vrcp.f32 %v580_v58  ;;  %v526_v46 = vsel %vm525_vm2, %v503_v41, %v524_v32 }
 0x228   :  { %v9181_v43 = vpop.eup %9180  ;;  %v529_v29 = vsel %vm527_vm3, %v528_v42, %v526_v46  ;;  %v542_v42 = vand.u32 2147483648, %v507_v51 }
 0x229   :  { %v531_v38 = vmul.f32 %v9181_v43, %v505_v50  ;;  %v511_v26 = vpop.xlane.xlu0 %510  ;;  %v581_v39 = vadd.f32 1e-07, %v529_v29  ;;  %vm573_vm12 = vcmp.gt.f32.partialorder %v529_v29, 3.0 }
 0x22a   :  { %9188 = vrsqrt.f32 %v511_v26  ;;  %vm553_vm11 = vcmp.eq.f32.partialorder %v511_v26, inf  ;;  %v556_v30 = vand.u32 2147483648, %v511_v26  ;;  %vm555_vm13 = vcmp.eq.f32.partialorder %v511_v26, 0.0 }
 0x22b   :  { %9190 = vrcp.f32 %v581_v39  ;;  %v533_v55 = vsel %vm532_vm4, %v505_v50, %v531_v38 }
 0x22c   :  { %v9183_v35 = vpop.eup %9182  ;;  %v10338_v49 = vsel %vm534_vm5, %v535_v62, %v533_v55  ;;  %v628_v62 = vld [vmem:[%s12433_s3 + $0x40] sm:$0xff]  ;;  %v631_v55 = vld [vmem:[%s12433_s3 + $0x58] sm:$0xff] }
 0x22d   :  { %v538_v59 = vmul.f32 %v9183_v35, %v507_v51  ;;  %v10340_v36 = vpop.xlane.xlu1 %512  ;;  %v582_v32 = vadd.f32 1e-07, %v10338_v49  ;;  %v7695_v37 = vpack.c.bf16 %v631_v55, %v628_v62  ;;  %v12652_v62 = vmov 0.0  }
 0x22e   :  { %9192 = vrsqrt.f32 %v10340_v36  ;;  %vm560_vm14 = vcmp.eq.f32.partialorder %v10340_v36, inf  ;;  %vm562_vm15 = vcmp.eq.f32.partialorder %v10340_v36, 0.0  ;;  %vm574_vm0 = vcmp.gt.f32.partialorder %v10338_v49, 3.0 }
 0x22f   :  { %9194 = vrcp.f32 %v582_v32  ;;  %v540_v43 = vsel %vm539_vm6, %v507_v51, %v538_v59  ;;  %v549_v51 = vand.u32 2147483648, %v509_v45 }
 0x230   :  { %v9185_v46 = vpop.eup %9184  ;;  %v10344_v58 = vsel %vm541_vm7, %v542_v42, %v540_v43 }
 0x231   :  { %v9187_v39 = vpop.eup %9186  ;;  %v545_v41 = vmul.f32 %v9185_v46, %v509_v45  ;;  %v10346_v50 = vpop.xlane.xlu0 %514  ;;  %v583_v38 = vadd.f32 1e-07, %v10344_v58  ;;  %vm575_vm3 = vcmp.gt.f32.partialorder %v10344_v58, 3.0 }
 0x232   :  { %9196 = vrsqrt.f32 %v10346_v50  ;;  %v589_v35 = vmul.f32 3.0, %v9187_v39  ;;  %vm567_vm1 = vcmp.eq.f32.partialorder %v10346_v50, inf  ;;  %vm569_vm2 = vcmp.eq.f32.partialorder %v10346_v50, 0.0 }
 0x233   :  { %9198 = vrcp.f32 %v583_v38  ;;  %v547_v59 = vsel %vm546_vm8, %v509_v45, %v545_v41  ;;  %v634_v45 = vld [vmem:[%s12433_s3 + $0x70] sm:$0xff]  ;;  %vm9424_vm8 = vmmov 0  }
 0x234   :  { %v9189_v32 = vpop.eup %9188  ;;  %v10356_v42 = vsel %vm548_vm9, %v549_v51, %v547_v59  ;;  %v604_v40 = vsel %vm572_vm10, %v589_v35, 1.0 }
 0x235   :  { %v9191_v43 = vpop.eup %9190  ;;  %v552_v46 = vmul.f32 %v9189_v32, %v511_v26  ;;  %v584_v23 = vadd.f32 1e-07, %v10356_v42  ;;  %v10360_v20 = vmul.f32 %v10097_v47, %v604_v40  ;;  %vm576_vm4 = vcmp.gt.f32.partialorder %v10356_v42, 3.0 }
 0x236   :  { %v591_v33 = vmul.f32 3.0, %v9191_v43 }
 0x237   :  { %9200 = vrcp.f32 %v584_v23  ;;  %v554_v39 = vsel %vm553_vm11, %v511_v26, %v552_v46  ;;  %750 = vmatmul.mubr.f32.vlgmr.msra.gmra.mrb[16].mxu0 %v10360_v20  ;;  %v563_v26 = vand.u32 2147483648, %v10340_v36 }
 0x238   :  { %v9193_v41 = vpop.eup %9192  ;;  %v605_v40 = vsel %vm573_vm12, %v591_v33, 1.0  ;;  %v10369_v47 = vsel %vm555_vm13, %v556_v30, %v554_v39  ;;  %7694 = vmatpush3.bf16.msra.mxu0 %v10324_v56  ;;  %755 = vmatprep.mubr.f32.mxu0 %v12652_v62  ;;  %v7699_v33 = vpack.c.bf16 %v637_v44, %v634_v45  ;;  %v643_v56 = vld [vmem:[%s12433_s3 + $0xb8] sm:$0xff]  ;;  %v570_v45 = vand.u32 2147483648, %v10346_v50 }
 0x239   :  { %v9195_v38 = vpop.eup %9194  ;;  %v559_v29 = vmul.f32 %v9193_v41, %v10340_v36  ;;  %v10375_v55 = vmul.f32 %v10101_v53, %v605_v40  ;;  %v585_v23 = vadd.f32 1e-07, %v10369_v47  ;;  %7696 = vmatprep.subr.bf16.mxu0 %v7695_v37  ;;  %v640_v53 = vld [vmem:[%s12433_s3 + $0xa0] sm:$0xff]  ;;  %vm577_vm5 = vcmp.gt.f32.partialorder %v10369_v47, 3.0 }
 0x23a   :  { %v593_v30 = vmul.f32 3.0, %v9195_v38  ;;  %v7703_v44 = vpack.c.bf16 %v643_v56, %v640_v53  ;;  %v664_v47 = vld [vmem:[%s12433_s3 + $0x160] sm:$0xff] }
 0x23b   :  { %v561_v51 = vsel %vm560_vm14, %v10340_v36, %v559_v29  ;;  %9202 = vrcp.f32 %v585_v23  ;;  %756 = vmatmul.mubr.f32.gmra.mrb[18].mxu0 %v10375_v55 }
 0x23c   :  { %v9197_v35 = vpop.eup %9196  ;;  %v606_v59 = vsel %vm574_vm0, %v593_v30, 1.0  ;;  %v564_v32 = vsel %vm562_vm15, %v563_v26, %v561_v51  ;;  %7698 = vmatpush3.bf16.msra.mxu0 %v7695_v37  ;;  %761 = vmatprep.mubr.f32.mxu0 %v12652_v62  ;;  %v646_v37 = vld [vmem:[%s12433_s3 + $0xd0] sm:$0xff]  ;;  %v652_v30 = vld [vmem:[%s12433_s3 + $0x100] sm:$0xff]  ;;  %v655_v51 = vld [vmem:[%s12433_s3 + $0x118] sm:$0xff] }
 0x23d   :  { %v9199_v43 = vpop.eup %9198  ;;  %v566_v46 = vmul.f32 %v9197_v35, %v10346_v50  ;;  %v10393_v36 = vmul.f32 %v10105_v60, %v606_v59  ;;  %v586_v49 = vadd.f32 1e-07, %v564_v32  ;;  %7700 = vmatprep.subr.bf16.mxu0 %v7699_v33  ;;  %v649_v60 = vld [vmem:[%s12433_s3 + $0xe8] sm:$0xff]  ;;  %v7711_v42 = vpack.c.bf16 %v655_v51, %v652_v30  ;;  %v658_v35 = vld [vmem:[%s12433_s3 + $0x130] sm:$0xff] }
 0x23e   :  { %v595_v39 = vmul.f32 3.0, %v9199_v43  ;;  %v7707_v23 = vpack.c.bf16 %v649_v60, %v646_v37  ;;  %v661_v59 = vld [vmem:[%s12433_s3 + $0x148] sm:$0xff]  ;;  %vm578_vm6 = vcmp.gt.f32.partialorder %v564_v32, 3.0 }
 0x23f   :  { %v568_v41 = vsel %vm567_vm1, %v10346_v50, %v566_v46  ;;  %9204 = vrcp.f32 %v586_v49  ;;  %762 = vmatmul.mubr.f32.gmra.mrb[20].mxu0 %v10393_v36  ;;  %v7715_v49 = vpack.c.bf16 %v661_v59, %v658_v35  ;;  %v958_v30 = vld [vmem:[%s12434_s4 + $0x88] sm:$0xff]  ;;  %v979_v59 = vld [vmem:[%s12434_s4 + $0x130] sm:$0xff] }
 0x240   :  { %v607_v40 = vsel %vm575_vm3, %v595_v39, 1.0  ;;  %v571_v38 = vsel %vm569_vm2, %v570_v45, %v568_v41  ;;  %7702 = vmatpush3.bf16.msra.mxu0 %v7699_v33  ;;  %767 = vmatprep.mubr.f32.mxu0 %v12652_v62 }
 0x241   :  { %v9201_v29 = vpop.eup %9200  ;;  %v10409_v50 = vmul.f32 %v10109_v57, %v607_v40  ;;  %v587_v58 = vadd.f32 1e-07, %v571_v38  ;;  %7704 = vmatprep.subr.bf16.mxu0 %v7703_v44  ;;  %vm579_vm7 = vcmp.gt.f32.partialorder %v571_v38, 3.0 }
 0x242   :  { %v597_v26 = vmul.f32 3.0, %v9201_v29  ;;  %v943_v29 = vld [vmem:[%s12434_s4 + $0x10] sm:$0xff] }
 0x243   :  { %9206 = vrcp.f32 %v587_v58  ;;  %768 = vmatmul.mubr.f32.gmra.mrb[22].mxu0 %v10409_v50  ;;  %v12446_v58 = vmov 0.0|0.0  }
 0x244   :  { %v608_v33 = vsel %vm576_vm4, %v597_v26, 1.0  ;;  %7706 = vmatpush3.bf16.msra.mxu0 %v7703_v44  ;;  %773 = vmatprep.mubr.f32.mxu0 %v12652_v62  ;;  %v667_v44 = vld [vmem:[%s12433_s3 + $0x178] sm:$0xff] }
 0x245   :  { %v9203_v57 = vpop.eup %9202  ;;  %v616_v53 = vmul.f32 %v10119_v63, %v608_v33  ;;  %7708 = vmatprep.subr.bf16.mxu0 %v7707_v23  ;;  %v7719_v37 = vpack.c.bf16 %v667_v44, %v664_v47 }
 0x246   :  { %v599_v56 = vmul.f32 3.0, %v9203_v57  ;;  %v970_v57 = vld [vmem:[%s12434_s4 + $0xe8] sm:$0xff] }
 0x247   :  { %774 = vmatmul.mubr.f32.gmra.mrb[24].mxu0 %v616_v53 }
 0x248   :  { %v609_v43 = vsel %vm577_vm5, %v599_v56, 1.0  ;;  %7710 = vmatpush3.bf16.msra.mxu0 %v7707_v23  ;;  %779 = vmatprep.mubr.f32.mxu0 %v12652_v62  ;;  %v952_v23 = vld [vmem:[%s12434_s4 + $0x58] sm:$0xff] }
 0x249   :  { %v9205_v46 = vpop.eup %9204  ;;  %v617_v63 = vmul.f32 %v10144_v61, %v609_v43  ;;  %7712 = vmatprep.subr.bf16.mxu0 %v7711_v42  ;;  %v976_v56 = vld [vmem:[%s12434_s4 + $0x118] sm:$0xff]  ;;  %v982_v43 = vld [vmem:[%s12434_s4 + $0x148] sm:$0xff] }
 0x24a   :  { %v601_v45 = vmul.f32 3.0, %v9205_v46  ;;  %v7774_v46 = vpack.c.bf16 %v982_v43, %v979_v59 }
 0x24b   :  { %780 = vmatmul.mubr.f32.gmra.mrb[26].mxu0 %v617_v63 }
 0x24c   :  { %v610_v39 = vsel %vm578_vm6, %v601_v45, 1.0  ;;  %7714 = vmatpush3.bf16.msra.mxu0 %v7711_v42  ;;  %785 = vmatprep.mubr.f32.mxu0 %v12652_v62  ;;  %v973_v42 = vld [vmem:[%s12434_s4 + $0x100] sm:$0xff] }
 0x24d   :  { %v9207_v41 = vpop.eup %9206  ;;  %v618_v61 = vmul.f32 %v10172_v54, %v610_v39  ;;  %7716 = vmatprep.subr.bf16.mxu0 %v7715_v49  ;;  %v946_v54 = vld [vmem:[%s12434_s4 + $0x28] sm:$0xff]  ;;  %v7771_v35 = vpack.c.bf16 %v976_v56, %v973_v42  ;;  %v12653_v39 = vlaneseq }
 0x24e   :  { %v603_v60 = vmul.f32 3.0, %v9207_v41  ;;  %v7756_v38 = vpack.c.bf16 %v946_v54, %v943_v29 }
 0x24f   :  { %786 = vmatmul.mubr.f32.gmra.mrb[28].mxu0 %v618_v61  ;;  %v10504_v41 = vshrl.u32 %v12653_v39, 7 }
 0x250   :  { %v611_v32 = vsel %vm579_vm7, %v603_v60, 1.0  ;;  %7718 = vmatpush3.bf16.msra.mxu0 %v7715_v49  ;;  %791 = vmatprep.mubr.f32.mxu0 %v12652_v62  ;;  %v988_v49 = vld [vmem:[%s12434_s4 + $0x178] sm:$0xff] }
 0x251   :  { %v619_v40 = vmul.f32 %v10200_v48, %v611_v32  ;;  %7720 = vmatprep.subr.bf16.mxu0 %v7719_v37  ;;  %v949_v48 = vld [vmem:[%s12434_s4 + $0x40] sm:$0xff]  ;;  %12654 = vst [vmem:[#allocation82_spill] sm:$0xff] %v10504_v41  ;;  %v10513_v60 = vsub.s32 1, %v10504_v41 }
 0x252   :  { %v7759_v26 = vpack.c.bf16 %v952_v23, %v949_v48 }
 0x253   :  { %792 = vmatmul.mubr.f32.gmra.mrb[30].mxu0 %v619_v40  ;;  %12656 = vst [vmem:[#allocation84_spill] sm:$0xff] %v10513_v60 }
 0x254   :  { %7722 = vmatpush3.bf16.msra.mxu0 %v7719_v37  ;;  %6775 = vmatprep.mubr.f32.mxu0 %v10360_v20  ;;  %v955_v20 = vld [vmem:[%s12434_s4 + $0x70] sm:$0xff]  ;;  %v668_v37 = vld [vmem:[%s12435_s5] sm:$0x7] }
 0x255   :  { %7755 = vmatprep.subr.bf16.mxu0 %v12446_v58  ;;  %v7762_v51 = vpack.c.bf16 %v958_v30, %v955_v20 }
 0x257   :  { %6776 = vmatmul.mubr.f32.vlgmr.msra.gmra.mrb[32].mxu0 %v10375_v55  ;;  %v961_v55 = vld [vmem:[%s12434_s4 + $0xa0] sm:$0xff] }
 0x258   :  { %7757 = vmatpush3.bf16.msra.mxu0 %v7756_v38  ;;  %6778 = vmatprep.mubr.f32.mxu0 %v10393_v36  ;;  %v964_v36 = vld [vmem:[%s12434_s4 + $0xb8] sm:$0xff] }
 0x259   :  { %7758 = vmatprep.subr.bf16.mxu0 %v12446_v58  ;;  %v7765_v33 = vpack.c.bf16 %v964_v36, %v961_v55 }
 0x25b   :  { %6779 = vmatmul.mubr.f32.gmra.mrb[34].mxu0 %v10409_v50  ;;  %v967_v50 = vld [vmem:[%s12434_s4 + $0xd0] sm:$0xff] }
 0x25c   :  { %7760 = vmatpush3.bf16.msra.mxu0 %v7759_v26  ;;  %6781 = vmatprep.mubr.f32.mxu0 %v616_v53  ;;  %v7768_v53 = vpack.c.bf16 %v970_v57, %v967_v50 }
 0x25d   :  { %7761 = vmatprep.subr.bf16.mxu0 %v12446_v58 }
 0x25f   :  { %6782 = vmatmul.mubr.f32.gmra.mrb[36].mxu0 %v617_v63  ;;  %v985_v63 = vld [vmem:[%s12434_s4 + $0x160] sm:$0xff] }
 0x260   :  { %7763 = vmatpush3.bf16.msra.mxu0 %v7762_v51  ;;  %6784 = vmatprep.mubr.f32.mxu0 %v618_v61  ;;  %v7777_v45 = vpack.c.bf16 %v988_v49, %v985_v63  ;;  %v10507_v61 = vsub.s32 0, %v10504_v41 }
 0x261   :  { %7764 = vmatprep.subr.bf16.mxu0 %v12446_v58 }
 0x262   :  { %12655 = vst [vmem:[#allocation83_spill] sm:$0xff] %v10507_v61  ;;  %v673_v32 = vrot.slane %v668_v37, %v10507_v61 }
 0x263   :  { %6785 = vmatmul.mubr.f32.gmra.mrb[38].mxu0 %v619_v40  ;;  %v677_v40 = vrot.slane %v668_v37, %v10513_v60 }
 0x264   :  { %7766 = vmatpush3.bf16.msra.mxu0 %v7765_v33  ;;  %6819 = vmatprep.mubr.msk.f32.mxu0 %vm9424_vm8, %v12652_v62 }
 0x265   :  { %7767 = vmatprep.subr.bf16.mxu0 %v12446_v58 }
 0x268   :  { %7769 = vmatpush3.bf16.msra.mxu0 %v7768_v53 }
 0x269   :  { %7770 = vmatprep.subr.bf16.mxu0 %v12446_v58 }
 0x26c   :  { %7772 = vmatpush3.bf16.msra.mxu0 %v7771_v35 }
 0x26d   :  { %7773 = vmatprep.subr.bf16.mxu0 %v12446_v58 }
 0x270   :  { %7775 = vmatpush3.bf16.msra.mxu0 %v7774_v46 }
 0x271   :  { %7776 = vmatprep.subr.bf16.mxu0 %v12446_v58 }
 0x274   :  { %7778 = vmatpush3.bf16.msra.mxu0 %v7777_v45 }
 0x277   :  { %6820 = vmatmul.mubr.f32.vlgmr.msra.gmra.mrb[40].mxu0 %v10335_v52 }
 0x28a   :  { %v1055_v47 = vpop.f32.mrb[0].mxu1 }
 0x28b   :  { %v1057_v44 = vpop.f32.mrb[1].mxu1 }
 0x30a   :  { %v751_v29 = vpop.f32.mrb[16].mxu0 }
 0x30b   :  { %v752_v54 = vadd.f32 %v751_v29, %v673_v32  ;;  %v753_v38 = vpop.f32.mrb[17].mxu0 }
 0x30c   :  { %v754_v48 = vadd.f32 %v753_v38, %v677_v40  ;;  %v12448_v38 = vsub.s32 2, %v10504_v41 }
 0x30d   :  { %v1130_v23 = vadd.f32 %v1055_v47, %v752_v54 }
 0x30e   :  { %v1131_v26 = vadd.f32 %v1057_v44, %v754_v48  ;;  %v757_v20 = vpop.f32.mrb[18].mxu0 }
 0x30f   :  { %v10517_v30 = vadd.f32 %v757_v20, %v673_v32  ;;  %v759_v51 = vpop.f32.mrb[19].mxu0 }
 0x310   :  { %v10519_v55 = vadd.f32 %v759_v51, %v677_v40 }
 0x312   :  { %v763_v36 = vpop.f32.mrb[20].mxu0 }
 0x313   :  { %v10521_v33 = vadd.f32 %v763_v36, %v673_v32  ;;  %v765_v50 = vpop.f32.mrb[21].mxu0 }
 0x314   :  { %v10523_v57 = vadd.f32 %v765_v50, %v677_v40  ;;  %v681_v50 = vrot.slane %v668_v37, %v12448_v38  ;;  %v6173_v38 = vmul.f32 -1.442695, %v1131_v26 }
 0x315   :  { %12657 = vst [vmem:[#allocation85_spill] sm:$0xff] %v10521_v33 }
 0x316   :  { %12658 = vst [vmem:[#allocation86_spill] sm:$0xff] %v10523_v57  ;;  %v769_v53 = vpop.f32.mrb[22].mxu0 }
 0x317   :  { %v10525_v42 = vadd.f32 %v769_v53, %v673_v32  ;;  %v771_v56 = vpop.f32.mrb[23].mxu0 }
 0x318   :  { %v10527_v35 = vadd.f32 %v771_v56, %v677_v40 }
 0x319   :  { %12659 = vst [vmem:[#allocation87_spill] sm:$0xff] %v10525_v42 }
 0x31a   :  { %12660 = vst [vmem:[#allocation88_spill] sm:$0xff] %v10527_v35  ;;  %v775_v59 = vpop.f32.mrb[24].mxu0 }
 0x31b   :  { %v10529_v43 = vadd.f32 %v775_v59, %v673_v32  ;;  %v777_v46 = vpop.f32.mrb[25].mxu0 }
 0x31c   :  { %v10531_v63 = vadd.f32 %v777_v46, %v677_v40 }
 0x31d   :  { %12661 = vst [vmem:[#allocation89_spill] sm:$0xff] %v10529_v43 }
 0x31e   :  { %12662 = vst [vmem:[#allocation90_spill] sm:$0xff] %v10531_v63  ;;  %v781_v49 = vpop.f32.mrb[26].mxu0 }
 0x31f   :  { %v10533_v45 = vadd.f32 %v781_v49, %v673_v32  ;;  %v783_v47 = vpop.f32.mrb[27].mxu0  ;;  %v6172_v49 = vmul.f32 -1.442695, %v1130_v23 }
 0x320   :  { %v10535_v44 = vadd.f32 %v783_v47, %v677_v40 }
 0x321   :  { %12663 = vst [vmem:[#allocation91_spill] sm:$0xff] %v10533_v45  ;;  %9208 = vpow2.f32 %v6172_v49 }
 0x322   :  { %12664 = vst [vmem:[#allocation92_spill] sm:$0xff] %v10535_v44  ;;  %v787_v39 = vpop.f32.mrb[28].mxu0  ;;  %9210 = vpow2.f32 %v6173_v38 }
 0x323   :  { %v10537_v29 = vadd.f32 %v787_v39, %v673_v32  ;;  %v789_v54 = vpop.f32.mrb[29].mxu0 }
 0x324   :  { %v10540_v48 = vadd.f32 %v789_v54, %v677_v40 }
 0x325   :  { %12665 = vst [vmem:[#allocation93_spill] sm:$0xff] %v10537_v29 }
 0x326   :  { %12666 = vst [vmem:[#allocation94_spill] sm:$0xff] %v10540_v48  ;;  %v793_v20 = vpop.f32.mrb[30].mxu0 }
 0x327   :  { %v10542_v51 = vadd.f32 %v793_v20, %v673_v32  ;;  %v795_v36 = vpop.f32.mrb[31].mxu0 }
 0x328   :  { %v10546_v53 = vadd.f32 %v795_v36, %v677_v40 }
 0x329   :  { %12667 = vst [vmem:[#allocation95_spill] sm:$0xff] %v10542_v51 }
 0x32a   :  { %12668 = vst [vmem:[#allocation96_spill] sm:$0xff] %v10546_v53  ;;  %v6777_v56 = vpop.f32.mrb[32].mxu0 }
 0x32b   :  { %v10548_v59 = vadd.f32 %v6777_v56, %v681_v50  ;;  %v864_v46 = vpop.f32.mrb[33].mxu0  ;;  %v9209_v23 = vpop.eup %9208 }
 0x32e   :  { %v6780_v47 = vpop.f32.mrb[34].mxu0 }
 0x32f   :  { %v10550_v39 = vadd.f32 %v6780_v47, %v681_v50  ;;  %v874_v58 = vpop.f32.mrb[35].mxu0  ;;  %v1138_v47 = vadd.f32 1.0, %v9209_v23 }
 0x330   :  { %v10552_v54 = vadd.f32 %v874_v58, %v681_v50  ;;  %v10565_v58 = vld [vmem:[%s12436_s6] ss:$0 sm:$0xff] }
 0x331   :  { %12669 = vst [vmem:[#allocation97_spill] sm:$0xff] %v10550_v39  ;;  %9212 = vrcp.f32 %v1138_v47 }
 0x332   :  { %12670 = vst [vmem:[#allocation98_spill] sm:$0xff] %v10552_v54  ;;  %v6783_v32 = vpop.f32.mrb[36].mxu0 }
 0x333   :  { %v10554_v20 = vadd.f32 %v6783_v32, %v681_v50  ;;  %v884_v51 = vpop.f32.mrb[37].mxu0  ;;  %v9211_v32 = vpop.eup %9210 }
 0x334   :  { %v10556_v48 = vadd.f32 %v884_v51, %v681_v50 }
 0x335   :  { %12671 = vst [vmem:[#allocation99_spill] sm:$0xff] %v10554_v20 }
 0x336   :  { %12672 = vst [vmem:[#allocation100_spill] sm:$0xff] %v10556_v48  ;;  %v6786_v37 = vpop.f32.mrb[38].mxu0 }
 0x337   :  { %v10558_v40 = vadd.f32 %v6786_v37, %v681_v50  ;;  %v894_v36 = vpop.f32.mrb[39].mxu0 }
 0x338   :  { %v10560_v56 = vadd.f32 %v894_v36, %v681_v50  ;;  %v1139_v36 = vadd.f32 1.0, %v9211_v32 }
 0x339   :  { %12673 = vst [vmem:[#allocation101_spill] sm:$0xff] %v10558_v40  ;;  %v865_v40 = vadd.f32 %v864_v46, %v681_v50 }
 0x33a   :  { %12674 = vst [vmem:[#allocation102_spill] sm:$0xff] %v10560_v56 }
 0x33b   :  { %v9213_v37 = vpop.eup %9212 }
 0x34a   :  { %v1126_v49 = vpop.f32.mrb[40].mxu0 }
 0x34b   :  { %v1144_v51 = vadd.f32 %v10565_v58, %v1126_v49  ;;  %v6821_v53 = vpop.f32.mrb[41].mxu0 }
 0x34d   :  { %v1145_v29 = vmul.f32 %v9213_v37, %v1144_v51 }
 0x34f   :  { %v1146_v56 = vadd.f32 %v1145_v29, %v865_v40 }
 0x351   :  { %9214 = vtanh.f32 %v1146_v56 }
 0x352   :  { %9216 = vrcp.f32 %v1139_v36 }
 0x35b   :  { %v9215_v26 = vpop.eup %9214 }
 0x35c   :  { %v1148_v38 = vsub.f32 %v10335_v52, %v9215_v26  ;;  %v9217_v23 = vpop.eup %9216 }
 0x35e   :  { %v1149_v47 = vmul.f32 %v9217_v23, %v1148_v38 }
 0x360   :  { %v10569_v20 = vadd.f32 %v9215_v26, %v1149_v47 }
 0x361   :  { %9414 = dma.done.wait [#allocation5], 12288 }
 0x362   :  { %9415 = vsyncadd [#allocation5], 4294955008  ;;  %v12675_v44 = vmov 0.0|0.0   ;;  %1300 = vmatprep.mubr.f32.mxu1 %v12652_v62  ;;  %6854 = vmatprep.mubr.msk.f32.mxu0 %vm9424_vm8, %v12652_v62  ;;  %v1189_v29 = vld [vmem:[%s12434_s4 + $0x8] sm:$0xff]  ;;  %v1192_v52 = vld [vmem:[%s12434_s4 + $0x20] sm:$0xff] }
 0x363   :  { %7811 = vmatprep.subr.bf16.mxu0 %v12675_v44  ;;  %v1188_v50 = vld [vmem:[%s12434_s4] sm:$0xff]  ;;  %v10584_v53 = vpack.c.bf16 %v1192_v52, %v1189_v29  ;;  %v1191_v46 = vld [vmem:[%s12434_s4 + $0x18] sm:$0xff]  ;;  %v1198_v56 = vld [vmem:[%s12434_s4 + $0x50] sm:$0xff] }
 0x364   :  { %v1195_v40 = vld [vmem:[%s12434_s4 + $0x38] sm:$0xff]  ;;  %v10595_v49 = vpack.c.bf16 %v1191_v46, %v1188_v50  ;;  %v1194_v51 = vld [vmem:[%s12434_s4 + $0x30] sm:$0xff]  ;;  %v1197_v37 = vld [vmem:[%s12434_s4 + $0x48] sm:$0xff] }
 0x365   :  { %v10597_v32 = vpack.c.bf16 %v1198_v56, %v1195_v40  ;;  %v1201_v36 = vld [vmem:[%s12434_s4 + $0x68] sm:$0xff]  ;;  %7780 = vmatprep.subr.bf16.mxu1 %v10584_v53  ;;  %v1204_v26 = vld [vmem:[%s12434_s4 + $0x80] sm:$0xff]  ;;  %v10613_v38 = vpack.c.bf16 %v1197_v37, %v1194_v51  ;;  %v1203_v29 = vld [vmem:[%s12434_s4 + $0x78] sm:$0xff] }
 0x366   :  { %7782 = vmatpush1.bf16.msra.mxu1 %v10595_v49  ;;  %v10616_v23 = vpack.c.bf16 %v1204_v26, %v1201_v36  ;;  %v1200_v47 = vld [vmem:[%s12434_s4 + $0x60] sm:$0xff]  ;;  %v1207_v52 = vld [vmem:[%s12434_s4 + $0x98] sm:$0xff]  ;;  %v1210_v50 = vld [vmem:[%s12434_s4 + $0xb0] sm:$0xff] }
 0x367   :  { %7784 = vmatprep.subr.bf16.mxu1 %v10597_v32  ;;  %v10631_v46 = vpack.c.bf16 %v1203_v29, %v1200_v47  ;;  %v1206_v40 = vld [vmem:[%s12434_s4 + $0x90] sm:$0xff]  ;;  %v10637_v56 = vpack.c.bf16 %v1210_v50, %v1207_v52  ;;  %v1209_v51 = vld [vmem:[%s12434_s4 + $0xa8] sm:$0xff]  ;;  %v1216_v47 = vld [vmem:[%s12434_s4 + $0xe0] sm:$0xff] }
 0x368   :  { %v1190_v37 = vld [vmem:[%s12434_s4 + $0x10] sm:$0xff]  ;;  %v1193_v36 = vld [vmem:[%s12434_s4 + $0x28] sm:$0xff]  ;;  %v1196_v52 = vld [vmem:[%s12434_s4 + $0x40] sm:$0xff]  ;;  %v10663_v45 = vpack.c.bf16 %v1209_v51, %v1206_v40 }
 0x369   :  { %v1213_v26 = vld [vmem:[%s12434_s4 + $0xc8] sm:$0xff]  ;;  %v10654_v29 = vpack.c.bf16 %v1193_v36, %v1190_v37  ;;  %v1199_v50 = vld [vmem:[%s12434_s4 + $0x58] sm:$0xff]  ;;  %v1212_v48 = vld [vmem:[%s12434_s4 + $0xc0] sm:$0xff] }
 0x36a   :  { %7786 = vmatpush1.bf16.msra.mxu1 %v10613_v38  ;;  %v10669_v37 = vpack.c.bf16 %v1199_v50, %v1196_v52  ;;  %v10672_v36 = vpack.c.bf16 %v1216_v47, %v1213_v26  ;;  %v1215_v63 = vld [vmem:[%s12434_s4 + $0xd8] sm:$0xff]  ;;  %v1202_v40 = vld [vmem:[%s12434_s4 + $0x70] sm:$0xff]  ;;  %v1205_v51 = vld [vmem:[%s12434_s4 + $0x88] sm:$0xff] }
 0x36b   :  { %7788 = vmatprep.subr.bf16.mxu1 %v10616_v23  ;;  %7813 = vmatpush3.bf16.msra.mxu0 %v10654_v29  ;;  %v1219_v52 = vld [vmem:[%s12434_s4 + $0xf8] sm:$0xff]  ;;  %v1222_v26 = vld [vmem:[%s12434_s4 + $0x110] sm:$0xff]  ;;  %v10691_v47 = vpack.c.bf16 %v1215_v63, %v1212_v48  ;;  %v10697_v43 = vpack.c.bf16 %v1205_v51, %v1202_v40  ;;  %v1221_v35 = vld [vmem:[%s12434_s4 + $0x108] sm:$0xff] }
 0x36c   :  { %7814 = vmatprep.subr.bf16.mxu0 %v12675_v44  ;;  %v1218_v50 = vld [vmem:[%s12434_s4 + $0xf0] sm:$0xff]  ;;  %v10700_v39 = vpack.c.bf16 %v1222_v26, %v1219_v52  ;;  %v1208_v63 = vld [vmem:[%s12434_s4 + $0xa0] sm:$0xff]  ;;  %v1211_v48 = vld [vmem:[%s12434_s4 + $0xb8] sm:$0xff] }
 0x36d   :  { %v1225_v40 = vld [vmem:[%s12434_s4 + $0x128] sm:$0xff]  ;;  %v1228_v51 = vld [vmem:[%s12434_s4 + $0x140] sm:$0xff]  ;;  %v10719_v52 = vpack.c.bf16 %v1221_v35, %v1218_v50  ;;  %v10725_v42 = vpack.c.bf16 %v1211_v48, %v1208_v63  ;;  %v1227_v57 = vld [vmem:[%s12434_s4 + $0x138] sm:$0xff] }
 0x36e   :  { %7790 = vmatpush1.bf16.msra.mxu1 %v10631_v46  ;;  %12676 = vst [vmem:[#allocation103_spill] sm:$0xff] %v10700_v39  ;;  %v1224_v26 = vld [vmem:[%s12434_s4 + $0x120] sm:$0xff]  ;;  %v10728_v54 = vpack.c.bf16 %v1228_v51, %v1225_v40  ;;  %v1214_v35 = vld [vmem:[%s12434_s4 + $0xd0] sm:$0xff]  ;;  %v1217_v50 = vld [vmem:[%s12434_s4 + $0xe8] sm:$0xff] }
 0x36f   :  { %7792 = vmatprep.subr.bf16.mxu1 %v10637_v56  ;;  %7816 = vmatpush3.bf16.msra.mxu0 %v10669_v37  ;;  %12677 = vst [vmem:[#allocation104_spill] sm:$0xff] %v10719_v52  ;;  %v1231_v63 = vld [vmem:[%s12434_s4 + $0x158] sm:$0xff]  ;;  %v1234_v48 = vld [vmem:[%s12434_s4 + $0x170] sm:$0xff]  ;;  %v10747_v40 = vpack.c.bf16 %v1227_v57, %v1224_v26  ;;  %v10753_v33 = vpack.c.bf16 %v1217_v50, %v1214_v35  ;;  %v1233_v60 = vld [vmem:[%s12434_s4 + $0x168] sm:$0xff] }
 0x370   :  { %7817 = vmatprep.subr.bf16.mxu0 %v12675_v44  ;;  %12678 = vst [vmem:[#allocation105_spill] sm:$0xff] %v10728_v54  ;;  %v1230_v51 = vld [vmem:[%s12434_s4 + $0x150] sm:$0xff]  ;;  %v10756_v41 = vpack.c.bf16 %v1234_v48, %v1231_v63  ;;  %v1220_v57 = vld [vmem:[%s12434_s4 + $0x100] sm:$0xff]  ;;  %v1223_v26 = vld [vmem:[%s12434_s4 + $0x118] sm:$0xff]  ;;  %v10777_v63 = vpack.c.bf16 %v9519_v4, %v9504_v1  ;;  %v10797_v4 = vpack.c.bf16 %v9549_v10, %v9534_v7 }
 0x371   :  { %12679 = vst [vmem:[#allocation106_spill] sm:$0xff] %v10747_v40  ;;  %12680 = vst [vmem:[#allocation107_spill] sm:$0xff] %v10753_v33  ;;  %v10769_v35 = vpack.c.bf16 %v1233_v60, %v1230_v51  ;;  %v10772_v50 = vpack.c.bf16 %v1223_v26, %v1220_v57  ;;  %v1226_v48 = vld [vmem:[%s12434_s4 + $0x130] sm:$0xff]  ;;  %v1229_v60 = vld [vmem:[%s12434_s4 + $0x148] sm:$0xff]  ;;  %v10789_v51 = vpack.c.bf16 %v9514_v3, %v9499_v0 }
 0x372   :  { %7794 = vmatpush1.bf16.msra.mxu1 %v10663_v45  ;;  %12681 = vst [vmem:[#allocation108_spill] sm:$0xff] %v10756_v41  ;;  %12684 = vst [vmem:[#allocation111_spill] sm:$0xff] %v10777_v63  ;;  %v10792_v1 = vpack.c.bf16 %v1229_v60, %v1226_v48  ;;  %v1232_v57 = vld [vmem:[%s12434_s4 + $0x160] sm:$0xff]  ;;  %v1235_v0 = vld [vmem:[%s12434_s4 + $0x178] sm:$0xff]  ;;  %v10810_v3 = vpack.c.bf16 %v9544_v9, %v9529_v6  ;;  %v10818_v10 = vpack.c.bf16 %v9579_v16, %v9564_v13 }
 0x373   :  { %7796 = vmatprep.subr.bf16.mxu1 %v10672_v36  ;;  %7819 = vmatpush3.bf16.msra.mxu0 %v10697_v43  ;;  %12682 = vst [vmem:[#allocation109_spill] sm:$0xff] %v10769_v35  ;;  %12683 = vst [vmem:[#allocation110_spill] sm:$0xff] %v10772_v50  ;;  %v10813_v7 = vpack.c.bf16 %v1235_v0, %v1232_v57  ;;  %v10825_v6 = vpack.c.bf16 %v9574_v15, %v9559_v12  ;;  %v12687_v16 = vld [vmem:[#allocation18_spill] sm:$0xff]  ;;  %v12697_v26 = vld [vmem:[#allocation17_spill] sm:$0xff] }
 0x374   :  { %7820 = vmatprep.subr.bf16.mxu0 %v12675_v44  ;;  %12685 = vst [vmem:[#allocation112_spill] sm:$0xff] %v10792_v1  ;;  %v10830_v9 = vpack.c.bf16 %v9524_v5, %v9509_v2  ;;  %v10835_v13 = vpack.c.bf16 %v9609_v22, %v9594_v19  ;;  %v10842_v12 = vpack.c.bf16 %v9604_v21, %v9589_v18  ;;  %v12688_v18 = vld [vmem:[#allocation20_spill] sm:$0xff]  ;;  %v12689_v21 = vld [vmem:[#allocation14_spill] sm:$0xff]  ;;  %v12690_v22 = vld [vmem:[#allocation15_spill] sm:$0xff] }
 0x375   :  { %12686 = vst [vmem:[#allocation113_spill] sm:$0xff] %v10813_v7  ;;  %v10847_v2 = vpack.c.bf16 %v9554_v11, %v9539_v8  ;;  %v10852_v5 = vpack.c.bf16 %v9639_v28, %v9624_v25  ;;  %v10860_v15 = vpack.c.bf16 %v9634_v27, %v9619_v24  ;;  %v10865_v8 = vpack.c.bf16 %v9584_v17, %v9569_v14  ;;  %v12691_v17 = vld [vmem:[#allocation23_spill] sm:$0xff]  ;;  %v12692_v24 = vld [vmem:[#allocation26_spill] sm:$0xff]  ;;  %v12694_v28 = vld [vmem:[#allocation25_spill] sm:$0xff] }
 0x376   :  { %7798 = vmatpush1.bf16.msra.mxu1 %v10691_v47  ;;  %v10870_v11 = vpack.c.bf16 %v9669_v34, %v9654_v31  ;;  %v10876_v19 = vpack.c.bf16 %v12688_v18, %v12687_v16  ;;  %v10881_v14 = vpack.c.bf16 %v12690_v22, %v12689_v21  ;;  %v10886_v25 = vpack.c.bf16 %v12692_v24, %v12691_v17  ;;  %v12693_v27 = vld [vmem:[#allocation22_spill] sm:$0xff]  ;;  %v12696_v34 = vld [vmem:[#allocation16_spill] sm:$0xff]  ;;  %v12698_v60 = vld [vmem:[#allocation29_spill] sm:$0xff] }
 0x377   :  { %7800 = vmatprep.subr.bf16.mxu1 %v10700_v39  ;;  %7822 = vmatpush3.bf16.msra.mxu0 %v10725_v42  ;;  %v10892_v31 = vpack.c.bf16 %v12694_v28, %v12693_v27  ;;  %v10897_v48 = vpack.c.bf16 %v12697_v26, %v12696_v34  ;;  %v12699_v57 = vld [vmem:[#allocation32_spill] sm:$0xff]  ;;  %v12702_v18 = vld [vmem:[#allocation31_spill] sm:$0xff]  ;;  %v12705_v17 = vld [vmem:[#allocation21_spill] sm:$0xff] }
 0x378   :  { %7823 = vmatprep.subr.bf16.mxu0 %v12675_v44  ;;  %v10902_v0 = vpack.c.bf16 %v12699_v57, %v12698_v60  ;;  %v12701_v16 = vld [vmem:[#allocation28_spill] sm:$0xff]  ;;  %v12704_v22 = vld [vmem:[#allocation19_spill] sm:$0xff]  ;;  %v12707_v28 = vld [vmem:[#allocation38_spill] sm:$0xff] }
 0x379   :  { %12695 = vst [vmem:[#allocation18_spill] sm:$0xff] %v10892_v31  ;;  %v10908_v21 = vpack.c.bf16 %v12702_v18, %v12701_v16  ;;  %v10913_v24 = vpack.c.bf16 %v12705_v17, %v12704_v22  ;;  %v12706_v27 = vld [vmem:[#allocation35_spill] sm:$0xff]  ;;  %v12709_v26 = vld [vmem:[#allocation34_spill] sm:$0xff]  ;;  %v12710_v60 = vld [vmem:[#allocation37_spill] sm:$0xff] }
 0x37a   :  { %7802 = vmatpush1.bf16.msra.mxu1 %v10719_v52  ;;  %12700 = vst [vmem:[#allocation20_spill] sm:$0xff] %v10902_v0  ;;  %v10918_v34 = vpack.c.bf16 %v12707_v28, %v12706_v27  ;;  %v10924_v57 = vpack.c.bf16 %v12710_v60, %v12709_v26  ;;  %v12712_v16 = vld [vmem:[#allocation24_spill] sm:$0xff]  ;;  %v12713_v18 = vld [vmem:[#allocation27_spill] sm:$0xff]  ;;  %v12715_v17 = vld [vmem:[#allocation41_spill] sm:$0xff] }
 0x37b   :  { %7804 = vmatprep.subr.bf16.mxu1 %v10728_v54  ;;  %7825 = vmatpush3.bf16.msra.mxu0 %v10753_v33  ;;  %12703 = vst [vmem:[#allocation14_spill] sm:$0xff] %v10908_v21  ;;  %v10929_v22 = vpack.c.bf16 %v12713_v18, %v12712_v16  ;;  %v12718_v28 = vld [vmem:[#allocation40_spill] sm:$0xff]  ;;  %v12719_v26 = vld [vmem:[#allocation43_spill] sm:$0xff]  ;;  %v12721_v16 = vld [vmem:[#allocation30_spill] sm:$0xff] }
 0x37c   :  { %7826 = vmatprep.subr.bf16.mxu0 %v12675_v44  ;;  %12708 = vst [vmem:[#allocation15_spill] sm:$0xff] %v10918_v34  ;;  %12711 = vst [vmem:[#allocation23_spill] sm:$0xff] %v10924_v57  ;;  %v10941_v60 = vpack.c.bf16 %v12719_v26, %v12718_v28  ;;  %v12722_v18 = vld [vmem:[#allocation33_spill] sm:$0xff]  ;;  %v12727_v28 = vld [vmem:[#allocation46_spill] sm:$0xff] }
 0x37d   :  { %12714 = vst [vmem:[#allocation26_spill] sm:$0xff] %v10929_v22  ;;  %v12728_v26 = vld [vmem:[#allocation49_spill] sm:$0xff] }
 0x37e   :  { %7806 = vmatpush1.bf16.msra.mxu1 %v10747_v40  ;;  %12720 = vst [vmem:[#allocation25_spill] sm:$0xff] %v10941_v60 }
 0x37f   :  { %7808 = vmatprep.subr.bf16.mxu1 %v10756_v41  ;;  %7828 = vmatpush3.bf16.msra.mxu0 %v10772_v50 }
 0x380   :  { %7829 = vmatprep.subr.bf16.mxu0 %v12675_v44 }
 0x382   :  { %7810 = vmatpush1.bf16.msra.mxu1 %v10769_v35 }
 0x383   :  { %7836 = vmatprep.subr.bf16.mxu1 %v10777_v63  ;;  %7831 = vmatpush3.bf16.msra.mxu0 %v10792_v1 }
 0x384   :  { %7832 = vmatprep.subr.bf16.mxu0 %v12675_v44 }
 0x385   :  { %1301 = vmatmul.mubr.f32.vlgmr.msra.gmra.mrb[2].mxu1 %v10569_v20 }
 0x386   :  { %7838 = vmatpush1.bf16.msra.mxu1 %v10789_v51  ;;  %1510 = vmatprep.mubr.f32.mxu1 %v12652_v62 }
 0x387   :  { %7840 = vmatprep.subr.bf16.mxu1 %v10797_v4  ;;  %7834 = vmatpush3.bf16.msra.mxu0 %v10813_v7 }
 0x388   :  { %7867 = vmatprep.subr.bf16.mxu0 %v12675_v44 }
 0x38a   :  { %7842 = vmatpush1.bf16.msra.mxu1 %v10810_v3  ;;  %6855 = vmatmul.mubr.f32.vlgmr.msra.gmra.mrb[42].mxu0 %v10569_v20 }
 0x38b   :  { %7844 = vmatprep.subr.bf16.mxu1 %v10818_v10  ;;  %7869 = vmatpush3.bf16.msra.mxu0 %v10830_v9 }
 0x38c   :  { %7870 = vmatprep.subr.bf16.mxu0 %v12675_v44  ;;  %6889 = vmatprep.mubr.msk.f32.mxu0 %vm9424_vm8, %v12652_v62 }
 0x38e   :  { %7846 = vmatpush1.bf16.msra.mxu1 %v10825_v6 }
 0x38f   :  { %7848 = vmatprep.subr.bf16.mxu1 %v10835_v13  ;;  %7872 = vmatpush3.bf16.msra.mxu0 %v10847_v2 }
 0x390   :  { %7873 = vmatprep.subr.bf16.mxu0 %v12675_v44 }
 0x392   :  { %7850 = vmatpush1.bf16.msra.mxu1 %v10842_v12 }
 0x393   :  { %7852 = vmatprep.subr.bf16.mxu1 %v10852_v5  ;;  %7875 = vmatpush3.bf16.msra.mxu0 %v10865_v8 }
 0x394   :  { %7876 = vmatprep.subr.bf16.mxu0 %v12675_v44 }
 0x396   :  { %7854 = vmatpush1.bf16.msra.mxu1 %v10860_v15 }
 0x397   :  { %7856 = vmatprep.subr.bf16.mxu1 %v10870_v11  ;;  %7878 = vmatpush3.bf16.msra.mxu0 %v10881_v14 }
 0x398   :  { %7879 = vmatprep.subr.bf16.mxu0 %v12675_v44 }
 0x39a   :  { %7858 = vmatpush1.bf16.msra.mxu1 %v10876_v19 }
 0x39b   :  { %7860 = vmatprep.subr.bf16.mxu1 %v10886_v25  ;;  %7881 = vmatpush3.bf16.msra.mxu0 %v10897_v48 }
 0x39c   :  { %7882 = vmatprep.subr.bf16.mxu0 %v12675_v44 }
 0x39e   :  { %7862 = vmatpush1.bf16.msra.mxu1 %v10892_v31  ;;  %v12755_v31 = vld [vmem:[#allocation67_spill] sm:$0xff] }
 0x39f   :  { %7864 = vmatprep.subr.bf16.mxu1 %v10902_v0  ;;  %7884 = vmatpush3.bf16.msra.mxu0 %v10913_v24  ;;  %v12716_v0 = vld [vmem:[#allocation44_spill] sm:$0xff] }
 0x3a0   :  { %v10934_v27 = vpack.c.bf16 %v12716_v0, %v12715_v17  ;;  %7885 = vmatprep.subr.bf16.mxu0 %v12675_v44  ;;  %v12724_v0 = vld [vmem:[#allocation47_spill] sm:$0xff]  ;;  %v12725_v17 = vld [vmem:[#allocation50_spill] sm:$0xff] }
 0x3a2   :  { %7866 = vmatpush1.bf16.msra.mxu1 %v10908_v21  ;;  %12717 = vst [vmem:[#allocation22_spill] sm:$0xff] %v10934_v27  ;;  %v10946_v21 = vpack.c.bf16 %v12722_v18, %v12721_v16  ;;  %v12730_v16 = vld [vmem:[#allocation36_spill] sm:$0xff]  ;;  %v12731_v18 = vld [vmem:[#allocation39_spill] sm:$0xff] }
 0x3a3   :  { %7892 = vmatprep.subr.bf16.mxu1 %v10918_v34  ;;  %7887 = vmatpush3.bf16.msra.mxu0 %v10929_v22  ;;  %v10951_v34 = vpack.c.bf16 %v12725_v17, %v12724_v0  ;;  %v10963_v22 = vpack.c.bf16 %v12731_v18, %v12730_v16  ;;  %v12733_v0 = vld [vmem:[#allocation53_spill] sm:$0xff]  ;;  %v12734_v17 = vld [vmem:[#allocation56_spill] sm:$0xff]  ;;  %v12739_v16 = vld [vmem:[#allocation42_spill] sm:$0xff] }
 0x3a4   :  { %12723 = vst [vmem:[#allocation16_spill] sm:$0xff] %v10946_v21  ;;  %7888 = vmatprep.subr.bf16.mxu0 %v12675_v44  ;;  %v12740_v18 = vld [vmem:[#allocation45_spill] sm:$0xff] }
 0x3a5   :  { %1511 = vmatmul.mubr.f32.vlgmr.msra.gmra.mrb[4].mxu1 %v10569_v20  ;;  %12726 = vst [vmem:[#allocation17_spill] sm:$0xff] %v10951_v34  ;;  %12732 = vst [vmem:[#allocation32_spill] sm:$0xff] %v10963_v22 }
 0x3a6   :  { %7894 = vmatpush1.bf16.msra.mxu1 %v10924_v57  ;;  %1700 = vmatprep.mubr.f32.mxu1 %v12652_v62  ;;  %v10958_v57 = vpack.c.bf16 %v12728_v26, %v12727_v28  ;;  %v12736_v28 = vld [vmem:[#allocation52_spill] sm:$0xff]  ;;  %v12737_v26 = vld [vmem:[#allocation55_spill] sm:$0xff] }
 0x3a7   :  { %7896 = vmatprep.subr.bf16.mxu1 %v10934_v27  ;;  %7890 = vmatpush3.bf16.msra.mxu0 %v10946_v21  ;;  %v10968_v27 = vpack.c.bf16 %v12734_v17, %v12733_v0  ;;  %v10980_v21 = vpack.c.bf16 %v12740_v18, %v12739_v16  ;;  %v12742_v0 = vld [vmem:[#allocation59_spill] sm:$0xff]  ;;  %v12743_v17 = vld [vmem:[#allocation62_spill] sm:$0xff]  ;;  %v12748_v16 = vld [vmem:[#allocation48_spill] sm:$0xff] }
 0x3a8   :  { %12729 = vst [vmem:[#allocation29_spill] sm:$0xff] %v10958_v57  ;;  %7923 = vmatprep.subr.bf16.mxu0 %v12675_v44  ;;  %v12749_v18 = vld [vmem:[#allocation51_spill] sm:$0xff] }
 0x3a9   :  { %12735 = vst [vmem:[#allocation28_spill] sm:$0xff] %v10968_v27  ;;  %12741 = vst [vmem:[#allocation19_spill] sm:$0xff] %v10980_v21 }
 0x3aa   :  { %7898 = vmatpush1.bf16.msra.mxu1 %v10941_v60  ;;  %6890 = vmatmul.mubr.f32.vlgmr.msra.gmra.mrb[44].mxu0 %v10569_v20  ;;  %v10975_v60 = vpack.c.bf16 %v12737_v26, %v12736_v28  ;;  %v12745_v28 = vld [vmem:[#allocation58_spill] sm:$0xff]  ;;  %v12746_v26 = vld [vmem:[#allocation61_spill] sm:$0xff] }
 0x3ab   :  { %7900 = vmatprep.subr.bf16.mxu1 %v10951_v34  ;;  %7925 = vmatpush3.bf16.msra.mxu0 %v10963_v22  ;;  %v10985_v34 = vpack.c.bf16 %v12743_v17, %v12742_v0  ;;  %v12751_v0 = vld [vmem:[#allocation65_spill] sm:$0xff]  ;;  %v12752_v17 = vld [vmem:[#allocation68_spill] sm:$0xff] }
 0x3ac   :  { %12738 = vst [vmem:[#allocation31_spill] sm:$0xff] %v10975_v60  ;;  %7926 = vmatprep.subr.bf16.mxu0 %v12675_v44  ;;  %6924 = vmatprep.mubr.msk.f32.mxu0 %vm9424_vm8, %v12652_v62  ;;  %v11003_v22 = vpack.c.bf16 %v12752_v17, %v12751_v0  ;;  %v12763_v17 = vld [vmem:[#allocation70_spill] sm:$0xff] }
 0x3ad   :  { %12744 = vst [vmem:[#allocation21_spill] sm:$0xff] %v10985_v34 }
 0x3ae   :  { %7902 = vmatpush1.bf16.msra.mxu1 %v10958_v57  ;;  %v10993_v57 = vpack.c.bf16 %v12746_v26, %v12745_v28  ;;  %12753 = vst [vmem:[#allocation34_spill] sm:$0xff] %v11003_v22  ;;  %v12757_v26 = vld [vmem:[#allocation54_spill] sm:$0xff] }
 0x3af   :  { %7904 = vmatprep.subr.bf16.mxu1 %v10968_v27  ;;  %7928 = vmatpush3.bf16.msra.mxu0 %v10980_v21  ;;  %v10998_v27 = vpack.c.bf16 %v12749_v18, %v12748_v16  ;;  %v12758_v21 = vld [vmem:[#allocation57_spill] sm:$0xff]  ;;  %v12760_v18 = vld [vmem:[#allocation71_spill] sm:$0xff] }
 0x3b0   :  { %12747 = vst [vmem:[#allocation35_spill] sm:$0xff] %v10993_v57  ;;  %7929 = vmatprep.subr.bf16.mxu0 %v12675_v44  ;;  %v11014_v16 = vpack.c.bf16 %v12758_v21, %v12757_v26  ;;  %v12769_v26 = vld [vmem:[#allocation77_spill] sm:$0xff] }
 0x3b1   :  { %12750 = vst [vmem:[#allocation38_spill] sm:$0xff] %v10998_v27 }
 0x3b2   :  { %7906 = vmatpush1.bf16.msra.mxu1 %v10975_v60  ;;  %v12754_v60 = vld [vmem:[#allocation64_spill] sm:$0xff]  ;;  %12759 = vst [vmem:[#allocation24_spill] sm:$0xff] %v11014_v16 }
 0x3b3   :  { %7908 = vmatprep.subr.bf16.mxu1 %v10985_v34  ;;  %v11009_v28 = vpack.c.bf16 %v12755_v31, %v12754_v60  ;;  %7931 = vmatpush3.bf16.msra.mxu0 %v10998_v27  ;;  %v12761_v34 = vld [vmem:[#allocation74_spill] sm:$0xff]  ;;  %v12766_v60 = vld [vmem:[#allocation60_spill] sm:$0xff]  ;;  %v12767_v27 = vld [vmem:[#allocation63_spill] sm:$0xff] }
 0x3b4   :  { %v11019_v0 = vpack.c.bf16 %v12761_v34, %v12760_v18  ;;  %7932 = vmatprep.subr.bf16.mxu0 %v12675_v44  ;;  %v11030_v21 = vpack.c.bf16 %v12767_v27, %v12766_v60  ;;  %v12772_v18 = vld [vmem:[#allocation76_spill] sm:$0xff]  ;;  %v12779_v60 = vld [vmem:[#allocation75_spill] sm:$0xff] }
 0x3b5   :  { %12756 = vst [vmem:[#allocation37_spill] sm:$0xff] %v11009_v28 }
 0x3b6   :  { %7910 = vmatpush1.bf16.msra.mxu1 %v10993_v57  ;;  %12762 = vst [vmem:[#allocation27_spill] sm:$0xff] %v11019_v0  ;;  %v12764_v57 = vld [vmem:[#allocation73_spill] sm:$0xff]  ;;  %12768 = vst [vmem:[#allocation44_spill] sm:$0xff] %v11030_v21 }
 0x3b7   :  { %7912 = vmatprep.subr.bf16.mxu1 %v11003_v22  ;;  %v11025_v31 = vpack.c.bf16 %v12764_v57, %v12763_v17  ;;  %7934 = vmatpush3.bf16.msra.mxu0 %v11014_v16  ;;  %v12770_v22 = vld [vmem:[#allocation80_spill] sm:$0xff]  ;;  %v12775_v17 = vld [vmem:[#allocation66_spill] sm:$0xff]  ;;  %v12776_v16 = vld [vmem:[#allocation69_spill] sm:$0xff] }
 0x3b8   :  { %v11035_v34 = vpack.c.bf16 %v12770_v22, %v12769_v26  ;;  %7935 = vmatprep.subr.bf16.mxu0 %v12675_v44  ;;  %v11046_v27 = vpack.c.bf16 %v12776_v16, %v12775_v17  ;;  %v11054_v22 = vld [vmem:[%s12431_s1 + $0x8] sm:$0xff]  ;;  %v12781_v16 = vld [vmem:[#allocation78_spill] sm:$0xff] }
 0x3b9   :  { %12765 = vst [vmem:[#allocation41_spill] sm:$0xff] %v11025_v31 }
 0x3ba   :  { %7914 = vmatpush1.bf16.msra.mxu1 %v11009_v28  ;;  %12771 = vst [vmem:[#allocation40_spill] sm:$0xff] %v11035_v34  ;;  %v12773_v28 = vld [vmem:[#allocation79_spill] sm:$0xff]  ;;  %12777 = vst [vmem:[#allocation30_spill] sm:$0xff] %v11046_v27 }
 0x3bb   :  { %7916 = vmatprep.subr.bf16.mxu1 %v11019_v0  ;;  %v11041_v57 = vpack.c.bf16 %v12773_v28, %v12772_v18  ;;  %7937 = vmatpush3.bf16.msra.mxu0 %v11030_v21  ;;  %v12778_v28 = vld [vmem:[#allocation72_spill] sm:$0xff]  ;;  %v12782_v18 = vld [vmem:[#allocation81_spill] sm:$0xff] }
 0x3bc   :  { %7938 = vmatprep.subr.bf16.mxu0 %v12675_v44  ;;  %v11059_v26 = vpack.c.bf16 %v12779_v60, %v12778_v28  ;;  %v11067_v17 = vpack.c.bf16 %v12782_v18, %v12781_v16 }
 0x3bd   :  { %12774 = vst [vmem:[#allocation43_spill] sm:$0xff] %v11041_v57 }
 0x3be   :  { %7918 = vmatpush1.bf16.msra.mxu1 %v11025_v31  ;;  %12780 = vst [vmem:[#allocation33_spill] sm:$0xff] %v11059_v26  ;;  %12783 = vst [vmem:[#allocation47_spill] sm:$0xff] %v11067_v17 }
 0x3bf   :  { %7920 = vmatprep.subr.bf16.mxu1 %v11035_v34  ;;  %7940 = vmatpush3.bf16.msra.mxu0 %v11046_v27 }
 0x3c0   :  { %7941 = vmatprep.subr.bf16.mxu0 %v12675_v44 }
 0x3c2   :  { %7922 = vmatpush1.bf16.msra.mxu1 %v11041_v57 }
 0x3c3   :  { %7948 = vmatprep.subr.bf16.mxu1 %v10584_v53  ;;  %7943 = vmatpush3.bf16.msra.mxu0 %v11059_v26 }
 0x3c4   :  { %7944 = vmatprep.subr.bf16.mxu0 %v12675_v44 }
 0x3c5   :  { %1701 = vmatmul.mubr.f32.vlgmr.msra.gmra.mrb[4].mxu1 %v11054_v22 }
 0x3c6   :  { %7950 = vmatpush1.bf16.msra.mxu1 %v10595_v49  ;;  %1917 = vmatprep.mubr.f32.mxu1 %v12652_v62 }
 0x3c7   :  { %7952 = vmatprep.subr.bf16.mxu1 %v10597_v32  ;;  %7946 = vmatpush3.bf16.msra.mxu0 %v11067_v17 }
 0x3c8   :  { %7979 = vmatprep.subr.bf16.mxu0 %v12675_v44 }
 0x3ca   :  { %7954 = vmatpush1.bf16.msra.mxu1 %v10613_v38  ;;  %6925 = vmatmul.mubr.f32.vlgmr.msra.gmra.mrb[46].mxu0 %v11054_v22 }
 0x3cb   :  { %7956 = vmatprep.subr.bf16.mxu1 %v10616_v23  ;;  %7981 = vmatpush3.bf16.msra.mxu0 %v10654_v29 }
 0x3cc   :  { %7982 = vmatprep.subr.bf16.mxu0 %v12675_v44  ;;  %6959 = vmatprep.mubr.msk.f32.mxu0 %vm9424_vm8, %v12652_v62 }
 0x3ce   :  { %7958 = vmatpush1.bf16.msra.mxu1 %v10631_v46 }
 0x3cf   :  { %7960 = vmatprep.subr.bf16.mxu1 %v10637_v56  ;;  %7984 = vmatpush3.bf16.msra.mxu0 %v10669_v37 }
 0x3d0   :  { %7985 = vmatprep.subr.bf16.mxu0 %v12675_v44 }
 0x3d2   :  { %7962 = vmatpush1.bf16.msra.mxu1 %v10663_v45 }
 0x3d3   :  { %7964 = vmatprep.subr.bf16.mxu1 %v10672_v36  ;;  %7987 = vmatpush3.bf16.msra.mxu0 %v10697_v43 }
 0x3d4   :  { %7988 = vmatprep.subr.bf16.mxu0 %v12675_v44 }
 0x3d6   :  { %7966 = vmatpush1.bf16.msra.mxu1 %v10691_v47 }
 0x3d7   :  { %7968 = vmatprep.subr.bf16.mxu1 %v10700_v39  ;;  %7990 = vmatpush3.bf16.msra.mxu0 %v10725_v42 }
 0x3d8   :  { %7991 = vmatprep.subr.bf16.mxu0 %v12675_v44 }
 0x3da   :  { %7970 = vmatpush1.bf16.msra.mxu1 %v10719_v52 }
 0x3db   :  { %7972 = vmatprep.subr.bf16.mxu1 %v10728_v54  ;;  %7993 = vmatpush3.bf16.msra.mxu0 %v10753_v33 }
 0x3dc   :  { %7994 = vmatprep.subr.bf16.mxu0 %v12675_v44 }
 0x3de   :  { %7974 = vmatpush1.bf16.msra.mxu1 %v10747_v40 }
 0x3df   :  { %7976 = vmatprep.subr.bf16.mxu1 %v10756_v41  ;;  %7996 = vmatpush3.bf16.msra.mxu0 %v10772_v50 }
 0x3e0   :  { %7997 = vmatprep.subr.bf16.mxu0 %v12675_v44 }
 0x3e2   :  { %7978 = vmatpush1.bf16.msra.mxu1 %v10769_v35 }
 0x3e3   :  { %8004 = vmatprep.subr.bf16.mxu1 %v10777_v63  ;;  %7999 = vmatpush3.bf16.msra.mxu0 %v10792_v1 }
 0x3e4   :  { %8000 = vmatprep.subr.bf16.mxu0 %v12675_v44 }
 0x3e7   :  { %8002 = vmatpush3.bf16.msra.mxu0 %v10813_v7 }
 0x3e8   :  { %8035 = vmatprep.subr.bf16.mxu0 %v12675_v44 }
 0x458   :  { %v1302_v28 = vpop.f32.mrb[2].mxu1 }
 0x459   :  { %v1377_v60 = vadd.f32 %v1302_v28, %v10517_v30  ;;  %v1304_v16 = vpop.f32.mrb[3].mxu1 }
 0x45a   :  { %v1378_v35 = vadd.f32 %v1304_v16, %v10519_v55 }
 0x45b   :  { %v6176_v18 = vmul.f32 -1.442695, %v1377_v60 }
 0x45c   :  { %v6177_v54 = vmul.f32 -1.442695, %v1378_v35 }
 0x45d   :  { %9218 = vpow2.f32 %v6176_v18  ;;  %v1373_v41 = vpop.f32.mrb[42].mxu0 }
 0x45e   :  { %v6856_v40 = vpop.f32.mrb[43].mxu0  ;;  %9220 = vpow2.f32 %v6177_v54  ;;  %v1391_v1 = vadd.f32 %v10565_v58, %v1373_v41  ;;  %v1156_v41 = vld [vmem:[%s12438_s8] sm:$0x7] }
 0x467   :  { %v9219_v63 = vpop.eup %9218 }
 0x468   :  { %v1385_v50 = vadd.f32 1.0, %v9219_v63  ;;  %v9221_v7 = vpop.eup %9220 }
 0x469   :  { %v1386_v33 = vadd.f32 1.0, %v9221_v7 }
 0x46a   :  { %9222 = vrcp.f32 %v1385_v50  ;;  %v12784_v50 = vld [vmem:[#allocation84_spill] sm:$0xff] }
 0x474   :  { %v9223_v52 = vpop.eup %9222 }
 0x475   :  { %v1392_v39 = vmul.f32 %v9223_v52, %v1391_v1  ;;  %v11150_v1 = vrot.slane %v1156_v41, %v12784_v50  ;;  %v12796_v50 = vld [vmem:[#allocation17_spill] sm:$0xff] }
 0x477   :  { %v1393_v30 = vadd.f32 %v1392_v39, %v10548_v59 }
 0x479   :  { %9224 = vtanh.f32 %v1393_v30  ;;  %v12785_v30 = vld [vmem:[#allocation18_spill] sm:$0xff] }
 0x47a   :  { %9226 = vrcp.f32 %v1386_v33  ;;  %v11138_v33 = vrot.slane %v1156_v41, %v10507_v61  ;;  %v12797_v61 = vld [vmem:[#allocation82_spill] sm:$0xff] }
 0x47d   :  { %v11112_v28 = vpop.f32.mrb[44].mxu0 }
 0x47e   :  { %v6891_v60 = vpop.f32.mrb[45].mxu0 }
 0x47f   :  { %v12786_v60 = vld [vmem:[#allocation26_spill] sm:$0xff] }
 0x483   :  { %v9225_v55 = vpop.eup %9224 }
 0x484   :  { %v1395_v40 = vsub.f32 %v10569_v20, %v9225_v55  ;;  %v9227_v35 = vpop.eup %9226 }
 0x486   :  { %v1396_v63 = vmul.f32 %v9227_v35, %v1395_v40 }
 0x488   :  { %v11115_v54 = vadd.f32 %v9225_v55, %v1396_v63  ;;  %v12787_v55 = vld [vmem:[#allocation20_spill] sm:$0xff]  ;;  %v12788_v63 = vld [vmem:[#allocation14_spill] sm:$0xff] }
 0x48a   :  { %1918 = vmatmul.mubr.f32.vlgmr.msra.gmra.mrb[6].mxu1 %v11115_v54  ;;  %6960 = vmatmul.mubr.f32.vlgmr.msra.gmra.mrb[48].mxu0 %v11115_v54 }
 0x48b   :  { %8006 = vmatpush1.bf16.msra.mxu1 %v10789_v51  ;;  %8037 = vmatpush3.bf16.msra.mxu0 %v10830_v9 }
 0x48c   :  { %8008 = vmatprep.subr.bf16.mxu1 %v10797_v4  ;;  %8038 = vmatprep.subr.bf16.mxu0 %v12675_v44 }
 0x48d   :  { %2127 = vmatprep.mubr.f32.mxu1 %v12652_v62  ;;  %6994 = vmatprep.mubr.msk.f32.mxu0 %vm9424_vm8, %v12652_v62 }
 0x48f   :  { %8010 = vmatpush1.bf16.msra.mxu1 %v10810_v3  ;;  %8040 = vmatpush3.bf16.msra.mxu0 %v10847_v2 }
 0x490   :  { %8012 = vmatprep.subr.bf16.mxu1 %v10818_v10  ;;  %8041 = vmatprep.subr.bf16.mxu0 %v12675_v44 }
 0x493   :  { %8014 = vmatpush1.bf16.msra.mxu1 %v10825_v6  ;;  %8043 = vmatpush3.bf16.msra.mxu0 %v10865_v8 }
 0x494   :  { %8016 = vmatprep.subr.bf16.mxu1 %v10835_v13  ;;  %8044 = vmatprep.subr.bf16.mxu0 %v12675_v44 }
 0x497   :  { %8018 = vmatpush1.bf16.msra.mxu1 %v10842_v12  ;;  %8046 = vmatpush3.bf16.msra.mxu0 %v10881_v14 }
 0x498   :  { %v1702_v59 = vpop.f32.mrb[4].mxu1  ;;  %8020 = vmatprep.subr.bf16.mxu1 %v10852_v5  ;;  %8047 = vmatprep.subr.bf16.mxu0 %v12675_v44 }
 0x499   :  { %v9131_v39 = vadd.f32 %v1702_v59, %v11138_v33  ;;  %v1704_v20 = vpop.f32.mrb[5].mxu1  ;;  %v12789_v59 = vld [vmem:[#allocation16_spill] sm:$0xff] }
 0x49a   :  { %v9132_v16 = vadd.f32 %v1704_v20, %v11150_v1  ;;  %v12791_v20 = vld [vmem:[#allocation23_spill] sm:$0xff] }
 0x49b   :  { %v6178_v52 = vmul.f32 -1.442695, %v9131_v39  ;;  %8022 = vmatpush1.bf16.msra.mxu1 %v10860_v15  ;;  %8049 = vmatpush3.bf16.msra.mxu0 %v10897_v48 }
 0x49c   :  { %8024 = vmatprep.subr.bf16.mxu1 %v10870_v11  ;;  %8050 = vmatprep.subr.bf16.mxu0 %v12675_v44  ;;  %v6179_v40 = vmul.f32 -1.442695, %v9132_v16  ;;  %v12793_v16 = vld [vmem:[#allocation22_spill] sm:$0xff] }
 0x49d   :  { %9228 = vpow2.f32 %v6178_v52  ;;  %v1773_v7 = vpop.f32.mrb[46].mxu0  ;;  %v12790_v52 = vld [vmem:[#allocation15_spill] sm:$0xff] }
 0x49e   :  { %v6926_v18 = vpop.f32.mrb[47].mxu0  ;;  %9230 = vpow2.f32 %v6179_v40  ;;  %v11177_v40 = vld [vmem:[%s12439_s9] ss:$0 sm:$0xff] }
 0x49f   :  { %8026 = vmatpush1.bf16.msra.mxu1 %v10876_v19  ;;  %8052 = vmatpush3.bf16.msra.mxu0 %v10913_v24  ;;  %v12792_v18 = vld [vmem:[#allocation32_spill] sm:$0xff] }
 0x4a0   :  { %8028 = vmatprep.subr.bf16.mxu1 %v10886_v25  ;;  %8053 = vmatprep.subr.bf16.mxu0 %v12675_v44 }
 0x4a3   :  { %8030 = vmatpush1.bf16.msra.mxu1 %v12785_v30  ;;  %8055 = vmatpush3.bf16.msra.mxu0 %v12786_v60  ;;  %v12801_v60 = vld [vmem:[#allocation28_spill] sm:$0xff] }
 0x4a4   :  { %8032 = vmatprep.subr.bf16.mxu1 %v12787_v55  ;;  %8056 = vmatprep.subr.bf16.mxu0 %v12675_v44 }
 0x4a7   :  { %v9229_v35 = vpop.eup %9228  ;;  %8034 = vmatpush1.bf16.msra.mxu1 %v12788_v63  ;;  %8058 = vmatpush3.bf16.msra.mxu0 %v12789_v59  ;;  %v12799_v59 = vld [vmem:[#allocation29_spill] sm:$0xff]  ;;  %v12800_v63 = vld [vmem:[#allocation38_spill] sm:$0xff] }
 0x4a8   :  { %v1785_v39 = vadd.f32 1.0, %v9229_v35  ;;  %8060 = vmatprep.subr.bf16.mxu1 %v12790_v52  ;;  %8091 = vmatprep.subr.bf16.mxu0 %v12675_v44  ;;  %v12794_v35 = vld [vmem:[#allocation25_spill] sm:$0xff]  ;;  %v9231_v52 = vpop.eup %9230 }
 0x4aa   :  { %9232 = vrcp.f32 %v1785_v39  ;;  %2128 = vmatmul.mubr.f32.vlgmr.msra.gmra.mrb[8].mxu1 %v11115_v54  ;;  %6995 = vmatmul.mubr.f32.vlgmr.msra.gmra.mrb[50].mxu0 %v11115_v54  ;;  %v12795_v39 = vld [vmem:[#allocation19_spill] sm:$0xff] }
 0x4ab   :  { %8062 = vmatpush1.bf16.msra.mxu1 %v12791_v20  ;;  %8093 = vmatpush3.bf16.msra.mxu0 %v12792_v18  ;;  %v1791_v20 = vadd.f32 %v11177_v40, %v1773_v7  ;;  %v12804_v7 = vld [vmem:[#allocation21_spill] sm:$0xff] }
 0x4ac   :  { %8064 = vmatprep.subr.bf16.mxu1 %v12793_v16  ;;  %8094 = vmatprep.subr.bf16.mxu0 %v12675_v44  ;;  %v12798_v16 = vsub.s32 2, %v12797_v61 }
 0x4ad   :  { %2316 = vmatprep.mubr.f32.mxu1 %v12652_v62  ;;  %7029 = vmatprep.mubr.msk.f32.mxu0 %vm9424_vm8, %v12652_v62 }
 0x4ae   :  { %v11185_v18 = vrot.slane %v1156_v41, %v12798_v16  ;;  %v12802_v41 = vld [vmem:[#allocation31_spill] sm:$0xff]  ;;  %v12803_v16 = vld [vmem:[#allocation24_spill] sm:$0xff] }
 0x4af   :  { %8066 = vmatpush1.bf16.msra.mxu1 %v12794_v35  ;;  %8096 = vmatpush3.bf16.msra.mxu0 %v12795_v39  ;;  %v1786_v35 = vadd.f32 1.0, %v9231_v52 }
 0x4b0   :  { %8068 = vmatprep.subr.bf16.mxu1 %v12796_v50  ;;  %8097 = vmatprep.subr.bf16.mxu0 %v12675_v44  ;;  %v1584_v50 = vadd.f32 %v11112_v28, %v11185_v18  ;;  %v12807_v28 = vld [vmem:[#allocation37_spill] sm:$0xff] }
 0x4b3   :  { %8070 = vmatpush1.bf16.msra.mxu1 %v12799_v59  ;;  %8099 = vmatpush3.bf16.msra.mxu0 %v12800_v63  ;;  %v12805_v63 = vld [vmem:[#allocation35_spill] sm:$0xff] }
 0x4b4   :  { %v9233_v55 = vpop.eup %9232  ;;  %8072 = vmatprep.subr.bf16.mxu1 %v12801_v60  ;;  %8100 = vmatprep.subr.bf16.mxu0 %v12675_v44  ;;  %v12806_v60 = vld [vmem:[#allocation34_spill] sm:$0xff] }
 0x4b5   :  { %v1792_v39 = vmul.f32 %v9233_v55, %v1791_v20 }
 0x4b7   :  { %v1793_v61 = vadd.f32 %v1792_v39, %v1584_v50  ;;  %8074 = vmatpush1.bf16.msra.mxu1 %v12802_v41  ;;  %8102 = vmatpush3.bf16.msra.mxu0 %v12803_v16 }
 0x4b8   :  { %8076 = vmatprep.subr.bf16.mxu1 %v12804_v7  ;;  %8103 = vmatprep.subr.bf16.mxu0 %v12675_v44 }
 0x4b9   :  { %9234 = vtanh.f32 %v1793_v61 }
 0x4ba   :  { %9236 = vrcp.f32 %v1786_v35 }
 0x4bb   :  { %8078 = vmatpush1.bf16.msra.mxu1 %v12805_v63  ;;  %8105 = vmatpush3.bf16.msra.mxu0 %v11030_v21 }
 0x4bc   :  { %8080 = vmatprep.subr.bf16.mxu1 %v12806_v60  ;;  %8106 = vmatprep.subr.bf16.mxu0 %v12675_v44 }
 0x4bf   :  { %8082 = vmatpush1.bf16.msra.mxu1 %v12807_v28  ;;  %8108 = vmatpush3.bf16.msra.mxu0 %v11046_v27 }
 0x4c0   :  { %8084 = vmatprep.subr.bf16.mxu1 %v11019_v0  ;;  %8109 = vmatprep.subr.bf16.mxu0 %v12675_v44 }
 0x4c3   :  { %v9235_v50 = vpop.eup %9234  ;;  %8086 = vmatpush1.bf16.msra.mxu1 %v11025_v31  ;;  %8111 = vmatpush3.bf16.msra.mxu0 %v11059_v26 }
 0x4c4   :  { %8088 = vmatprep.subr.bf16.mxu1 %v11035_v34  ;;  %8112 = vmatprep.subr.bf16.mxu0 %v12675_v44  ;;  %v1795_v55 = vsub.f32 %v11054_v22, %v9235_v50  ;;  %v9237_v52 = vpop.eup %9236 }
 0x4c6   :  { %v1796_v20 = vmul.f32 %v9237_v52, %v1795_v55  ;;  %v12821_v55 = vld [vmem:[#allocation86_spill] sm:$0xff] }
 0x4c7   :  { %8090 = vmatpush1.bf16.msra.mxu1 %v11041_v57  ;;  %8114 = vmatpush3.bf16.msra.mxu0 %v11067_v17 }
 0x4c8   :  { %v11213_v35 = vadd.f32 %v9235_v50, %v1796_v20  ;;  %8116 = vmatprep.subr.bf16.mxu1 %v10584_v53  ;;  %8147 = vmatprep.subr.bf16.mxu0 %v12675_v44  ;;  %v12809_v53 = vld [vmem:[#allocation107_spill] sm:$0xff] }
 0x4ca   :  { %12808 = vst [vmem:[#allocation50_spill] sm:$0xff] %v11213_v35  ;;  %2317 = vmatmul.mubr.f32.vlgmr.msra.gmra.mrb[8].mxu1 %v11213_v35  ;;  %7030 = vmatmul.mubr.f32.vlgmr.msra.gmra.mrb[52].mxu0 %v11213_v35 }
 0x4cb   :  { %8118 = vmatpush1.bf16.msra.mxu1 %v10595_v49  ;;  %8149 = vmatpush3.bf16.msra.mxu0 %v10654_v29  ;;  %v12810_v49 = vld [vmem:[#allocation103_spill] sm:$0xff] }
 0x4cc   :  { %8120 = vmatprep.subr.bf16.mxu1 %v10597_v32  ;;  %8150 = vmatprep.subr.bf16.mxu0 %v12675_v44  ;;  %v12812_v32 = vld [vmem:[#allocation110_spill] sm:$0xff]  ;;  %v12819_v29 = vld [vmem:[#allocation111_spill] sm:$0xff] }
 0x4cd   :  { %2534 = vmatprep.mubr.f32.mxu1 %v12652_v62  ;;  %7064 = vmatprep.mubr.msk.f32.mxu0 %vm9424_vm8, %v12652_v62 }
 0x4cf   :  { %8122 = vmatpush1.bf16.msra.mxu1 %v10613_v38  ;;  %8152 = vmatpush3.bf16.msra.mxu0 %v10669_v37  ;;  %v12813_v38 = vld [vmem:[#allocation105_spill] sm:$0xff] }
 0x4d0   :  { %8124 = vmatprep.subr.bf16.mxu1 %v10616_v23  ;;  %8153 = vmatprep.subr.bf16.mxu0 %v12675_v44  ;;  %v12816_v23 = vld [vmem:[#allocation108_spill] sm:$0xff] }
 0x4d3   :  { %8126 = vmatpush1.bf16.msra.mxu1 %v10631_v46  ;;  %8155 = vmatpush3.bf16.msra.mxu0 %v10697_v43  ;;  %v12811_v43 = vld [vmem:[#allocation104_spill] sm:$0xff]  ;;  %v12817_v46 = vld [vmem:[#allocation109_spill] sm:$0xff] }
 0x4d4   :  { %8128 = vmatprep.subr.bf16.mxu1 %v10637_v56  ;;  %8156 = vmatprep.subr.bf16.mxu0 %v12675_v44  ;;  %v12818_v56 = vld [vmem:[#allocation113_spill] sm:$0xff] }
 0x4d7   :  { %8130 = vmatpush1.bf16.msra.mxu1 %v10663_v45  ;;  %8158 = vmatpush3.bf16.msra.mxu0 %v10725_v42  ;;  %v12814_v42 = vld [vmem:[#allocation106_spill] sm:$0xff]  ;;  %v12815_v45 = vld [vmem:[#allocation112_spill] sm:$0xff] }
 0x4d8   :  { %8132 = vmatprep.subr.bf16.mxu1 %v10672_v36  ;;  %8159 = vmatprep.subr.bf16.mxu0 %v12675_v44 }
 0x4db   :  { %8134 = vmatpush1.bf16.msra.mxu1 %v10691_v47  ;;  %8161 = vmatpush3.bf16.msra.mxu0 %v12809_v53  ;;  %v12820_v47 = vld [vmem:[#allocation85_spill] sm:$0xff] }
 0x4dc   :  { %8136 = vmatprep.subr.bf16.mxu1 %v12810_v49  ;;  %8162 = vmatprep.subr.bf16.mxu0 %v12675_v44 }
 0x4df   :  { %8138 = vmatpush1.bf16.msra.mxu1 %v12811_v43  ;;  %8164 = vmatpush3.bf16.msra.mxu0 %v12812_v32 }
 0x4e0   :  { %8140 = vmatprep.subr.bf16.mxu1 %v12813_v38  ;;  %8165 = vmatprep.subr.bf16.mxu0 %v12675_v44 }
 0x4e3   :  { %8142 = vmatpush1.bf16.msra.mxu1 %v12814_v42  ;;  %8167 = vmatpush3.bf16.msra.mxu0 %v12815_v45  ;;  %v12822_v45 = vld [vmem:[#allocation98_spill] sm:$0xff] }
 0x4e4   :  { %8144 = vmatprep.subr.bf16.mxu1 %v12816_v23  ;;  %8168 = vmatprep.subr.bf16.mxu0 %v12675_v44 }
 0x4e7   :  { %8146 = vmatpush1.bf16.msra.mxu1 %v12817_v46  ;;  %8170 = vmatpush3.bf16.msra.mxu0 %v12818_v56 }
 0x4e8   :  { %8172 = vmatprep.subr.bf16.mxu1 %v12819_v29  ;;  %8203 = vmatprep.subr.bf16.mxu0 %v12675_v44 }
 0x55d   :  { %v1919_v37 = vpop.f32.mrb[6].mxu1  ;;  %v1990_v36 = vpop.f32.mrb[48].mxu0 }
 0x55e   :  { %v1994_v22 = vadd.f32 %v1919_v37, %v12820_v47  ;;  %v1921_v39 = vpop.f32.mrb[7].mxu1  ;;  %v6961_v61 = vpop.f32.mrb[49].mxu0  ;;  %v2008_v32 = vadd.f32 %v10565_v58, %v1990_v36 }
 0x55f   :  { %v1995_v52 = vadd.f32 %v1921_v39, %v12821_v55 }
 0x560   :  { %v6180_v50 = vmul.f32 -1.442695, %v1994_v22 }
 0x561   :  { %v6181_v20 = vmul.f32 -1.442695, %v1995_v52 }
 0x562   :  { %9238 = vpow2.f32 %v6180_v50 }
 0x563   :  { %9240 = vpow2.f32 %v6181_v20 }
 0x56c   :  { %v9239_v53 = vpop.eup %9238 }
 0x56d   :  { %v2002_v49 = vadd.f32 1.0, %v9239_v53  ;;  %v9241_v43 = vpop.eup %9240 }
 0x56e   :  { %v2003_v46 = vadd.f32 1.0, %v9241_v43  ;;  %v12823_v43 = vld [vmem:[#allocation26_spill] sm:$0xff] }
 0x56f   :  { %9242 = vrcp.f32 %v2002_v49 }
 0x579   :  { %v9243_v38 = vpop.eup %9242 }
 0x57a   :  { %v2009_v42 = vmul.f32 %v9243_v38, %v2008_v32  ;;  %v12824_v32 = vld [vmem:[#allocation20_spill] sm:$0xff] }
 0x57c   :  { %v2010_v23 = vadd.f32 %v2009_v42, %v12822_v45  ;;  %v12825_v45 = vld [vmem:[#allocation14_spill] sm:$0xff] }
 0x57d   :  { %v11258_v56 = vpop.f32.mrb[50].mxu0 }
 0x57e   :  { %9244 = vtanh.f32 %v2010_v23  ;;  %v6996_v37 = vpop.f32.mrb[51].mxu0  ;;  %v12826_v23 = vld [vmem:[#allocation16_spill] sm:$0xff] }
 0x57f   :  { %9246 = vrcp.f32 %v2003_v46  ;;  %v12827_v37 = vld [vmem:[#allocation15_spill] sm:$0xff] }
 0x588   :  { %v9245_v47 = vpop.eup %9244 }
 0x589   :  { %v2012_v22 = vsub.f32 %v11115_v54, %v9245_v47  ;;  %v9247_v39 = vpop.eup %9246 }
 0x58b   :  { %v2013_v61 = vmul.f32 %v9247_v39, %v2012_v22  ;;  %v12829_v22 = vld [vmem:[#allocation32_spill] sm:$0xff]  ;;  %v12830_v39 = vld [vmem:[#allocation22_spill] sm:$0xff] }
 0x58d   :  { %v11261_v50 = vadd.f32 %v9245_v47, %v2013_v61  ;;  %v12828_v47 = vld [vmem:[#allocation23_spill] sm:$0xff]  ;;  %v12831_v61 = vld [vmem:[#allocation25_spill] sm:$0xff] }
 0x58f   :  { %2535 = vmatmul.mubr.f32.vlgmr.msra.gmra.mrb[10].mxu1 %v11261_v50  ;;  %7065 = vmatmul.mubr.f32.vlgmr.msra.gmra.mrb[54].mxu0 %v11261_v50 }
 0x590   :  { %8174 = vmatpush1.bf16.msra.mxu1 %v10789_v51  ;;  %8205 = vmatpush3.bf16.msra.mxu0 %v10830_v9 }
 0x591   :  { %8176 = vmatprep.subr.bf16.mxu1 %v10797_v4  ;;  %8206 = vmatprep.subr.bf16.mxu0 %v12675_v44 }
 0x592   :  { %2744 = vmatprep.mubr.f32.mxu1 %v12652_v62  ;;  %7099 = vmatprep.mubr.msk.f32.mxu0 %vm9424_vm8, %v12652_v62 }
 0x594   :  { %8178 = vmatpush1.bf16.msra.mxu1 %v10810_v3  ;;  %8208 = vmatpush3.bf16.msra.mxu0 %v10847_v2 }
 0x595   :  { %8180 = vmatprep.subr.bf16.mxu1 %v10818_v10  ;;  %8209 = vmatprep.subr.bf16.mxu0 %v12675_v44 }
 0x598   :  { %8182 = vmatpush1.bf16.msra.mxu1 %v10825_v6  ;;  %8211 = vmatpush3.bf16.msra.mxu0 %v10865_v8 }
 0x599   :  { %8184 = vmatprep.subr.bf16.mxu1 %v10835_v13  ;;  %8212 = vmatprep.subr.bf16.mxu0 %v12675_v44 }
 0x59c   :  { %8186 = vmatpush1.bf16.msra.mxu1 %v10842_v12  ;;  %8214 = vmatpush3.bf16.msra.mxu0 %v10881_v14 }
 0x59d   :  { %v2318_v54 = vpop.f32.mrb[8].mxu1  ;;  %v2389_v36 = vpop.f32.mrb[52].mxu0  ;;  %8188 = vmatprep.subr.bf16.mxu1 %v10852_v5  ;;  %8215 = vmatprep.subr.bf16.mxu0 %v12675_v44 }
 0x59e   :  { %v9133_v55 = vadd.f32 %v2318_v54, %v11138_v33  ;;  %v2320_v52 = vpop.f32.mrb[9].mxu1  ;;  %v7031_v20 = vpop.f32.mrb[53].mxu0  ;;  %v12832_v54 = vld [vmem:[#allocation19_spill] sm:$0xff] }
 0x59f   :  { %v9134_v49 = vadd.f32 %v2320_v52, %v11150_v1  ;;  %v2407_v20 = vadd.f32 %v11177_v40, %v2389_v36 }
 0x5a0   :  { %v6182_v53 = vmul.f32 -1.442695, %v9133_v55  ;;  %8190 = vmatpush1.bf16.msra.mxu1 %v10860_v15  ;;  %8217 = vmatpush3.bf16.msra.mxu0 %v10897_v48  ;;  %v12833_v55 = vld [vmem:[#allocation17_spill] sm:$0xff] }
 0x5a1   :  { %8192 = vmatprep.subr.bf16.mxu1 %v10870_v11  ;;  %8218 = vmatprep.subr.bf16.mxu0 %v12675_v44  ;;  %v6183_v38 = vmul.f32 -1.442695, %v9134_v49 }
 0x5a2   :  { %9248 = vpow2.f32 %v6182_v53  ;;  %v12834_v53 = vld [vmem:[#allocation38_spill] sm:$0xff] }
 0x5a3   :  { %9250 = vpow2.f32 %v6183_v38  ;;  %v12835_v38 = vld [vmem:[#allocation28_spill] sm:$0xff] }
 0x5a4   :  { %8194 = vmatpush1.bf16.msra.mxu1 %v10876_v19  ;;  %8220 = vmatpush3.bf16.msra.mxu0 %v10913_v24 }
 0x5a5   :  { %8196 = vmatprep.subr.bf16.mxu1 %v10886_v25  ;;  %8221 = vmatprep.subr.bf16.mxu0 %v12675_v44 }
 0x5a8   :  { %8198 = vmatpush1.bf16.msra.mxu1 %v12785_v30  ;;  %8223 = vmatpush3.bf16.msra.mxu0 %v12823_v43 }
 0x5a9   :  { %8200 = vmatprep.subr.bf16.mxu1 %v12824_v32  ;;  %8224 = vmatprep.subr.bf16.mxu0 %v12675_v44 }
 0x5ac   :  { %v9249_v42 = vpop.eup %9248  ;;  %8202 = vmatpush1.bf16.msra.mxu1 %v12825_v45  ;;  %8226 = vmatpush3.bf16.msra.mxu0 %v12826_v23 }
 0x5ad   :  { %v2401_v46 = vadd.f32 1.0, %v9249_v42  ;;  %8228 = vmatprep.subr.bf16.mxu1 %v12827_v37  ;;  %8259 = vmatprep.subr.bf16.mxu0 %v12675_v44  ;;  %v9251_v52 = vpop.eup %9250  ;;  %v2201_v42 = vadd.f32 %v11258_v56, %v11185_v18 }
 0x5af   :  { %9252 = vrcp.f32 %v2401_v46  ;;  %2745 = vmatmul.mubr.f32.vlgmr.msra.gmra.mrb[12].mxu1 %v11261_v50  ;;  %7100 = vmatmul.mubr.f32.vlgmr.msra.gmra.mrb[56].mxu0 %v11261_v50 }
 0x5b0   :  { %8230 = vmatpush1.bf16.msra.mxu1 %v12828_v47  ;;  %8261 = vmatpush3.bf16.msra.mxu0 %v12829_v22 }
 0x5b1   :  { %8232 = vmatprep.subr.bf16.mxu1 %v12830_v39  ;;  %8262 = vmatprep.subr.bf16.mxu0 %v12675_v44 }
 0x5b2   :  { %2933 = vmatprep.mubr.f32.mxu1 %v12652_v62  ;;  %7134 = vmatprep.mubr.msk.f32.mxu0 %vm9424_vm8, %v12652_v62 }
 0x5b4   :  { %8234 = vmatpush1.bf16.msra.mxu1 %v12831_v61  ;;  %8264 = vmatpush3.bf16.msra.mxu0 %v12832_v54 }
 0x5b5   :  { %8236 = vmatprep.subr.bf16.mxu1 %v12833_v55  ;;  %8265 = vmatprep.subr.bf16.mxu0 %v12675_v44  ;;  %v2402_v55 = vadd.f32 1.0, %v9251_v52 }
 0x5b8   :  { %8238 = vmatpush1.bf16.msra.mxu1 %v12799_v59  ;;  %8267 = vmatpush3.bf16.msra.mxu0 %v12834_v53 }
 0x5b9   :  { %v9253_v49 = vpop.eup %9252  ;;  %8240 = vmatprep.subr.bf16.mxu1 %v12835_v38  ;;  %8268 = vmatprep.subr.bf16.mxu0 %v12675_v44 }
 0x5ba   :  { %v2408_v46 = vmul.f32 %v9253_v49, %v2407_v20  ;;  %v3040_v20 = vld [vmem:[%s12434_s4 + $0x8] sm:$0xff]  ;;  %v3043_v49 = vld [vmem:[%s12434_s4 + $0x20] sm:$0xff] }
 0x5bc   :  { %v2409_v54 = vadd.f32 %v2408_v46, %v2201_v42  ;;  %8242 = vmatpush1.bf16.msra.mxu1 %v12802_v41  ;;  %8270 = vmatpush3.bf16.msra.mxu0 %v12803_v16  ;;  %v11355_v42 = vpack.c.bf16 %v3043_v49, %v3040_v20  ;;  %v3039_v46 = vld [vmem:[%s12434_s4] sm:$0xff]  ;;  %v3046_v49 = vld [vmem:[%s12434_s4 + $0x38] sm:$0xff] }
 0x5bd   :  { %8244 = vmatprep.subr.bf16.mxu1 %v12804_v7  ;;  %8271 = vmatprep.subr.bf16.mxu0 %v12675_v44 }
 0x5be   :  { %9254 = vtanh.f32 %v2409_v54  ;;  %12837 = vst [vmem:[#allocation49_spill] sm:$0xff] %v11355_v42 }
 0x5bf   :  { %9256 = vrcp.f32 %v2402_v55 }
 0x5c0   :  { %8246 = vmatpush1.bf16.msra.mxu1 %v12805_v63  ;;  %8273 = vmatpush3.bf16.msra.mxu0 %v11030_v21 }
 0x5c1   :  { %8248 = vmatprep.subr.bf16.mxu1 %v12806_v60  ;;  %8274 = vmatprep.subr.bf16.mxu0 %v12675_v44 }
 0x5c4   :  { %8250 = vmatpush1.bf16.msra.mxu1 %v12807_v28  ;;  %8276 = vmatpush3.bf16.msra.mxu0 %v11046_v27 }
 0x5c5   :  { %8252 = vmatprep.subr.bf16.mxu1 %v11019_v0  ;;  %8277 = vmatprep.subr.bf16.mxu0 %v12675_v44  ;;  %v12863_v0 = vld [vmem:[#allocation97_spill] sm:$0xff] }
 0x5c8   :  { %v9255_v56 = vpop.eup %9254  ;;  %8254 = vmatpush1.bf16.msra.mxu1 %v11025_v31  ;;  %8279 = vmatpush3.bf16.msra.mxu0 %v11059_v26 }
 0x5c9   :  { %8256 = vmatprep.subr.bf16.mxu1 %v11035_v34  ;;  %8280 = vmatprep.subr.bf16.mxu0 %v12675_v44  ;;  %v2411_v36 = vsub.f32 %v11213_v35, %v9255_v56  ;;  %v9257_v54 = vpop.eup %9256  ;;  %v3049_v35 = vld [vmem:[%s12434_s4 + $0x50] sm:$0xff]  ;;  %v12862_v34 = vld [vmem:[#allocation88_spill] sm:$0xff] }
 0x5cb   :  { %v2412_v55 = vmul.f32 %v9257_v54, %v2411_v36  ;;  %v3041_v36 = vld [vmem:[%s12434_s4 + $0x10] sm:$0xff] }
 0x5cc   :  { %8258 = vmatpush1.bf16.msra.mxu1 %v11041_v57  ;;  %8282 = vmatpush3.bf16.msra.mxu0 %v11067_v17 }
 0x5cd   :  { %v11341_v52 = vadd.f32 %v9255_v56, %v2412_v55  ;;  %8315 = vmatprep.subr.bf16.mxu0 %v12675_v44  ;;  %v3042_v56 = vld [vmem:[%s12434_s4 + $0x18] sm:$0xff]  ;;  %v3044_v55 = vld [vmem:[%s12434_s4 + $0x28] sm:$0xff]  ;;  %8284 = vmatprep.subr.bf16.mxu1 %v11355_v42  ;;  %v3055_v42 = vld [vmem:[%s12434_s4 + $0x80] sm:$0xff] }
 0x5ce   :  { %v11366_v54 = vpack.c.bf16 %v3042_v56, %v3039_v46  ;;  %v11372_v20 = vpack.c.bf16 %v3044_v55, %v3041_v36  ;;  %v11382_v46 = vpack.c.bf16 %v3049_v35, %v3046_v49  ;;  %v3045_v56 = vld [vmem:[%s12434_s4 + $0x30] sm:$0xff]  ;;  %v3048_v36 = vld [vmem:[%s12434_s4 + $0x48] sm:$0xff]  ;;  %v3047_v55 = vld [vmem:[%s12434_s4 + $0x40] sm:$0xff] }
 0x5cf   :  { %12836 = vst [vmem:[#allocation46_spill] sm:$0xff] %v11341_v52  ;;  %2934 = vmatmul.mubr.f32.vlgmr.msra.gmra.mrb[12].mxu1 %v11341_v52  ;;  %7135 = vmatmul.mubr.f32.vlgmr.msra.gmra.mrb[58].mxu0 %v11341_v52  ;;  %v3050_v35 = vld [vmem:[%s12434_s4 + $0x58] sm:$0xff] }
 0x5d0   :  { %3151 = vmatprep.mubr.f32.mxu1 %v12652_v62  ;;  %7169 = vmatprep.mubr.msk.f32.mxu0 %vm9424_vm8, %v12652_v62  ;;  %12838 = vst [vmem:[#allocation36_spill] sm:$0xff] %v11366_v54  ;;  %12839 = vst [vmem:[#allocation39_spill] sm:$0xff] %v11372_v20  ;;  %v11400_v49 = vpack.c.bf16 %v3050_v35, %v3047_v55  ;;  %v3054_v55 = vld [vmem:[%s12434_s4 + $0x78] sm:$0xff]  ;;  %v3053_v35 = vld [vmem:[%s12434_s4 + $0x70] sm:$0xff] }
 0x5d1   :  { %8286 = vmatpush1.bf16.msra.mxu1 %v11366_v54  ;;  %8317 = vmatpush3.bf16.msra.mxu0 %v11372_v20  ;;  %12840 = vst [vmem:[#allocation53_spill] sm:$0xff] %v11382_v46  ;;  %v11394_v54 = vpack.c.bf16 %v3048_v36, %v3045_v56  ;;  %v3052_v20 = vld [vmem:[%s12434_s4 + $0x68] sm:$0xff]  ;;  %v3051_v36 = vld [vmem:[%s12434_s4 + $0x60] sm:$0xff] }
 0x5d2   :  { %8318 = vmatprep.subr.bf16.mxu0 %v12675_v44  ;;  %8288 = vmatprep.subr.bf16.mxu1 %v11382_v46  ;;  %12842 = vst [vmem:[#allocation52_spill] sm:$0xff] %v11400_v49  ;;  %v11410_v56 = vpack.c.bf16 %v3055_v42, %v3052_v20  ;;  %v3056_v42 = vld [vmem:[%s12434_s4 + $0x88] sm:$0xff]  ;;  %v3061_v46 = vld [vmem:[%s12434_s4 + $0xb0] sm:$0xff] }
 0x5d3   :  { %12841 = vst [vmem:[#allocation56_spill] sm:$0xff] %v11394_v54  ;;  %v11428_v20 = vpack.c.bf16 %v3056_v42, %v3053_v35  ;;  %v3060_v35 = vld [vmem:[%s12434_s4 + $0xa8] sm:$0xff]  ;;  %v3059_v42 = vld [vmem:[%s12434_s4 + $0xa0] sm:$0xff] }
 0x5d4   :  { %12843 = vst [vmem:[#allocation55_spill] sm:$0xff] %v11410_v56 }
 0x5d5   :  { %8290 = vmatpush1.bf16.msra.mxu1 %v11394_v54  ;;  %8320 = vmatpush3.bf16.msra.mxu0 %v11400_v49  ;;  %v11422_v54 = vpack.c.bf16 %v3054_v55, %v3051_v36  ;;  %12845 = vst [vmem:[#allocation45_spill] sm:$0xff] %v11428_v20  ;;  %v3058_v49 = vld [vmem:[%s12434_s4 + $0x98] sm:$0xff]  ;;  %v3057_v55 = vld [vmem:[%s12434_s4 + $0x90] sm:$0xff] }
 0x5d6   :  { %8321 = vmatprep.subr.bf16.mxu0 %v12675_v44  ;;  %8292 = vmatprep.subr.bf16.mxu1 %v11410_v56  ;;  %v11438_v36 = vpack.c.bf16 %v3061_v46, %v3058_v49  ;;  %v3062_v46 = vld [vmem:[%s12434_s4 + $0xb8] sm:$0xff]  ;;  %v3067_v56 = vld [vmem:[%s12434_s4 + $0xe0] sm:$0xff] }
 0x5d7   :  { %12844 = vst [vmem:[#allocation42_spill] sm:$0xff] %v11422_v54  ;;  %v11456_v49 = vpack.c.bf16 %v3062_v46, %v3059_v42  ;;  %v3066_v42 = vld [vmem:[%s12434_s4 + $0xd8] sm:$0xff]  ;;  %v3065_v46 = vld [vmem:[%s12434_s4 + $0xd0] sm:$0xff] }
 0x5d8   :  { %12846 = vst [vmem:[#allocation59_spill] sm:$0xff] %v11438_v36 }
 0x5d9   :  { %8294 = vmatpush1.bf16.msra.mxu1 %v11422_v54  ;;  %8323 = vmatpush3.bf16.msra.mxu0 %v11428_v20  ;;  %v11450_v54 = vpack.c.bf16 %v3060_v35, %v3057_v55  ;;  %12848 = vst [vmem:[#allocation58_spill] sm:$0xff] %v11456_v49  ;;  %v3064_v20 = vld [vmem:[%s12434_s4 + $0xc8] sm:$0xff]  ;;  %v3063_v35 = vld [vmem:[%s12434_s4 + $0xc0] sm:$0xff] }
 0x5da   :  { %8324 = vmatprep.subr.bf16.mxu0 %v12675_v44  ;;  %8296 = vmatprep.subr.bf16.mxu1 %v11438_v36  ;;  %v11466_v55 = vpack.c.bf16 %v3067_v56, %v3064_v20  ;;  %v3068_v56 = vld [vmem:[%s12434_s4 + $0xe8] sm:$0xff]  ;;  %v3073_v36 = vld [vmem:[%s12434_s4 + $0x110] sm:$0xff] }
 0x5db   :  { %12847 = vst [vmem:[#allocation62_spill] sm:$0xff] %v11450_v54  ;;  %v11484_v20 = vpack.c.bf16 %v3068_v56, %v3065_v46  ;;  %v3072_v46 = vld [vmem:[%s12434_s4 + $0x108] sm:$0xff]  ;;  %v3071_v56 = vld [vmem:[%s12434_s4 + $0x100] sm:$0xff] }
 0x5dc   :  { %12849 = vst [vmem:[#allocation61_spill] sm:$0xff] %v11466_v55 }
 0x5dd   :  { %8298 = vmatpush1.bf16.msra.mxu1 %v11450_v54  ;;  %8326 = vmatpush3.bf16.msra.mxu0 %v11456_v49  ;;  %v11478_v54 = vpack.c.bf16 %v3066_v42, %v3063_v35  ;;  %12851 = vst [vmem:[#allocation51_spill] sm:$0xff] %v11484_v20  ;;  %v3070_v49 = vld [vmem:[%s12434_s4 + $0xf8] sm:$0xff]  ;;  %v3069_v42 = vld [vmem:[%s12434_s4 + $0xf0] sm:$0xff] }
 0x5de   :  { %8327 = vmatprep.subr.bf16.mxu0 %v12675_v44  ;;  %8300 = vmatprep.subr.bf16.mxu1 %v11466_v55  ;;  %v11494_v35 = vpack.c.bf16 %v3073_v36, %v3070_v49  ;;  %v3074_v36 = vld [vmem:[%s12434_s4 + $0x118] sm:$0xff]  ;;  %v3079_v55 = vld [vmem:[%s12434_s4 + $0x140] sm:$0xff] }
 0x5df   :  { %12850 = vst [vmem:[#allocation48_spill] sm:$0xff] %v11478_v54  ;;  %v11512_v49 = vpack.c.bf16 %v3074_v36, %v3071_v56  ;;  %v3078_v56 = vld [vmem:[%s12434_s4 + $0x138] sm:$0xff]  ;;  %v3077_v36 = vld [vmem:[%s12434_s4 + $0x130] sm:$0xff] }
 0x5e0   :  { %12852 = vst [vmem:[#allocation65_spill] sm:$0xff] %v11494_v35 }
 0x5e1   :  { %8302 = vmatpush1.bf16.msra.mxu1 %v11478_v54  ;;  %8329 = vmatpush3.bf16.msra.mxu0 %v11484_v20  ;;  %v11506_v54 = vpack.c.bf16 %v3072_v46, %v3069_v42  ;;  %12854 = vst [vmem:[#allocation64_spill] sm:$0xff] %v11512_v49  ;;  %v3076_v20 = vld [vmem:[%s12434_s4 + $0x128] sm:$0xff]  ;;  %v3075_v46 = vld [vmem:[%s12434_s4 + $0x120] sm:$0xff] }
 0x5e2   :  { %8330 = vmatprep.subr.bf16.mxu0 %v12675_v44  ;;  %8304 = vmatprep.subr.bf16.mxu1 %v11494_v35  ;;  %v11522_v42 = vpack.c.bf16 %v3079_v55, %v3076_v20  ;;  %v3080_v55 = vld [vmem:[%s12434_s4 + $0x148] sm:$0xff]  ;;  %v3085_v35 = vld [vmem:[%s12434_s4 + $0x170] sm:$0xff] }
 0x5e3   :  { %12853 = vst [vmem:[#allocation68_spill] sm:$0xff] %v11506_v54  ;;  %v11540_v20 = vpack.c.bf16 %v3080_v55, %v3077_v36  ;;  %v3084_v36 = vld [vmem:[%s12434_s4 + $0x168] sm:$0xff]  ;;  %v3083_v55 = vld [vmem:[%s12434_s4 + $0x160] sm:$0xff] }
 0x5e4   :  { %12855 = vst [vmem:[#allocation67_spill] sm:$0xff] %v11522_v42 }
 0x5e5   :  { %8306 = vmatpush1.bf16.msra.mxu1 %v11506_v54  ;;  %8332 = vmatpush3.bf16.msra.mxu0 %v11512_v49  ;;  %v11534_v54 = vpack.c.bf16 %v3078_v56, %v3075_v46  ;;  %12857 = vst [vmem:[#allocation57_spill] sm:$0xff] %v11540_v20  ;;  %v3082_v49 = vld [vmem:[%s12434_s4 + $0x158] sm:$0xff]  ;;  %v3081_v56 = vld [vmem:[%s12434_s4 + $0x150] sm:$0xff] }
 0x5e6   :  { %8333 = vmatprep.subr.bf16.mxu0 %v12675_v44  ;;  %8308 = vmatprep.subr.bf16.mxu1 %v11522_v42  ;;  %v11550_v46 = vpack.c.bf16 %v3085_v35, %v3082_v49  ;;  %v3086_v35 = vld [vmem:[%s12434_s4 + $0x178] sm:$0xff] }
 0x5e7   :  { %12856 = vst [vmem:[#allocation54_spill] sm:$0xff] %v11534_v54  ;;  %v11568_v49 = vpack.c.bf16 %v3086_v35, %v3083_v55 }
 0x5e8   :  { %12858 = vst [vmem:[#allocation71_spill] sm:$0xff] %v11550_v46 }
 0x5e9   :  { %8310 = vmatpush1.bf16.msra.mxu1 %v11534_v54  ;;  %8335 = vmatpush3.bf16.msra.mxu0 %v11540_v20  ;;  %v11562_v54 = vpack.c.bf16 %v3084_v36, %v3081_v56  ;;  %12860 = vst [vmem:[#allocation70_spill] sm:$0xff] %v11568_v49  ;;  %v12861_v56 = vld [vmem:[#allocation87_spill] sm:$0xff] }
 0x5ea   :  { %8336 = vmatprep.subr.bf16.mxu0 %v12675_v44  ;;  %8312 = vmatprep.subr.bf16.mxu1 %v11550_v46 }
 0x5eb   :  { %12859 = vst [vmem:[#allocation74_spill] sm:$0xff] %v11562_v54 }
 0x5ed   :  { %8314 = vmatpush1.bf16.msra.mxu1 %v11562_v54  ;;  %8338 = vmatpush3.bf16.msra.mxu0 %v11568_v49 }
 0x5ee   :  { %8340 = vmatprep.subr.bf16.mxu1 %v12819_v29  ;;  %8371 = vmatprep.subr.bf16.mxu0 %v12675_v44 }
 0x662   :  { %v2536_v20 = vpop.f32.mrb[10].mxu1  ;;  %v2607_v42 = vpop.f32.mrb[54].mxu0 }
 0x663   :  { %v2611_v36 = vadd.f32 %v2536_v20, %v12861_v56  ;;  %v2538_v17 = vpop.f32.mrb[11].mxu1  ;;  %v7066_v57 = vpop.f32.mrb[55].mxu0  ;;  %v2625_v29 = vadd.f32 %v10565_v58, %v2607_v42 }
 0x664   :  { %v2612_v46 = vadd.f32 %v2538_v17, %v12862_v34 }
 0x665   :  { %v6184_v52 = vmul.f32 -1.442695, %v2611_v36  ;;  %v12864_v36 = vld [vmem:[#allocation19_spill] sm:$0xff] }
 0x666   :  { %v6185_v55 = vmul.f32 -1.442695, %v2612_v46 }
 0x667   :  { %9258 = vpow2.f32 %v6184_v52 }
 0x668   :  { %9260 = vpow2.f32 %v6185_v55  ;;  %v12865_v55 = vld [vmem:[#allocation17_spill] sm:$0xff] }
 0x671   :  { %v9259_v35 = vpop.eup %9258 }
 0x672   :  { %v2619_v26 = vadd.f32 1.0, %v9259_v35  ;;  %v9261_v49 = vpop.eup %9260 }
 0x673   :  { %v2620_v28 = vadd.f32 1.0, %v9261_v49 }
 0x674   :  { %9262 = vrcp.f32 %v2619_v26 }
 0x67e   :  { %v9263_v54 = vpop.eup %9262 }
 0x67f   :  { %v2626_v31 = vmul.f32 %v9263_v54, %v2625_v29 }
 0x681   :  { %v2627_v27 = vadd.f32 %v2626_v31, %v12863_v0 }
 0x682   :  { %v11578_v20 = vpop.f32.mrb[56].mxu0 }
 0x683   :  { %9264 = vtanh.f32 %v2627_v27  ;;  %v7101_v57 = vpop.f32.mrb[57].mxu0 }
 0x684   :  { %9266 = vrcp.f32 %v2620_v28 }
 0x68d   :  { %v9265_v52 = vpop.eup %9264 }
 0x68e   :  { %v2629_v34 = vsub.f32 %v11261_v50, %v9265_v52  ;;  %v9267_v17 = vpop.eup %9266 }
 0x690   :  { %v2630_v46 = vmul.f32 %v9267_v17, %v2629_v34  ;;  %v2818_v34 = vadd.f32 %v11578_v20, %v11185_v18  ;;  %v12867_v20 = vld [vmem:[#allocation30_spill] sm:$0xff] }
 0x692   :  { %v11581_v56 = vadd.f32 %v9265_v52, %v2630_v46 }
 0x694   :  { %3152 = vmatmul.mubr.f32.vlgmr.msra.gmra.mrb[14].mxu1 %v11581_v56  ;;  %7170 = vmatmul.mubr.f32.vlgmr.msra.gmra.mrb[60].mxu0 %v11581_v56 }
 0x695   :  { %8342 = vmatpush1.bf16.msra.mxu1 %v10789_v51  ;;  %8373 = vmatpush3.bf16.msra.mxu0 %v10830_v9 }
 0x696   :  { %8344 = vmatprep.subr.bf16.mxu1 %v10797_v4  ;;  %8374 = vmatprep.subr.bf16.mxu0 %v12675_v44 }
 0x697   :  { %3361 = vmatprep.mubr.f32.mxu1 %v12652_v62  ;;  %7204 = vmatprep.mubr.msk.f32.mxu0 %vm9424_vm8, %v12652_v62 }
 0x699   :  { %8346 = vmatpush1.bf16.msra.mxu1 %v10810_v3  ;;  %8376 = vmatpush3.bf16.msra.mxu0 %v10847_v2 }
 0x69a   :  { %8348 = vmatprep.subr.bf16.mxu1 %v10818_v10  ;;  %8377 = vmatprep.subr.bf16.mxu0 %v12675_v44 }
 0x69d   :  { %8350 = vmatpush1.bf16.msra.mxu1 %v10825_v6  ;;  %8379 = vmatpush3.bf16.msra.mxu0 %v10865_v8 }
 0x69e   :  { %8352 = vmatprep.subr.bf16.mxu1 %v10835_v13  ;;  %8380 = vmatprep.subr.bf16.mxu0 %v12675_v44 }
 0x6a1   :  { %8354 = vmatpush1.bf16.msra.mxu1 %v10842_v12  ;;  %8382 = vmatpush3.bf16.msra.mxu0 %v10881_v14 }
 0x6a2   :  { %v2935_v0 = vpop.f32.mrb[12].mxu1  ;;  %v3006_v31 = vpop.f32.mrb[58].mxu0  ;;  %8356 = vmatprep.subr.bf16.mxu1 %v10852_v5  ;;  %8383 = vmatprep.subr.bf16.mxu0 %v12675_v44 }
 0x6a3   :  { %v9135_v27 = vadd.f32 %v2935_v0, %v11138_v33  ;;  %v2937_v26 = vpop.f32.mrb[13].mxu1  ;;  %v7136_v28 = vpop.f32.mrb[59].mxu0  ;;  %v3024_v57 = vadd.f32 %v11177_v40, %v3006_v31  ;;  %v12866_v40 = vld [vmem:[#allocation37_spill] sm:$0xff]  ;;  %v12868_v31 = vld [vmem:[#allocation27_spill] sm:$0xff] }
 0x6a4   :  { %v9136_v50 = vadd.f32 %v2937_v26, %v11150_v1  ;;  %v12869_v26 = vld [vmem:[#allocation41_spill] sm:$0xff] }
 0x6a5   :  { %v6186_v29 = vmul.f32 -1.442695, %v9135_v27  ;;  %8358 = vmatpush1.bf16.msra.mxu1 %v10860_v15  ;;  %8385 = vmatpush3.bf16.msra.mxu0 %v10897_v48  ;;  %v12870_v28 = vld [vmem:[#allocation33_spill] sm:$0xff] }
 0x6a6   :  { %8360 = vmatprep.subr.bf16.mxu1 %v10870_v11  ;;  %8386 = vmatprep.subr.bf16.mxu0 %v12675_v44  ;;  %v6187_v54 = vmul.f32 -1.442695, %v9136_v50  ;;  %v12872_v50 = vld [vmem:[#allocation46_spill] sm:$0xff] }
 0x6a7   :  { %9268 = vpow2.f32 %v6186_v29  ;;  %v12871_v29 = vld [vmem:[#allocation40_spill] sm:$0xff] }
 0x6a8   :  { %9270 = vpow2.f32 %v6187_v54 }
 0x6a9   :  { %8362 = vmatpush1.bf16.msra.mxu1 %v10876_v19  ;;  %8388 = vmatpush3.bf16.msra.mxu0 %v10913_v24 }
 0x6aa   :  { %8364 = vmatprep.subr.bf16.mxu1 %v10886_v25  ;;  %8389 = vmatprep.subr.bf16.mxu0 %v12675_v44 }
 0x6ad   :  { %8366 = vmatpush1.bf16.msra.mxu1 %v12785_v30  ;;  %8391 = vmatpush3.bf16.msra.mxu0 %v12823_v43 }
 0x6ae   :  { %8368 = vmatprep.subr.bf16.mxu1 %v12824_v32  ;;  %8392 = vmatprep.subr.bf16.mxu0 %v12675_v44 }
 0x6b1   :  { %v9269_v42 = vpop.eup %9268  ;;  %8370 = vmatpush1.bf16.msra.mxu1 %v12825_v45  ;;  %8394 = vmatpush3.bf16.msra.mxu0 %v12826_v23 }
 0x6b2   :  { %v3018_v49 = vadd.f32 1.0, %v9269_v42  ;;  %8396 = vmatprep.subr.bf16.mxu1 %v12827_v37  ;;  %8427 = vmatprep.subr.bf16.mxu0 %v12675_v44  ;;  %v9271_v35 = vpop.eup %9270 }
 0x6b3   :  { %v3019_v0 = vadd.f32 1.0, %v9271_v35  ;;  %v12873_v35 = vld [vmem:[#allocation43_spill] sm:$0xff] }
 0x6b4   :  { %9272 = vrcp.f32 %v3018_v49  ;;  %3362 = vmatmul.mubr.f32.vlgmr.msra.gmra.mrb[16].mxu1 %v11581_v56  ;;  %7205 = vmatmul.mubr.f32.vlgmr.msra.gmra.mrb[62].mxu0 %v11581_v56 }
 0x6b5   :  { %8398 = vmatpush1.bf16.msra.mxu1 %v12828_v47  ;;  %8429 = vmatpush3.bf16.msra.mxu0 %v12829_v22 }
 0x6b6   :  { %8400 = vmatprep.subr.bf16.mxu1 %v12830_v39  ;;  %8430 = vmatprep.subr.bf16.mxu0 %v12675_v44 }
 0x6b7   :  { %3550 = vmatprep.mubr.f32.mxu1 %v12652_v62  ;;  %7239 = vmatprep.mubr.msk.f32.mxu0 %vm9424_vm8, %v12652_v62 }
 0x6b9   :  { %8402 = vmatpush1.bf16.msra.mxu1 %v12831_v61  ;;  %8432 = vmatpush3.bf16.msra.mxu0 %v12864_v36 }
 0x6ba   :  { %8404 = vmatprep.subr.bf16.mxu1 %v12865_v55  ;;  %8433 = vmatprep.subr.bf16.mxu0 %v12675_v44 }
 0x6bd   :  { %8406 = vmatpush1.bf16.msra.mxu1 %v12799_v59  ;;  %8435 = vmatpush3.bf16.msra.mxu0 %v12834_v53 }
 0x6be   :  { %v9273_v52 = vpop.eup %9272  ;;  %8408 = vmatprep.subr.bf16.mxu1 %v12835_v38  ;;  %8436 = vmatprep.subr.bf16.mxu0 %v12675_v44 }
 0x6bf   :  { %v3025_v17 = vmul.f32 %v9273_v52, %v3024_v57  ;;  %v12874_v57 = vld [vmem:[#allocation47_spill] sm:$0xff] }
 0x6c1   :  { %v3026_v46 = vadd.f32 %v3025_v17, %v2818_v34  ;;  %8410 = vmatpush1.bf16.msra.mxu1 %v12802_v41  ;;  %8438 = vmatpush3.bf16.msra.mxu0 %v12803_v16  ;;  %v12876_v34 = vld [vmem:[#allocation49_spill] sm:$0xff]  ;;  %v12877_v17 = vld [vmem:[#allocation36_spill] sm:$0xff] }
 0x6c2   :  { %8412 = vmatprep.subr.bf16.mxu1 %v12804_v7  ;;  %8439 = vmatprep.subr.bf16.mxu0 %v12675_v44 }
 0x6c3   :  { %9274 = vtanh.f32 %v3026_v46  ;;  %v12878_v46 = vld [vmem:[#allocation39_spill] sm:$0xff] }
 0x6c4   :  { %9276 = vrcp.f32 %v3019_v0  ;;  %v12879_v0 = vld [vmem:[#allocation53_spill] sm:$0xff] }
 0x6c5   :  { %8414 = vmatpush1.bf16.msra.mxu1 %v12805_v63  ;;  %8441 = vmatpush3.bf16.msra.mxu0 %v11030_v21 }
 0x6c6   :  { %8416 = vmatprep.subr.bf16.mxu1 %v12806_v60  ;;  %8442 = vmatprep.subr.bf16.mxu0 %v12675_v44 }
 0x6c9   :  { %8418 = vmatpush1.bf16.msra.mxu1 %v12866_v40  ;;  %8444 = vmatpush3.bf16.msra.mxu0 %v12867_v20  ;;  %v12903_v20 = vld [vmem:[#allocation100_spill] sm:$0xff] }
 0x6ca   :  { %8420 = vmatprep.subr.bf16.mxu1 %v12868_v31  ;;  %8445 = vmatprep.subr.bf16.mxu0 %v12675_v44 }
 0x6cd   :  { %v9275_v27 = vpop.eup %9274  ;;  %8422 = vmatpush1.bf16.msra.mxu1 %v12869_v26  ;;  %8447 = vmatpush3.bf16.msra.mxu0 %v12870_v28 }
 0x6ce   :  { %8424 = vmatprep.subr.bf16.mxu1 %v12871_v29  ;;  %8448 = vmatprep.subr.bf16.mxu0 %v12675_v44  ;;  %v3028_v54 = vsub.f32 %v12872_v50, %v9275_v27  ;;  %v9277_v42 = vpop.eup %9276  ;;  %v12884_v50 = vld [vmem:[#allocation45_spill] sm:$0xff] }
 0x6d0   :  { %v3029_v49 = vmul.f32 %v9277_v42, %v3028_v54  ;;  %v12881_v54 = vld [vmem:[#allocation52_spill] sm:$0xff]  ;;  %v12882_v42 = vld [vmem:[#allocation55_spill] sm:$0xff] }
 0x6d1   :  { %8426 = vmatpush1.bf16.msra.mxu1 %v12873_v35  ;;  %8450 = vmatpush3.bf16.msra.mxu0 %v12874_v57 }
 0x6d2   :  { %v11661_v52 = vadd.f32 %v9275_v27, %v3029_v49  ;;  %8452 = vmatprep.subr.bf16.mxu1 %v12876_v34  ;;  %8483 = vmatprep.subr.bf16.mxu0 %v12675_v44  ;;  %v12880_v27 = vld [vmem:[#allocation56_spill] sm:$0xff]  ;;  %v12883_v49 = vld [vmem:[#allocation42_spill] sm:$0xff]  ;;  %v12888_v34 = vld [vmem:[#allocation61_spill] sm:$0xff] }
 0x6d4   :  { %12875 = vst [vmem:[#allocation73_spill] sm:$0xff] %v11661_v52  ;;  %3551 = vmatmul.mubr.f32.vlgmr.msra.gmra.mrb[16].mxu1 %v11661_v52  ;;  %7240 = vmatmul.mubr.f32.vlgmr.msra.gmra.mrb[64].mxu0 %v11661_v52 }
 0x6d5   :  { %8454 = vmatpush1.bf16.msra.mxu1 %v12877_v17  ;;  %8485 = vmatpush3.bf16.msra.mxu0 %v12878_v46  ;;  %v12886_v46 = vld [vmem:[#allocation62_spill] sm:$0xff] }
 0x6d6   :  { %8456 = vmatprep.subr.bf16.mxu1 %v12879_v0  ;;  %8486 = vmatprep.subr.bf16.mxu0 %v12675_v44  ;;  %v12885_v0 = vld [vmem:[#allocation59_spill] sm:$0xff]  ;;  %v12887_v17 = vld [vmem:[#allocation58_spill] sm:$0xff] }
 0x6d7   :  { %3768 = vmatprep.mubr.f32.mxu1 %v12652_v62  ;;  %7274 = vmatprep.mubr.msk.f32.mxu0 %vm9424_vm8, %v12652_v62 }
 0x6d9   :  { %8458 = vmatpush1.bf16.msra.mxu1 %v12880_v27  ;;  %8488 = vmatpush3.bf16.msra.mxu0 %v12881_v54  ;;  %v12889_v54 = vld [vmem:[#allocation48_spill] sm:$0xff]  ;;  %v12891_v27 = vld [vmem:[#allocation65_spill] sm:$0xff] }
 0x6da   :  { %8460 = vmatprep.subr.bf16.mxu1 %v12882_v42  ;;  %8489 = vmatprep.subr.bf16.mxu0 %v12675_v44  ;;  %v12890_v42 = vld [vmem:[#allocation51_spill] sm:$0xff] }
 0x6dd   :  { %8462 = vmatpush1.bf16.msra.mxu1 %v12883_v49  ;;  %8491 = vmatpush3.bf16.msra.mxu0 %v12884_v50  ;;  %v12892_v50 = vld [vmem:[#allocation68_spill] sm:$0xff]  ;;  %v12894_v49 = vld [vmem:[#allocation67_spill] sm:$0xff] }
 0x6de   :  { %8464 = vmatprep.subr.bf16.mxu1 %v12885_v0  ;;  %8492 = vmatprep.subr.bf16.mxu0 %v12675_v44  ;;  %v12893_v0 = vld [vmem:[#allocation64_spill] sm:$0xff] }
 0x6e1   :  { %8466 = vmatpush1.bf16.msra.mxu1 %v12886_v46  ;;  %8494 = vmatpush3.bf16.msra.mxu0 %v12887_v17  ;;  %v12895_v17 = vld [vmem:[#allocation54_spill] sm:$0xff]  ;;  %v12897_v46 = vld [vmem:[#allocation71_spill] sm:$0xff] }
 0x6e2   :  { %8468 = vmatprep.subr.bf16.mxu1 %v12888_v34  ;;  %8495 = vmatprep.subr.bf16.mxu0 %v12675_v44  ;;  %v12896_v34 = vld [vmem:[#allocation57_spill] sm:$0xff] }
 0x6e5   :  { %8470 = vmatpush1.bf16.msra.mxu1 %v12889_v54  ;;  %8497 = vmatpush3.bf16.msra.mxu0 %v12890_v42  ;;  %v12898_v42 = vld [vmem:[#allocation74_spill] sm:$0xff]  ;;  %v12900_v54 = vld [vmem:[#allocation111_spill] sm:$0xff] }
 0x6e6   :  { %8472 = vmatprep.subr.bf16.mxu1 %v12891_v27  ;;  %8498 = vmatprep.subr.bf16.mxu0 %v12675_v44  ;;  %v12899_v27 = vld [vmem:[#allocation70_spill] sm:$0xff] }
 0x6e9   :  { %8474 = vmatpush1.bf16.msra.mxu1 %v12892_v50  ;;  %8500 = vmatpush3.bf16.msra.mxu0 %v12893_v0  ;;  %v12901_v50 = vld [vmem:[#allocation89_spill] sm:$0xff] }
 0x6ea   :  { %8476 = vmatprep.subr.bf16.mxu1 %v12894_v49  ;;  %8501 = vmatprep.subr.bf16.mxu0 %v12675_v44 }
 0x6ed   :  { %8478 = vmatpush1.bf16.msra.mxu1 %v12895_v17  ;;  %8503 = vmatpush3.bf16.msra.mxu0 %v12896_v34  ;;  %v12902_v34 = vld [vmem:[#allocation90_spill] sm:$0xff] }
 0x6ee   :  { %8480 = vmatprep.subr.bf16.mxu1 %v12897_v46  ;;  %8504 = vmatprep.subr.bf16.mxu0 %v12675_v44 }
 0x6f1   :  { %8482 = vmatpush1.bf16.msra.mxu1 %v12898_v42  ;;  %8506 = vmatpush3.bf16.msra.mxu0 %v12899_v27 }
 0x6f2   :  { %8508 = vmatprep.subr.bf16.mxu1 %v12900_v54  ;;  %8539 = vmatprep.subr.bf16.mxu0 %v12675_v44 }
 0x767   :  { %v3153_v0 = vpop.f32.mrb[14].mxu1  ;;  %v3224_v49 = vpop.f32.mrb[60].mxu0 }
 0x768   :  { %v3228_v57 = vadd.f32 %v3153_v0, %v12901_v50  ;;  %v3155_v35 = vpop.f32.mrb[15].mxu1  ;;  %v7171_v17 = vpop.f32.mrb[61].mxu0  ;;  %v3242_v54 = vadd.f32 %v10565_v58, %v3224_v49 }
 0x769   :  { %v3229_v46 = vadd.f32 %v3155_v35, %v12902_v34 }
 0x76a   :  { %v6188_v52 = vmul.f32 -1.442695, %v3228_v57 }
 0x76b   :  { %v6189_v29 = vmul.f32 -1.442695, %v3229_v46 }
 0x76c   :  { %9278 = vpow2.f32 %v6188_v52 }
 0x76d   :  { %9280 = vpow2.f32 %v6189_v29 }
 0x776   :  { %v9279_v28 = vpop.eup %9278 }
 0x777   :  { %v3236_v26 = vadd.f32 1.0, %v9279_v28  ;;  %v9281_v27 = vpop.eup %9280 }
 0x778   :  { %v3237_v60 = vadd.f32 1.0, %v9281_v27 }
 0x779   :  { %9282 = vrcp.f32 %v3236_v26 }
 0x783   :  { %v9283_v42 = vpop.eup %9282 }
 0x784   :  { %v3243_v31 = vmul.f32 %v9283_v42, %v3242_v54  ;;  %v11766_v42 = vld [vmem:[%s12439_s9] ss:$0 sm:$0xff] }
 0x786   :  { %v3244_v40 = vadd.f32 %v3243_v31, %v12903_v20 }
 0x787   :  { %v11706_v50 = vpop.f32.mrb[62].mxu0 }
 0x788   :  { %9284 = vtanh.f32 %v3244_v40  ;;  %v7206_v57 = vpop.f32.mrb[63].mxu0 }
 0x789   :  { %9286 = vrcp.f32 %v3237_v60 }
 0x792   :  { %v9285_v52 = vpop.eup %9284 }
 0x793   :  { %v3246_v35 = vsub.f32 %v11581_v56, %v9285_v52  ;;  %v9287_v34 = vpop.eup %9286 }
 0x795   :  { %v3247_v28 = vmul.f32 %v9287_v34, %v3246_v35 }
 0x797   :  { %v11709_v29 = vadd.f32 %v9285_v52, %v3247_v28  ;;  %v3435_v52 = vadd.f32 %v11706_v50, %v11185_v18  ;;  %v12905_v50 = vld [vmem:[#allocation37_spill] sm:$0xff] }
 0x799   :  { %3769 = vmatmul.mubr.f32.vlgmr.msra.gmra.mrb[18].mxu1 %v11709_v29  ;;  %7275 = vmatmul.mubr.f32.vlgmr.msra.gmra.mrb[66].mxu0 %v11709_v29 }
 0x79a   :  { %8510 = vmatpush1.bf16.msra.mxu1 %v10789_v51  ;;  %8541 = vmatpush3.bf16.msra.mxu0 %v10830_v9 }
 0x79b   :  { %8512 = vmatprep.subr.bf16.mxu1 %v10797_v4  ;;  %8542 = vmatprep.subr.bf16.mxu0 %v12675_v44 }
 0x79c   :  { %3978 = vmatprep.mubr.f32.mxu1 %v12652_v62  ;;  %7309 = vmatprep.mubr.msk.f32.mxu0 %vm9424_vm8, %v12652_v62 }
 0x79e   :  { %8514 = vmatpush1.bf16.msra.mxu1 %v10810_v3  ;;  %8544 = vmatpush3.bf16.msra.mxu0 %v10847_v2 }
 0x79f   :  { %8516 = vmatprep.subr.bf16.mxu1 %v10818_v10  ;;  %8545 = vmatprep.subr.bf16.mxu0 %v12675_v44 }
 0x7a2   :  { %8518 = vmatpush1.bf16.msra.mxu1 %v10825_v6  ;;  %8547 = vmatpush3.bf16.msra.mxu0 %v10865_v8 }
 0x7a3   :  { %8520 = vmatprep.subr.bf16.mxu1 %v10835_v13  ;;  %8548 = vmatprep.subr.bf16.mxu0 %v12675_v44 }
 0x7a6   :  { %8522 = vmatpush1.bf16.msra.mxu1 %v10842_v12  ;;  %8550 = vmatpush3.bf16.msra.mxu0 %v10881_v14 }
 0x7a7   :  { %v3552_v60 = vpop.f32.mrb[16].mxu1  ;;  %v3623_v56 = vpop.f32.mrb[64].mxu0  ;;  %8524 = vmatprep.subr.bf16.mxu1 %v10852_v5  ;;  %8551 = vmatprep.subr.bf16.mxu0 %v12675_v44 }
 0x7a8   :  { %v9137_v40 = vadd.f32 %v3552_v60, %v11138_v33  ;;  %v3554_v20 = vpop.f32.mrb[17].mxu1  ;;  %v7241_v31 = vpop.f32.mrb[65].mxu0  ;;  %v3641_v49 = vadd.f32 %v11766_v42, %v3623_v56  ;;  %v12904_v60 = vld [vmem:[#allocation34_spill] sm:$0xff] }
 0x7a9   :  { %v9138_v17 = vadd.f32 %v3554_v20, %v11150_v1  ;;  %v12906_v56 = vld [vmem:[#allocation30_spill] sm:$0xff]  ;;  %v12908_v31 = vld [vmem:[#allocation41_spill] sm:$0xff] }
 0x7aa   :  { %v6190_v26 = vmul.f32 -1.442695, %v9137_v40  ;;  %8526 = vmatpush1.bf16.msra.mxu1 %v10860_v15  ;;  %8553 = vmatpush3.bf16.msra.mxu0 %v10897_v48  ;;  %v12907_v40 = vld [vmem:[#allocation27_spill] sm:$0xff] }
 0x7ab   :  { %8528 = vmatprep.subr.bf16.mxu1 %v10870_v11  ;;  %8554 = vmatprep.subr.bf16.mxu0 %v12675_v44  ;;  %v6191_v46 = vmul.f32 -1.442695, %v9138_v17  ;;  %v12910_v17 = vld [vmem:[#allocation40_spill] sm:$0xff] }
 0x7ac   :  { %9288 = vpow2.f32 %v6190_v26  ;;  %v12909_v26 = vld [vmem:[#allocation33_spill] sm:$0xff] }
 0x7ad   :  { %9290 = vpow2.f32 %v6191_v46  ;;  %v12911_v46 = vld [vmem:[#allocation73_spill] sm:$0xff] }
 0x7ae   :  { %8530 = vmatpush1.bf16.msra.mxu1 %v10876_v19  ;;  %8556 = vmatpush3.bf16.msra.mxu0 %v10913_v24 }
 0x7af   :  { %8532 = vmatprep.subr.bf16.mxu1 %v10886_v25  ;;  %8557 = vmatprep.subr.bf16.mxu0 %v12675_v44 }
 0x7b2   :  { %8534 = vmatpush1.bf16.msra.mxu1 %v12785_v30  ;;  %8559 = vmatpush3.bf16.msra.mxu0 %v12823_v43 }
 0x7b3   :  { %8536 = vmatprep.subr.bf16.mxu1 %v12824_v32  ;;  %8560 = vmatprep.subr.bf16.mxu0 %v12675_v44 }
 0x7b6   :  { %v9289_v0 = vpop.eup %9288  ;;  %8538 = vmatpush1.bf16.msra.mxu1 %v12825_v45  ;;  %8562 = vmatpush3.bf16.msra.mxu0 %v12826_v23 }
 0x7b7   :  { %v3635_v27 = vadd.f32 1.0, %v9289_v0  ;;  %8564 = vmatprep.subr.bf16.mxu1 %v12827_v37  ;;  %8595 = vmatprep.subr.bf16.mxu0 %v12675_v44  ;;  %v9291_v54 = vpop.eup %9290 }
 0x7b8   :  { %v3636_v28 = vadd.f32 1.0, %v9291_v54 }
 0x7b9   :  { %9292 = vrcp.f32 %v3635_v27  ;;  %3979 = vmatmul.mubr.f32.vlgmr.msra.gmra.mrb[20].mxu1 %v11709_v29  ;;  %7310 = vmatmul.mubr.f32.vlgmr.msra.gmra.mrb[68].mxu0 %v11709_v29 }
 0x7ba   :  { %8566 = vmatpush1.bf16.msra.mxu1 %v12828_v47  ;;  %8597 = vmatpush3.bf16.msra.mxu0 %v12829_v22 }
 0x7bb   :  { %8568 = vmatprep.subr.bf16.mxu1 %v12830_v39  ;;  %8598 = vmatprep.subr.bf16.mxu0 %v12675_v44 }
 0x7bc   :  { %4167 = vmatprep.mubr.f32.mxu1 %v12652_v62  ;;  %7344 = vmatprep.mubr.msk.f32.mxu0 %vm9424_vm8, %v12652_v62 }
 0x7be   :  { %8570 = vmatpush1.bf16.msra.mxu1 %v12831_v61  ;;  %8600 = vmatpush3.bf16.msra.mxu0 %v12864_v36 }
 0x7bf   :  { %8572 = vmatprep.subr.bf16.mxu1 %v12865_v55  ;;  %8601 = vmatprep.subr.bf16.mxu0 %v12675_v44 }
 0x7c2   :  { %8574 = vmatpush1.bf16.msra.mxu1 %v12799_v59  ;;  %8603 = vmatpush3.bf16.msra.mxu0 %v12834_v53 }
 0x7c3   :  { %v9293_v57 = vpop.eup %9292  ;;  %8576 = vmatprep.subr.bf16.mxu1 %v12835_v38  ;;  %8604 = vmatprep.subr.bf16.mxu0 %v12675_v44 }
 0x7c4   :  { %v3642_v35 = vmul.f32 %v9293_v57, %v3641_v49  ;;  %v12912_v49 = vld [vmem:[#allocation43_spill] sm:$0xff] }
 0x7c5   :  { %v12913_v57 = vld [vmem:[#allocation47_spill] sm:$0xff] }
 0x7c6   :  { %v3643_v34 = vadd.f32 %v3642_v35, %v3435_v52  ;;  %8578 = vmatpush1.bf16.msra.mxu1 %v12802_v41  ;;  %8606 = vmatpush3.bf16.msra.mxu0 %v12803_v16  ;;  %v12915_v35 = vld [vmem:[#allocation49_spill] sm:$0xff] }
 0x7c7   :  { %8580 = vmatprep.subr.bf16.mxu1 %v12804_v7  ;;  %8607 = vmatprep.subr.bf16.mxu0 %v12675_v44 }
 0x7c8   :  { %9294 = vtanh.f32 %v3643_v34  ;;  %v12916_v34 = vld [vmem:[#allocation36_spill] sm:$0xff] }
 0x7c9   :  { %9296 = vrcp.f32 %v3636_v28  ;;  %v12917_v28 = vld [vmem:[#allocation39_spill] sm:$0xff] }
 0x7ca   :  { %8582 = vmatpush1.bf16.msra.mxu1 %v12805_v63  ;;  %8609 = vmatpush3.bf16.msra.mxu0 %v11030_v21 }
 0x7cb   :  { %8584 = vmatprep.subr.bf16.mxu1 %v12904_v60  ;;  %8610 = vmatprep.subr.bf16.mxu0 %v12675_v44 }
 0x7ce   :  { %8586 = vmatpush1.bf16.msra.mxu1 %v12905_v50  ;;  %8612 = vmatpush3.bf16.msra.mxu0 %v12906_v56  ;;  %v12942_v50 = vld [vmem:[#allocation99_spill] sm:$0xff] }
 0x7cf   :  { %8588 = vmatprep.subr.bf16.mxu1 %v12907_v40  ;;  %8613 = vmatprep.subr.bf16.mxu0 %v12675_v44 }
 0x7d2   :  { %v9295_v20 = vpop.eup %9294  ;;  %8590 = vmatpush1.bf16.msra.mxu1 %v12908_v31  ;;  %8615 = vmatpush3.bf16.msra.mxu0 %v12909_v26 }
 0x7d3   :  { %8592 = vmatprep.subr.bf16.mxu1 %v12910_v17  ;;  %8616 = vmatprep.subr.bf16.mxu0 %v12675_v44  ;;  %v3645_v0 = vsub.f32 %v12911_v46, %v9295_v20  ;;  %v9297_v27 = vpop.eup %9296  ;;  %v12918_v46 = vld [vmem:[#allocation53_spill] sm:$0xff] }
 0x7d5   :  { %v3646_v54 = vmul.f32 %v9297_v27, %v3645_v0  ;;  %v12920_v0 = vld [vmem:[#allocation52_spill] sm:$0xff]  ;;  %v12921_v27 = vld [vmem:[#allocation55_spill] sm:$0xff] }
 0x7d6   :  { %8594 = vmatpush1.bf16.msra.mxu1 %v12912_v49  ;;  %8618 = vmatpush3.bf16.msra.mxu0 %v12913_v57  ;;  %v12927_v57 = vld [vmem:[#allocation61_spill] sm:$0xff] }
 0x7d7   :  { %v11794_v52 = vadd.f32 %v9295_v20, %v3646_v54  ;;  %8620 = vmatprep.subr.bf16.mxu1 %v12915_v35  ;;  %8651 = vmatprep.subr.bf16.mxu0 %v12675_v44  ;;  %v12919_v20 = vld [vmem:[#allocation56_spill] sm:$0xff]  ;;  %v12922_v54 = vld [vmem:[#allocation42_spill] sm:$0xff]  ;;  %v12923_v35 = vld [vmem:[#allocation45_spill] sm:$0xff] }
 0x7d9   :  { %12914 = vst [vmem:[#allocation60_spill] sm:$0xff] %v11794_v52  ;;  %4168 = vmatmul.mubr.f32.vlgmr.msra.gmra.mrb[20].mxu1 %v11794_v52  ;;  %7345 = vmatmul.mubr.f32.vlgmr.msra.gmra.mrb[70].mxu0 %v11794_v52 }
 0x7da   :  { %8622 = vmatpush1.bf16.msra.mxu1 %v12916_v34  ;;  %8653 = vmatpush3.bf16.msra.mxu0 %v12917_v28  ;;  %v12925_v34 = vld [vmem:[#allocation62_spill] sm:$0xff] }
 0x7db   :  { %8624 = vmatprep.subr.bf16.mxu1 %v12918_v46  ;;  %8654 = vmatprep.subr.bf16.mxu0 %v12675_v44  ;;  %v12924_v46 = vld [vmem:[#allocation59_spill] sm:$0xff]  ;;  %v12926_v28 = vld [vmem:[#allocation58_spill] sm:$0xff] }
 0x7dc   :  { %4385 = vmatprep.mubr.f32.mxu1 %v12652_v62  ;;  %7379 = vmatprep.mubr.msk.f32.mxu0 %vm9424_vm8, %v12652_v62 }
 0x7de   :  { %8626 = vmatpush1.bf16.msra.mxu1 %v12919_v20  ;;  %8656 = vmatpush3.bf16.msra.mxu0 %v12920_v0  ;;  %v12928_v20 = vld [vmem:[#allocation48_spill] sm:$0xff]  ;;  %v12929_v0 = vld [vmem:[#allocation51_spill] sm:$0xff] }
 0x7df   :  { %8628 = vmatprep.subr.bf16.mxu1 %v12921_v27  ;;  %8657 = vmatprep.subr.bf16.mxu0 %v12675_v44  ;;  %v12930_v27 = vld [vmem:[#allocation65_spill] sm:$0xff] }
 0x7e2   :  { %8630 = vmatpush1.bf16.msra.mxu1 %v12922_v54  ;;  %8659 = vmatpush3.bf16.msra.mxu0 %v12923_v35  ;;  %v12931_v54 = vld [vmem:[#allocation68_spill] sm:$0xff] }
 0x7e3   :  { %8632 = vmatprep.subr.bf16.mxu1 %v12924_v46  ;;  %8660 = vmatprep.subr.bf16.mxu0 %v12675_v44  ;;  %v12932_v35 = vld [vmem:[#allocation64_spill] sm:$0xff]  ;;  %v12933_v46 = vld [vmem:[#allocation67_spill] sm:$0xff] }
 0x7e6   :  { %8634 = vmatpush1.bf16.msra.mxu1 %v12925_v34  ;;  %8662 = vmatpush3.bf16.msra.mxu0 %v12926_v28  ;;  %v12934_v34 = vld [vmem:[#allocation54_spill] sm:$0xff]  ;;  %v12936_v28 = vld [vmem:[#allocation71_spill] sm:$0xff] }
 0x7e7   :  { %8636 = vmatprep.subr.bf16.mxu1 %v12927_v57  ;;  %8663 = vmatprep.subr.bf16.mxu0 %v12675_v44  ;;  %v12935_v57 = vld [vmem:[#allocation57_spill] sm:$0xff] }
 0x7ea   :  { %8638 = vmatpush1.bf16.msra.mxu1 %v12928_v20  ;;  %8665 = vmatpush3.bf16.msra.mxu0 %v12929_v0  ;;  %v12937_v20 = vld [vmem:[#allocation74_spill] sm:$0xff] }
 0x7eb   :  { %8640 = vmatprep.subr.bf16.mxu1 %v12930_v27  ;;  %8666 = vmatprep.subr.bf16.mxu0 %v12675_v44  ;;  %v12938_v0 = vld [vmem:[#allocation70_spill] sm:$0xff]  ;;  %v12939_v27 = vld [vmem:[#allocation111_spill] sm:$0xff] }
 0x7ee   :  { %8642 = vmatpush1.bf16.msra.mxu1 %v12931_v54  ;;  %8668 = vmatpush3.bf16.msra.mxu0 %v12932_v35 }
 0x7ef   :  { %8644 = vmatprep.subr.bf16.mxu1 %v12933_v46  ;;  %8669 = vmatprep.subr.bf16.mxu0 %v12675_v44  ;;  %v12940_v46 = vld [vmem:[#allocation91_spill] sm:$0xff] }
 0x7f2   :  { %8646 = vmatpush1.bf16.msra.mxu1 %v12934_v34  ;;  %8671 = vmatpush3.bf16.msra.mxu0 %v12935_v57  ;;  %v12941_v57 = vld [vmem:[#allocation92_spill] sm:$0xff] }
 0x7f3   :  { %8648 = vmatprep.subr.bf16.mxu1 %v12936_v28  ;;  %8672 = vmatprep.subr.bf16.mxu0 %v12675_v44 }
 0x7f6   :  { %8650 = vmatpush1.bf16.msra.mxu1 %v12937_v20  ;;  %8674 = vmatpush3.bf16.msra.mxu0 %v12938_v0 }
 0x7f7   :  { %8676 = vmatprep.subr.bf16.mxu1 %v12939_v27  ;;  %8707 = vmatprep.subr.bf16.mxu0 %v12675_v44 }
 0x86c   :  { %v3770_v54 = vpop.f32.mrb[18].mxu1  ;;  %v3841_v35 = vpop.f32.mrb[66].mxu0 }
 0x86d   :  { %v3845_v49 = vadd.f32 %v3770_v54, %v12940_v46  ;;  %v3772_v52 = vpop.f32.mrb[19].mxu1  ;;  %v7276_v34 = vpop.f32.mrb[67].mxu0  ;;  %v3859_v0 = vadd.f32 %v10565_v58, %v3841_v35 }
 0x86e   :  { %v3846_v28 = vadd.f32 %v3772_v52, %v12941_v57 }
 0x86f   :  { %v6192_v17 = vmul.f32 -1.442695, %v3845_v49 }
 0x870   :  { %v6193_v26 = vmul.f32 -1.442695, %v3846_v28 }
 0x871   :  { %9298 = vpow2.f32 %v6192_v17 }
 0x872   :  { %9300 = vpow2.f32 %v6193_v26 }
 0x87b   :  { %v9299_v31 = vpop.eup %9298 }
 0x87c   :  { %v3853_v40 = vadd.f32 1.0, %v9299_v31  ;;  %v9301_v20 = vpop.eup %9300 }
 0x87d   :  { %v3854_v21 = vadd.f32 1.0, %v9301_v20 }
 0x87e   :  { %9302 = vrcp.f32 %v3853_v40 }
 0x888   :  { %v9303_v27 = vpop.eup %9302 }
 0x889   :  { %v3860_v56 = vmul.f32 %v9303_v27, %v3859_v0 }
 0x88b   :  { %v3861_v60 = vadd.f32 %v3860_v56, %v12942_v50 }
 0x88c   :  { %v11839_v54 = vpop.f32.mrb[68].mxu0 }
 0x88d   :  { %9304 = vtanh.f32 %v3861_v60  ;;  %v7311_v49 = vpop.f32.mrb[69].mxu0 }
 0x88e   :  { %9306 = vrcp.f32 %v3854_v21  ;;  %v4052_v49 = vadd.f32 %v11839_v54, %v11185_v18  ;;  %v12945_v54 = vld [vmem:[#allocation37_spill] sm:$0xff] }
 0x897   :  { %v9305_v17 = vpop.eup %9304 }
 0x898   :  { %v3863_v52 = vsub.f32 %v11709_v29, %v9305_v17  ;;  %v9307_v46 = vpop.eup %9306 }
 0x89a   :  { %v3864_v31 = vmul.f32 %v9307_v46, %v3863_v52 }
 0x89c   :  { %v11842_v26 = vadd.f32 %v9305_v17, %v3864_v31  ;;  %v12943_v31 = vld [vmem:[#allocation44_spill] sm:$0xff] }
 0x89e   :  { %4386 = vmatmul.mubr.f32.vlgmr.msra.gmra.mrb[22].mxu1 %v11842_v26  ;;  %7380 = vmatmul.mubr.f32.vlgmr.msra.gmra.mrb[72].mxu0 %v11842_v26 }
 0x89f   :  { %8678 = vmatpush1.bf16.msra.mxu1 %v10789_v51  ;;  %8709 = vmatpush3.bf16.msra.mxu0 %v10830_v9 }
 0x8a0   :  { %8680 = vmatprep.subr.bf16.mxu1 %v10797_v4  ;;  %8710 = vmatprep.subr.bf16.mxu0 %v12675_v44 }
 0x8a1   :  { %4595 = vmatprep.mubr.f32.mxu1 %v12652_v62  ;;  %7414 = vmatprep.mubr.msk.f32.mxu0 %vm9424_vm8, %v12652_v62 }
 0x8a3   :  { %8682 = vmatpush1.bf16.msra.mxu1 %v10810_v3  ;;  %8712 = vmatpush3.bf16.msra.mxu0 %v10847_v2 }
 0x8a4   :  { %8684 = vmatprep.subr.bf16.mxu1 %v10818_v10  ;;  %8713 = vmatprep.subr.bf16.mxu0 %v12675_v44 }
 0x8a7   :  { %8686 = vmatpush1.bf16.msra.mxu1 %v10825_v6  ;;  %8715 = vmatpush3.bf16.msra.mxu0 %v10865_v8 }
 0x8a8   :  { %8688 = vmatprep.subr.bf16.mxu1 %v10835_v13  ;;  %8716 = vmatprep.subr.bf16.mxu0 %v12675_v44 }
 0x8ab   :  { %8690 = vmatpush1.bf16.msra.mxu1 %v10842_v12  ;;  %8718 = vmatpush3.bf16.msra.mxu0 %v10881_v14 }
 0x8ac   :  { %v4169_v21 = vpop.f32.mrb[20].mxu1  ;;  %v4240_v29 = vpop.f32.mrb[70].mxu0  ;;  %8692 = vmatprep.subr.bf16.mxu1 %v10852_v5  ;;  %8719 = vmatprep.subr.bf16.mxu0 %v12675_v44 }
 0x8ad   :  { %v9139_v60 = vadd.f32 %v4169_v21, %v11138_v33  ;;  %v4171_v50 = vpop.f32.mrb[21].mxu1  ;;  %v7346_v56 = vpop.f32.mrb[71].mxu0  ;;  %v4258_v20 = vadd.f32 %v11766_v42, %v4240_v29  ;;  %v12944_v21 = vld [vmem:[#allocation34_spill] sm:$0xff] }
 0x8ae   :  { %v9140_v27 = vadd.f32 %v4171_v50, %v11150_v1  ;;  %v12946_v29 = vld [vmem:[#allocation30_spill] sm:$0xff]  ;;  %v12948_v56 = vld [vmem:[#allocation41_spill] sm:$0xff] }
 0x8af   :  { %v6194_v40 = vmul.f32 -1.442695, %v9139_v60  ;;  %8694 = vmatpush1.bf16.msra.mxu1 %v10860_v15  ;;  %8721 = vmatpush3.bf16.msra.mxu0 %v10897_v48  ;;  %v12947_v60 = vld [vmem:[#allocation27_spill] sm:$0xff] }
 0x8b0   :  { %8696 = vmatprep.subr.bf16.mxu1 %v10870_v11  ;;  %8722 = vmatprep.subr.bf16.mxu0 %v12675_v44  ;;  %v6195_v35 = vmul.f32 -1.442695, %v9140_v27  ;;  %v12950_v27 = vld [vmem:[#allocation40_spill] sm:$0xff] }
 0x8b1   :  { %9308 = vpow2.f32 %v6194_v40  ;;  %v12949_v40 = vld [vmem:[#allocation33_spill] sm:$0xff] }
 0x8b2   :  { %9310 = vpow2.f32 %v6195_v35  ;;  %v12951_v35 = vld [vmem:[#allocation60_spill] sm:$0xff] }
 0x8b3   :  { %8698 = vmatpush1.bf16.msra.mxu1 %v10876_v19  ;;  %8724 = vmatpush3.bf16.msra.mxu0 %v10913_v24 }
 0x8b4   :  { %8700 = vmatprep.subr.bf16.mxu1 %v10886_v25  ;;  %8725 = vmatprep.subr.bf16.mxu0 %v12675_v44 }
 0x8b7   :  { %8702 = vmatpush1.bf16.msra.mxu1 %v12785_v30  ;;  %8727 = vmatpush3.bf16.msra.mxu0 %v12823_v43 }
 0x8b8   :  { %8704 = vmatprep.subr.bf16.mxu1 %v12824_v32  ;;  %8728 = vmatprep.subr.bf16.mxu0 %v12675_v44 }
 0x8bb   :  { %v9309_v34 = vpop.eup %9308  ;;  %8706 = vmatpush1.bf16.msra.mxu1 %v12825_v45  ;;  %8730 = vmatpush3.bf16.msra.mxu0 %v12826_v23 }
 0x8bc   :  { %v4252_v57 = vadd.f32 1.0, %v9309_v34  ;;  %8732 = vmatprep.subr.bf16.mxu1 %v12827_v37  ;;  %8763 = vmatprep.subr.bf16.mxu0 %v12675_v44  ;;  %v9311_v28 = vpop.eup %9310 }
 0x8bd   :  { %v4253_v46 = vadd.f32 1.0, %v9311_v28 }
 0x8be   :  { %9312 = vrcp.f32 %v4252_v57  ;;  %4596 = vmatmul.mubr.f32.vlgmr.msra.gmra.mrb[24].mxu1 %v11842_v26  ;;  %7415 = vmatmul.mubr.f32.vlgmr.msra.gmra.mrb[74].mxu0 %v11842_v26 }
 0x8bf   :  { %8734 = vmatpush1.bf16.msra.mxu1 %v12828_v47  ;;  %8765 = vmatpush3.bf16.msra.mxu0 %v12829_v22 }
 0x8c0   :  { %8736 = vmatprep.subr.bf16.mxu1 %v12830_v39  ;;  %8766 = vmatprep.subr.bf16.mxu0 %v12675_v44 }
 0x8c1   :  { %4784 = vmatprep.mubr.f32.mxu1 %v12652_v62  ;;  %7449 = vmatprep.mubr.msk.f32.mxu0 %vm9424_vm8, %v12652_v62 }
 0x8c3   :  { %8738 = vmatpush1.bf16.msra.mxu1 %v12831_v61  ;;  %8768 = vmatpush3.bf16.msra.mxu0 %v12864_v36 }
 0x8c4   :  { %8740 = vmatprep.subr.bf16.mxu1 %v12865_v55  ;;  %8769 = vmatprep.subr.bf16.mxu0 %v12675_v44 }
 0x8c7   :  { %8742 = vmatpush1.bf16.msra.mxu1 %v12799_v59  ;;  %8771 = vmatpush3.bf16.msra.mxu0 %v12834_v53 }
 0x8c8   :  { %v9313_v0 = vpop.eup %9312  ;;  %8744 = vmatprep.subr.bf16.mxu1 %v12835_v38  ;;  %8772 = vmatprep.subr.bf16.mxu0 %v12675_v44 }
 0x8c9   :  { %v4259_v17 = vmul.f32 %v9313_v0, %v4258_v20  ;;  %v12952_v20 = vld [vmem:[#allocation43_spill] sm:$0xff] }
 0x8ca   :  { %v12953_v0 = vld [vmem:[#allocation47_spill] sm:$0xff] }
 0x8cb   :  { %v4260_v52 = vadd.f32 %v4259_v17, %v4052_v49  ;;  %8746 = vmatpush1.bf16.msra.mxu1 %v12802_v41  ;;  %8774 = vmatpush3.bf16.msra.mxu0 %v12803_v16  ;;  %v4891_v17 = vld [vmem:[%s12434_s4 + $0x8] sm:$0xff] }
 0x8cc   :  { %8748 = vmatprep.subr.bf16.mxu1 %v12804_v7  ;;  %8775 = vmatprep.subr.bf16.mxu0 %v12675_v44 }
 0x8cd   :  { %9314 = vtanh.f32 %v4260_v52  ;;  %v4894_v52 = vld [vmem:[%s12434_s4 + $0x20] sm:$0xff] }
 0x8ce   :  { %9316 = vrcp.f32 %v4253_v46  ;;  %v8787_v46 = vpack.c.bf16 %v4894_v52, %v4891_v17  ;;  %v4897_v17 = vld [vmem:[%s12434_s4 + $0x38] sm:$0xff]  ;;  %v4900_v52 = vld [vmem:[%s12434_s4 + $0x50] sm:$0xff] }
 0x8cf   :  { %8750 = vmatpush1.bf16.msra.mxu1 %v12805_v63  ;;  %8777 = vmatpush3.bf16.msra.mxu0 %v12943_v31 }
 0x8d0   :  { %8752 = vmatprep.subr.bf16.mxu1 %v12944_v21  ;;  %8778 = vmatprep.subr.bf16.mxu0 %v12675_v44 }
 0x8d3   :  { %8754 = vmatpush1.bf16.msra.mxu1 %v12945_v54  ;;  %8780 = vmatpush3.bf16.msra.mxu0 %v12946_v29 }
 0x8d4   :  { %8756 = vmatprep.subr.bf16.mxu1 %v12947_v60  ;;  %8781 = vmatprep.subr.bf16.mxu0 %v12675_v44 }
 0x8d7   :  { %v9315_v50 = vpop.eup %9314  ;;  %8758 = vmatpush1.bf16.msra.mxu1 %v12948_v56  ;;  %8783 = vmatpush3.bf16.msra.mxu0 %v12949_v40 }
 0x8d8   :  { %8760 = vmatprep.subr.bf16.mxu1 %v12950_v27  ;;  %8784 = vmatprep.subr.bf16.mxu0 %v12675_v44  ;;  %v4262_v34 = vsub.f32 %v12951_v35, %v9315_v50  ;;  %v9317_v57 = vpop.eup %9316  ;;  %v4895_v35 = vld [vmem:[%s12434_s4 + $0x28] sm:$0xff] }
 0x8da   :  { %v4263_v28 = vmul.f32 %v9317_v57, %v4262_v34  ;;  %v4893_v34 = vld [vmem:[%s12434_s4 + $0x18] sm:$0xff]  ;;  %v4892_v57 = vld [vmem:[%s12434_s4 + $0x10] sm:$0xff] }
 0x8db   :  { %8762 = vmatpush1.bf16.msra.mxu1 %v12952_v20  ;;  %8786 = vmatpush3.bf16.msra.mxu0 %v12953_v0  ;;  %v8820_v0 = vpack.c.bf16 %v4895_v35, %v4892_v57  ;;  %v8791_v20 = vpack.c.bf16 %v4900_v52, %v4897_v17  ;;  %v4898_v35 = vld [vmem:[%s12434_s4 + $0x40] sm:$0xff] }
 0x8dc   :  { %v11922_v49 = vadd.f32 %v9315_v50, %v4263_v28  ;;  %8819 = vmatprep.subr.bf16.mxu0 %v12675_v44  ;;  %v4890_v50 = vld [vmem:[%s12434_s4] sm:$0xff]  ;;  %8788 = vmatprep.subr.bf16.mxu1 %v8787_v46  ;;  %v4899_v46 = vld [vmem:[%s12434_s4 + $0x48] sm:$0xff] }
 0x8dd   :  { %v8789_v28 = vpack.c.bf16 %v4893_v34, %v4890_v50  ;;  %v4896_v50 = vld [vmem:[%s12434_s4 + $0x30] sm:$0xff]  ;;  %v4906_v17 = vld [vmem:[%s12434_s4 + $0x80] sm:$0xff] }
 0x8de   :  { %12954 = vst [vmem:[#allocation63_spill] sm:$0xff] %v11922_v49  ;;  %4785 = vmatmul.mubr.f32.vlgmr.msra.gmra.mrb[24].mxu1 %v11922_v49  ;;  %7450 = vmatmul.mubr.f32.vlgmr.msra.gmra.mrb[76].mxu0 %v11922_v49  ;;  %v8793_v34 = vpack.c.bf16 %v4899_v46, %v4896_v50  ;;  %v4902_v50 = vld [vmem:[%s12434_s4 + $0x60] sm:$0xff]  ;;  %v4904_v46 = vld [vmem:[%s12434_s4 + $0x70] sm:$0xff]  ;;  %v12956_v49 = vld [vmem:[#allocation93_spill] sm:$0xff] }
 0x8df   :  { %5002 = vmatprep.mubr.f32.mxu1 %v12652_v62  ;;  %7484 = vmatprep.mubr.msk.f32.mxu0 %vm9424_vm8, %v12652_v62 }
 0x8e0   :  { %8790 = vmatpush1.bf16.msra.mxu1 %v8789_v28  ;;  %8821 = vmatpush3.bf16.msra.mxu0 %v8820_v0  ;;  %v4901_v0 = vld [vmem:[%s12434_s4 + $0x58] sm:$0xff]  ;;  %v4903_v28 = vld [vmem:[%s12434_s4 + $0x68] sm:$0xff] }
 0x8e1   :  { %8822 = vmatprep.subr.bf16.mxu0 %v12675_v44  ;;  %8792 = vmatprep.subr.bf16.mxu1 %v8791_v20  ;;  %v8823_v57 = vpack.c.bf16 %v4901_v0, %v4898_v35  ;;  %v8795_v52 = vpack.c.bf16 %v4906_v17, %v4903_v28  ;;  %v4905_v20 = vld [vmem:[%s12434_s4 + $0x78] sm:$0xff]  ;;  %v4912_v28 = vld [vmem:[%s12434_s4 + $0xb0] sm:$0xff] }
 0x8e2   :  { %v8797_v35 = vpack.c.bf16 %v4905_v20, %v4902_v50  ;;  %v4908_v50 = vld [vmem:[%s12434_s4 + $0x90] sm:$0xff]  ;;  %v4910_v20 = vld [vmem:[%s12434_s4 + $0xa0] sm:$0xff] }
 0x8e4   :  { %8794 = vmatpush1.bf16.msra.mxu1 %v8793_v34  ;;  %8824 = vmatpush3.bf16.msra.mxu0 %v8823_v57  ;;  %v4907_v34 = vld [vmem:[%s12434_s4 + $0x88] sm:$0xff]  ;;  %v4909_v57 = vld [vmem:[%s12434_s4 + $0x98] sm:$0xff] }
 0x8e5   :  { %8825 = vmatprep.subr.bf16.mxu0 %v12675_v44  ;;  %8796 = vmatprep.subr.bf16.mxu1 %v8795_v52  ;;  %v8826_v0 = vpack.c.bf16 %v4907_v34, %v4904_v46  ;;  %v8799_v17 = vpack.c.bf16 %v4912_v28, %v4909_v57  ;;  %v4911_v52 = vld [vmem:[%s12434_s4 + $0xa8] sm:$0xff]  ;;  %v4918_v57 = vld [vmem:[%s12434_s4 + $0xe0] sm:$0xff] }
 0x8e6   :  { %v8801_v46 = vpack.c.bf16 %v4911_v52, %v4908_v50  ;;  %v4914_v50 = vld [vmem:[%s12434_s4 + $0xc0] sm:$0xff]  ;;  %v4916_v52 = vld [vmem:[%s12434_s4 + $0xd0] sm:$0xff] }
 0x8e8   :  { %8798 = vmatpush1.bf16.msra.mxu1 %v8797_v35  ;;  %8827 = vmatpush3.bf16.msra.mxu0 %v8826_v0  ;;  %v4913_v35 = vld [vmem:[%s12434_s4 + $0xb8] sm:$0xff]  ;;  %v4915_v0 = vld [vmem:[%s12434_s4 + $0xc8] sm:$0xff] }
 0x8e9   :  { %8828 = vmatprep.subr.bf16.mxu0 %v12675_v44  ;;  %8800 = vmatprep.subr.bf16.mxu1 %v8799_v17  ;;  %v8829_v34 = vpack.c.bf16 %v4913_v35, %v4910_v20  ;;  %v8803_v28 = vpack.c.bf16 %v4918_v57, %v4915_v0  ;;  %v4917_v17 = vld [vmem:[%s12434_s4 + $0xd8] sm:$0xff]  ;;  %v4924_v0 = vld [vmem:[%s12434_s4 + $0x110] sm:$0xff] }
 0x8ea   :  { %v8805_v20 = vpack.c.bf16 %v4917_v17, %v4914_v50  ;;  %v4920_v50 = vld [vmem:[%s12434_s4 + $0xf0] sm:$0xff]  ;;  %v4922_v17 = vld [vmem:[%s12434_s4 + $0x100] sm:$0xff] }
 0x8ec   :  { %8802 = vmatpush1.bf16.msra.mxu1 %v8801_v46  ;;  %8830 = vmatpush3.bf16.msra.mxu0 %v8829_v34  ;;  %v4919_v46 = vld [vmem:[%s12434_s4 + $0xe8] sm:$0xff]  ;;  %v4921_v34 = vld [vmem:[%s12434_s4 + $0xf8] sm:$0xff] }
 0x8ed   :  { %8831 = vmatprep.subr.bf16.mxu0 %v12675_v44  ;;  %8804 = vmatprep.subr.bf16.mxu1 %v8803_v28  ;;  %v8832_v35 = vpack.c.bf16 %v4919_v46, %v4916_v52  ;;  %v8807_v57 = vpack.c.bf16 %v4924_v0, %v4921_v34  ;;  %v4923_v28 = vld [vmem:[%s12434_s4 + $0x108] sm:$0xff]  ;;  %v4930_v34 = vld [vmem:[%s12434_s4 + $0x140] sm:$0xff] }
 0x8ee   :  { %v8809_v52 = vpack.c.bf16 %v4923_v28, %v4920_v50  ;;  %v4926_v50 = vld [vmem:[%s12434_s4 + $0x120] sm:$0xff]  ;;  %v4928_v28 = vld [vmem:[%s12434_s4 + $0x130] sm:$0xff] }
 0x8f0   :  { %8806 = vmatpush1.bf16.msra.mxu1 %v8805_v20  ;;  %8833 = vmatpush3.bf16.msra.mxu0 %v8832_v35  ;;  %v4925_v20 = vld [vmem:[%s12434_s4 + $0x118] sm:$0xff]  ;;  %v4927_v35 = vld [vmem:[%s12434_s4 + $0x128] sm:$0xff] }
 0x8f1   :  { %8834 = vmatprep.subr.bf16.mxu0 %v12675_v44  ;;  %8808 = vmatprep.subr.bf16.mxu1 %v8807_v57  ;;  %v8835_v46 = vpack.c.bf16 %v4925_v20, %v4922_v17  ;;  %v8811_v0 = vpack.c.bf16 %v4930_v34, %v4927_v35  ;;  %v4929_v57 = vld [vmem:[%s12434_s4 + $0x138] sm:$0xff]  ;;  %v4936_v35 = vld [vmem:[%s12434_s4 + $0x170] sm:$0xff] }
 0x8f2   :  { %v8813_v17 = vpack.c.bf16 %v4929_v57, %v4926_v50  ;;  %v4932_v50 = vld [vmem:[%s12434_s4 + $0x150] sm:$0xff]  ;;  %v4934_v57 = vld [vmem:[%s12434_s4 + $0x160] sm:$0xff] }
 0x8f4   :  { %8810 = vmatpush1.bf16.msra.mxu1 %v8809_v52  ;;  %8836 = vmatpush3.bf16.msra.mxu0 %v8835_v46  ;;  %v4931_v52 = vld [vmem:[%s12434_s4 + $0x148] sm:$0xff]  ;;  %v4933_v46 = vld [vmem:[%s12434_s4 + $0x158] sm:$0xff] }
 0x8f5   :  { %8837 = vmatprep.subr.bf16.mxu0 %v12675_v44  ;;  %8812 = vmatprep.subr.bf16.mxu1 %v8811_v0  ;;  %v8838_v20 = vpack.c.bf16 %v4931_v52, %v4928_v28  ;;  %v8815_v34 = vpack.c.bf16 %v4936_v35, %v4933_v46  ;;  %v4935_v0 = vld [vmem:[%s12434_s4 + $0x168] sm:$0xff] }
 0x8f6   :  { %v8817_v28 = vpack.c.bf16 %v4935_v0, %v4932_v50  ;;  %v12957_v50 = vld [vmem:[#allocation94_spill] sm:$0xff] }
 0x8f8   :  { %8814 = vmatpush1.bf16.msra.mxu1 %v8813_v17  ;;  %8839 = vmatpush3.bf16.msra.mxu0 %v8838_v20  ;;  %v4937_v17 = vld [vmem:[%s12434_s4 + $0x178] sm:$0xff] }
 0x8f9   :  { %8840 = vmatprep.subr.bf16.mxu0 %v12675_v44  ;;  %8816 = vmatprep.subr.bf16.mxu1 %v8815_v34  ;;  %v8841_v52 = vpack.c.bf16 %v4937_v17, %v4934_v57  ;;  %v12955_v20 = vld [vmem:[#allocation111_spill] sm:$0xff] }
 0x8fc   :  { %8818 = vmatpush1.bf16.msra.mxu1 %v8817_v28  ;;  %8842 = vmatpush3.bf16.msra.mxu0 %v8841_v52 }
 0x8fd   :  { %8844 = vmatprep.subr.bf16.mxu1 %v12955_v20  ;;  %8875 = vmatprep.subr.bf16.mxu0 %v12675_v44  ;;  %v12958_v20 = vld [vmem:[#allocation102_spill] sm:$0xff] }
 0x971   :  { %v4387_v46 = vpop.f32.mrb[22].mxu1  ;;  %v4458_v35 = vpop.f32.mrb[72].mxu0 }
 0x972   :  { %v4462_v27 = vadd.f32 %v4387_v46, %v12956_v49  ;;  %v4389_v40 = vpop.f32.mrb[23].mxu1  ;;  %v7381_v56 = vpop.f32.mrb[73].mxu0  ;;  %v4476_v28 = vadd.f32 %v10565_v58, %v4458_v35 }
 0x973   :  { %v4463_v0 = vadd.f32 %v4389_v40, %v12957_v50 }
 0x974   :  { %v6196_v60 = vmul.f32 -1.442695, %v4462_v27 }
 0x975   :  { %v6197_v29 = vmul.f32 -1.442695, %v4463_v0 }
 0x976   :  { %9318 = vpow2.f32 %v6196_v60 }
 0x977   :  { %9320 = vpow2.f32 %v6197_v29 }
 0x980   :  { %v9319_v54 = vpop.eup %9318 }
 0x981   :  { %v4470_v34 = vadd.f32 1.0, %v9319_v54  ;;  %v9321_v57 = vpop.eup %9320 }
 0x982   :  { %v4471_v31 = vadd.f32 1.0, %v9321_v57 }
 0x983   :  { %9322 = vrcp.f32 %v4470_v34 }
 0x98d   :  { %v9323_v17 = vpop.eup %9322 }
 0x98e   :  { %v4477_v52 = vmul.f32 %v9323_v17, %v4476_v28 }
 0x990   :  { %v4478_v21 = vadd.f32 %v4477_v52, %v12958_v20 }
 0x991   :  { %v12087_v49 = vpop.f32.mrb[74].mxu0 }
 0x992   :  { %9324 = vtanh.f32 %v4478_v21  ;;  %v7416_v56 = vpop.f32.mrb[75].mxu0 }
 0x993   :  { %9326 = vrcp.f32 %v4471_v31  ;;  %v4669_v56 = vadd.f32 %v12087_v49, %v11185_v18  ;;  %v12961_v49 = vld [vmem:[#allocation37_spill] sm:$0xff] }
 0x99c   :  { %v9325_v60 = vpop.eup %9324 }
 0x99d   :  { %v4480_v40 = vsub.f32 %v11842_v26, %v9325_v60  ;;  %v9327_v27 = vpop.eup %9326 }
 0x99f   :  { %v4481_v54 = vmul.f32 %v9327_v27, %v4480_v40 }
 0x9a1   :  { %v12090_v29 = vadd.f32 %v9325_v60, %v4481_v54  ;;  %v12960_v54 = vld [vmem:[#allocation34_spill] sm:$0xff] }
 0x9a3   :  { %5003 = vmatmul.mubr.f32.vlgmr.msra.gmra.mrb[26].mxu1 %v12090_v29  ;;  %7485 = vmatmul.mubr.f32.vlgmr.msra.gmra.mrb[78].mxu0 %v12090_v29 }
 0x9a4   :  { %8846 = vmatpush1.bf16.msra.mxu1 %v10789_v51  ;;  %8877 = vmatpush3.bf16.msra.mxu0 %v10830_v9 }
 0x9a5   :  { %8848 = vmatprep.subr.bf16.mxu1 %v10797_v4  ;;  %8878 = vmatprep.subr.bf16.mxu0 %v12675_v44 }
 0x9a6   :  { %5212 = vmatprep.mubr.f32.mxu1 %v12652_v62  ;;  %7519 = vmatprep.mubr.msk.f32.mxu0 %vm9424_vm8, %v12652_v62 }
 0x9a8   :  { %8850 = vmatpush1.bf16.msra.mxu1 %v10810_v3  ;;  %8880 = vmatpush3.bf16.msra.mxu0 %v10847_v2 }
 0x9a9   :  { %8852 = vmatprep.subr.bf16.mxu1 %v10818_v10  ;;  %8881 = vmatprep.subr.bf16.mxu0 %v12675_v44 }
 0x9ac   :  { %8854 = vmatpush1.bf16.msra.mxu1 %v10825_v6  ;;  %8883 = vmatpush3.bf16.msra.mxu0 %v10865_v8 }
 0x9ad   :  { %8856 = vmatprep.subr.bf16.mxu1 %v10835_v13  ;;  %8884 = vmatprep.subr.bf16.mxu0 %v12675_v44 }
 0x9b0   :  { %8858 = vmatpush1.bf16.msra.mxu1 %v10842_v12  ;;  %8886 = vmatpush3.bf16.msra.mxu0 %v10881_v14 }
 0x9b1   :  { %v4786_v26 = vpop.f32.mrb[24].mxu1  ;;  %v4857_v31 = vpop.f32.mrb[76].mxu0  ;;  %8860 = vmatprep.subr.bf16.mxu1 %v10852_v5  ;;  %8887 = vmatprep.subr.bf16.mxu0 %v12675_v44 }
 0x9b2   :  { %v9141_v21 = vadd.f32 %v4786_v26, %v11138_v33  ;;  %v4788_v20 = vpop.f32.mrb[25].mxu1  ;;  %v7451_v46 = vpop.f32.mrb[77].mxu0  ;;  %v4875_v17 = vadd.f32 %v11766_v42, %v4857_v31  ;;  %v12959_v42 = vld [vmem:[#allocation44_spill] sm:$0xff]  ;;  %v12962_v26 = vld [vmem:[#allocation30_spill] sm:$0xff]  ;;  %v12963_v31 = vld [vmem:[#allocation27_spill] sm:$0xff] }
 0x9b3   :  { %v9142_v50 = vadd.f32 %v4788_v20, %v11150_v1  ;;  %v12964_v20 = vld [vmem:[#allocation41_spill] sm:$0xff] }
 0x9b4   :  { %v6198_v35 = vmul.f32 -1.442695, %v9141_v21  ;;  %8862 = vmatpush1.bf16.msra.mxu1 %v10860_v15  ;;  %8889 = vmatpush3.bf16.msra.mxu0 %v10897_v48  ;;  %v12965_v46 = vld [vmem:[#allocation33_spill] sm:$0xff] }
 0x9b5   :  { %8864 = vmatprep.subr.bf16.mxu1 %v10870_v11  ;;  %8890 = vmatprep.subr.bf16.mxu0 %v12675_v44  ;;  %v6199_v0 = vmul.f32 -1.442695, %v9142_v50  ;;  %v12967_v50 = vld [vmem:[#allocation63_spill] sm:$0xff] }
 0x9b6   :  { %9328 = vpow2.f32 %v6198_v35  ;;  %v12966_v35 = vld [vmem:[#allocation40_spill] sm:$0xff] }
 0x9b7   :  { %9330 = vpow2.f32 %v6199_v0 }
 0x9b8   :  { %8866 = vmatpush1.bf16.msra.mxu1 %v10876_v19  ;;  %8892 = vmatpush3.bf16.msra.mxu0 %v10913_v24 }
 0x9b9   :  { %8868 = vmatprep.subr.bf16.mxu1 %v10886_v25  ;;  %8893 = vmatprep.subr.bf16.mxu0 %v12675_v44 }
 0x9bc   :  { %8870 = vmatpush1.bf16.msra.mxu1 %v12785_v30  ;;  %8895 = vmatpush3.bf16.msra.mxu0 %v12823_v43 }
 0x9bd   :  { %8872 = vmatprep.subr.bf16.mxu1 %v12824_v32  ;;  %8896 = vmatprep.subr.bf16.mxu0 %v12675_v44 }
 0x9c0   :  { %v9329_v34 = vpop.eup %9328  ;;  %8874 = vmatpush1.bf16.msra.mxu1 %v12825_v45  ;;  %8898 = vmatpush3.bf16.msra.mxu0 %v12826_v23 }
 0x9c1   :  { %v4869_v57 = vadd.f32 1.0, %v9329_v34  ;;  %8900 = vmatprep.subr.bf16.mxu1 %v12827_v37  ;;  %8931 = vmatprep.subr.bf16.mxu0 %v12675_v44  ;;  %v9331_v28 = vpop.eup %9330 }
 0x9c2   :  { %v4870_v27 = vadd.f32 1.0, %v9331_v28  ;;  %v12968_v28 = vld [vmem:[#allocation43_spill] sm:$0xff] }
 0x9c3   :  { %9332 = vrcp.f32 %v4869_v57  ;;  %5213 = vmatmul.mubr.f32.vlgmr.msra.gmra.mrb[28].mxu1 %v12090_v29  ;;  %7520 = vmatmul.mubr.f32.vlgmr.msra.gmra.mrb[80].mxu0 %v12090_v29 }
 0x9c4   :  { %8902 = vmatpush1.bf16.msra.mxu1 %v12828_v47  ;;  %8933 = vmatpush3.bf16.msra.mxu0 %v12829_v22 }
 0x9c5   :  { %8904 = vmatprep.subr.bf16.mxu1 %v12830_v39  ;;  %8934 = vmatprep.subr.bf16.mxu0 %v12675_v44 }
 0x9c6   :  { %5401 = vmatprep.mubr.f32.mxu1 %v12652_v62  ;;  %7554 = vmatprep.mubr.msk.f32.mxu0 %vm9424_vm8, %v12652_v62 }
 0x9c8   :  { %8906 = vmatpush1.bf16.msra.mxu1 %v12831_v61  ;;  %8936 = vmatpush3.bf16.msra.mxu0 %v12864_v36 }
 0x9c9   :  { %8908 = vmatprep.subr.bf16.mxu1 %v12865_v55  ;;  %8937 = vmatprep.subr.bf16.mxu0 %v12675_v44 }
 0x9cc   :  { %8910 = vmatpush1.bf16.msra.mxu1 %v12799_v59  ;;  %8939 = vmatpush3.bf16.msra.mxu0 %v12834_v53 }
 0x9cd   :  { %v9333_v52 = vpop.eup %9332  ;;  %8912 = vmatprep.subr.bf16.mxu1 %v12835_v38  ;;  %8940 = vmatprep.subr.bf16.mxu0 %v12675_v44 }
 0x9ce   :  { %v4876_v60 = vmul.f32 %v9333_v52, %v4875_v17  ;;  %v12969_v17 = vld [vmem:[#allocation47_spill] sm:$0xff] }
 0x9d0   :  { %v4877_v40 = vadd.f32 %v4876_v60, %v4669_v56  ;;  %8914 = vmatpush1.bf16.msra.mxu1 %v12802_v41  ;;  %8942 = vmatpush3.bf16.msra.mxu0 %v12803_v16  ;;  %v12970_v56 = vld [vmem:[#allocation111_spill] sm:$0xff] }
 0x9d1   :  { %8916 = vmatprep.subr.bf16.mxu1 %v12804_v7  ;;  %8943 = vmatprep.subr.bf16.mxu0 %v12675_v44 }
 0x9d2   :  { %9334 = vtanh.f32 %v4877_v40 }
 0x9d3   :  { %9336 = vrcp.f32 %v4870_v27 }
 0x9d4   :  { %8918 = vmatpush1.bf16.msra.mxu1 %v12805_v63  ;;  %8945 = vmatpush3.bf16.msra.mxu0 %v12959_v42 }
 0x9d5   :  { %8920 = vmatprep.subr.bf16.mxu1 %v12960_v54  ;;  %8946 = vmatprep.subr.bf16.mxu0 %v12675_v44 }
 0x9d8   :  { %8922 = vmatpush1.bf16.msra.mxu1 %v12961_v49  ;;  %8948 = vmatpush3.bf16.msra.mxu0 %v12962_v26 }
 0x9d9   :  { %8924 = vmatprep.subr.bf16.mxu1 %v12963_v31  ;;  %8949 = vmatprep.subr.bf16.mxu0 %v12675_v44 }
 0x9dc   :  { %v9335_v21 = vpop.eup %9334  ;;  %8926 = vmatpush1.bf16.msra.mxu1 %v12964_v20  ;;  %8951 = vmatpush3.bf16.msra.mxu0 %v12965_v46 }
 0x9dd   :  { %8928 = vmatprep.subr.bf16.mxu1 %v12966_v35  ;;  %8952 = vmatprep.subr.bf16.mxu0 %v12675_v44  ;;  %v4879_v0 = vsub.f32 %v12967_v50, %v9335_v21  ;;  %v9337_v34 = vpop.eup %9336 }
 0x9df   :  { %v4880_v57 = vmul.f32 %v9337_v34, %v4879_v0  ;;  %v5932_v0 = vld [vmem:[%s12432_s2 + $0x98] sm:$0xff] }
 0x9e0   :  { %8930 = vmatpush1.bf16.msra.mxu1 %v12968_v28  ;;  %8954 = vmatpush3.bf16.msra.mxu0 %v12969_v17 }
 0x9e1   :  { %v12170_v52 = vadd.f32 %v9335_v21, %v4880_v57  ;;  %8956 = vmatprep.subr.bf16.mxu1 %v12970_v56  ;;  %8987 = vmatprep.subr.bf16.mxu0 %v12675_v44  ;;  %v5913_v21 = vld [vmem:[%s12432_s2] sm:$0xff]  ;;  %v12974_v56 = vld [vmem:[#allocation50_spill] sm:$0xff] }
 0x9e3   :  { %5402 = vmatmul.mubr.f32.vlgmr.msra.gmra.mrb[28].mxu1 %v12170_v52  ;;  %7555 = vmatmul.mubr.f32.vlgmr.msra.gmra.mrb[82].mxu0 %v12170_v52 }
 0x9e4   :  { %8958 = vmatpush1.bf16.msra.mxu1 %v10789_v51  ;;  %8989 = vmatpush3.bf16.msra.mxu0 %v10830_v9 }
 0x9e5   :  { %8960 = vmatprep.subr.bf16.mxu1 %v10797_v4  ;;  %8990 = vmatprep.subr.bf16.mxu0 %v12675_v44 }
 0x9e6   :  { %5613 = vmatprep.mubr.f32.mxu1 %v12652_v62  ;;  %7589 = vmatprep.mubr.msk.f32.mxu0 %vm9424_vm8, %v12652_v62 }
 0x9e8   :  { %8962 = vmatpush1.bf16.msra.mxu1 %v10810_v3  ;;  %8992 = vmatpush3.bf16.msra.mxu0 %v10847_v2  ;;  %v12971_v3 = vld [vmem:[#allocation95_spill] sm:$0xff] }
 0x9e9   :  { %8964 = vmatprep.subr.bf16.mxu1 %v10818_v10  ;;  %8993 = vmatprep.subr.bf16.mxu0 %v12675_v44 }
 0x9ec   :  { %8966 = vmatpush1.bf16.msra.mxu1 %v10825_v6  ;;  %8995 = vmatpush3.bf16.msra.mxu0 %v10865_v8 }
 0x9ed   :  { %8968 = vmatprep.subr.bf16.mxu1 %v10835_v13  ;;  %8996 = vmatprep.subr.bf16.mxu0 %v12675_v44 }
 0x9f0   :  { %8970 = vmatpush1.bf16.msra.mxu1 %v10842_v12  ;;  %8998 = vmatpush3.bf16.msra.mxu0 %v10881_v14  ;;  %v12972_v12 = vld [vmem:[#allocation96_spill] sm:$0xff] }
 0x9f1   :  { %8972 = vmatprep.subr.bf16.mxu1 %v10852_v5  ;;  %8999 = vmatprep.subr.bf16.mxu0 %v12675_v44 }
 0x9f4   :  { %8974 = vmatpush1.bf16.msra.mxu1 %v10860_v15  ;;  %9001 = vmatpush3.bf16.msra.mxu0 %v10897_v48  ;;  %v12973_v48 = vld [vmem:[#allocation101_spill] sm:$0xff] }
 0x9f5   :  { %8976 = vmatprep.subr.bf16.mxu1 %v10870_v11  ;;  %9002 = vmatprep.subr.bf16.mxu0 %v12675_v44 }
 0x9f8   :  { %8978 = vmatpush1.bf16.msra.mxu1 %v10876_v19  ;;  %9004 = vmatpush3.bf16.msra.mxu0 %v10913_v24 }
 0x9f9   :  { %8980 = vmatprep.subr.bf16.mxu1 %v10886_v25  ;;  %9005 = vmatprep.subr.bf16.mxu0 %v12675_v44 }
 0x9fc   :  { %8982 = vmatpush1.bf16.msra.mxu1 %v12785_v30  ;;  %9007 = vmatpush3.bf16.msra.mxu0 %v12823_v43 }
 0x9fd   :  { %8984 = vmatprep.subr.bf16.mxu1 %v12824_v32  ;;  %9008 = vmatprep.subr.bf16.mxu0 %v12675_v44 }
 0xa00   :  { %8986 = vmatpush1.bf16.msra.mxu1 %v12825_v45  ;;  %9010 = vmatpush3.bf16.msra.mxu0 %v12826_v23 }
 0xa01   :  { %9012 = vmatprep.subr.bf16.mxu1 %v12827_v37  ;;  %9043 = vmatprep.subr.bf16.mxu0 %v12675_v44 }
 0xa76   :  { %v5004_v51 = vpop.f32.mrb[26].mxu1  ;;  %v5075_v4 = vpop.f32.mrb[78].mxu0 }
 0xa77   :  { %v5079_v10 = vadd.f32 %v5004_v51, %v12971_v3  ;;  %v5006_v6 = vpop.f32.mrb[27].mxu1  ;;  %v7486_v9 = vpop.f32.mrb[79].mxu0  ;;  %v5093_v19 = vadd.f32 %v10565_v58, %v5075_v4  ;;  %v5915_v51 = vld [vmem:[%s12432_s2 + $0x10] sm:$0xff]  ;;  %v5916_v4 = vld [vmem:[%s12432_s2 + $0x18] sm:$0xff]  ;;  %v5933_v3 = vld [vmem:[%s12432_s2 + $0xa0] sm:$0xff] }
 0xa78   :  { %v5080_v2 = vadd.f32 %v5006_v6, %v12972_v12  ;;  %v9073_v6 = vpack.c.bf16 %v5916_v4, %v5915_v51  ;;  %v5918_v12 = vld [vmem:[%s12432_s2 + $0x28] sm:$0xff] }
 0xa79   :  { %v6200_v13 = vmul.f32 -1.442695, %v5079_v10  ;;  %v5934_v10 = vld [vmem:[%s12432_s2 + $0xa8] sm:$0xff] }
 0xa7a   :  { %v6201_v5 = vmul.f32 -1.442695, %v5080_v2  ;;  %v9075_v9 = vpack.c.bf16 %v5934_v10, %v5933_v3  ;;  %v5935_v2 = vld [vmem:[%s12432_s2 + $0xb0] sm:$0xff] }
 0xa7b   :  { %9338 = vpow2.f32 %v6200_v13  ;;  %v5917_v13 = vld [vmem:[%s12432_s2 + $0x20] sm:$0xff] }
 0xa7c   :  { %9340 = vpow2.f32 %v6201_v5  ;;  %v5936_v5 = vld [vmem:[%s12432_s2 + $0xb8] sm:$0xff] }
 0xa85   :  { %v9339_v15 = vpop.eup %9338 }
 0xa86   :  { %v5087_v8 = vadd.f32 1.0, %v9339_v15  ;;  %v9341_v11 = vpop.eup %9340  ;;  %v9077_v15 = vpack.c.bf16 %v5918_v12, %v5917_v13  ;;  %v12979_v13 = vld [vmem:[#allocation84_spill] sm:$0xff] }
 0xa87   :  { %v5088_v30 = vadd.f32 1.0, %v9341_v11  ;;  %v5919_v11 = vld [vmem:[%s12432_s2 + $0x30] sm:$0xff] }
 0xa88   :  { %9342 = vrcp.f32 %v5087_v8  ;;  %v9079_v8 = vpack.c.bf16 %v5936_v5, %v5935_v2 }
 0xa92   :  { %v9343_v14 = vpop.eup %9342 }
 0xa93   :  { %v5094_v25 = vmul.f32 %v9343_v14, %v5093_v19  ;;  %v5920_v19 = vld [vmem:[%s12432_s2 + $0x38] sm:$0xff]  ;;  %v5937_v14 = vld [vmem:[%s12432_s2 + $0xc0] sm:$0xff] }
 0xa95   :  { %v5095_v24 = vadd.f32 %v5094_v25, %v12973_v48  ;;  %v5938_v25 = vld [vmem:[%s12432_s2 + $0xc8] sm:$0xff]  ;;  %v9081_v48 = vpack.c.bf16 %v5920_v19, %v5919_v11 }
 0xa96   :  { %v12215_v43 = vpop.f32.mrb[80].mxu0 }
 0xa97   :  { %9344 = vtanh.f32 %v5095_v24  ;;  %v7521_v32 = vpop.f32.mrb[81].mxu0  ;;  %v5286_v27 = vadd.f32 %v12215_v43, %v11185_v18  ;;  %v9083_v24 = vpack.c.bf16 %v5938_v25, %v5937_v14  ;;  %v5922_v43 = vld [vmem:[%s12432_s2 + $0x48] sm:$0xff] }
 0xa98   :  { %9346 = vrcp.f32 %v5088_v30  ;;  %v5921_v30 = vld [vmem:[%s12432_s2 + $0x40] sm:$0xff]  ;;  %v5939_v32 = vld [vmem:[%s12432_s2 + $0xd0] sm:$0xff] }
 0xaa1   :  { %v9345_v45 = vpop.eup %9344 }
 0xaa2   :  { %v5097_v23 = vsub.f32 %v12090_v29, %v9345_v45  ;;  %v9347_v37 = vpop.eup %9346 }
 0xaa4   :  { %v5098_v60 = vmul.f32 %v9347_v37, %v5097_v23  ;;  %v9085_v23 = vpack.c.bf16 %v5922_v43, %v5921_v30 }
 0xaa6   :  { %v5099_v40 = vadd.f32 %v9345_v45, %v5098_v60  ;;  %v5940_v45 = vld [vmem:[%s12432_s2 + $0xd8] sm:$0xff]  ;;  %v5923_v60 = vld [vmem:[%s12432_s2 + $0x50] sm:$0xff] }
 0xaa7   :  { %v9087_v37 = vpack.c.bf16 %v5940_v45, %v5939_v32 }
 0xaa8   :  { %5614 = vmatmul.mubr.f32.vlgmr.msra.gmra.mrb[30].mxu1 %v5099_v40  ;;  %5902 = vst [vmem:[#allocation8] sm:$0xff] %v5099_v40  ;;  %7590 = vmatmul.mubr.f32.vlgmr.msra.gmra.mrb[84].mxu0 %v5099_v40  ;;  %v5924_v40 = vld [vmem:[%s12432_s2 + $0x58] sm:$0xff] }
 0xaa9   :  { %9014 = vmatpush1.bf16.msra.mxu1 %v12828_v47  ;;  %9045 = vmatpush3.bf16.msra.mxu0 %v12829_v22 }
 0xaaa   :  { %9016 = vmatprep.subr.bf16.mxu1 %v12830_v39  ;;  %9046 = vmatprep.subr.bf16.mxu0 %v12675_v44 }
 0xaab   :  { %5802 = vmatprep.mubr.f32.mxu1 %v12652_v62  ;;  %7624 = vmatprep.mubr.msk.f32.mxu0 %vm9424_vm8, %v12652_v62 }
 0xaad   :  { %9018 = vmatpush1.bf16.msra.mxu1 %v12831_v61  ;;  %9048 = vmatpush3.bf16.msra.mxu0 %v12864_v36 }
 0xaae   :  { %9020 = vmatprep.subr.bf16.mxu1 %v12865_v55  ;;  %9049 = vmatprep.subr.bf16.mxu0 %v12675_v44  ;;  %v12262_v55 = vld [vmem:[%s12439_s9] ss:$0 sm:$0xff] }
 0xab1   :  { %9022 = vmatpush1.bf16.msra.mxu1 %v12799_v59  ;;  %9051 = vmatpush3.bf16.msra.mxu0 %v12834_v53 }
 0xab2   :  { %9024 = vmatprep.subr.bf16.mxu1 %v12835_v38  ;;  %9052 = vmatprep.subr.bf16.mxu0 %v12675_v44 }
 0xab5   :  { %9026 = vmatpush1.bf16.msra.mxu1 %v12802_v41  ;;  %9054 = vmatpush3.bf16.msra.mxu0 %v12803_v16  ;;  %v5930_v16 = vld [vmem:[%s12432_s2 + $0x88] sm:$0xff] }
 0xab6   :  { %v5403_v62 = vpop.f32.mrb[28].mxu1  ;;  %v5474_v58 = vpop.f32.mrb[82].mxu0  ;;  %9028 = vmatprep.subr.bf16.mxu1 %v12804_v7  ;;  %9055 = vmatprep.subr.bf16.mxu0 %v12675_v44 }
 0xab7   :  { %v9143_v47 = vadd.f32 %v5403_v62, %v11138_v33  ;;  %v5405_v22 = vpop.f32.mrb[29].mxu1  ;;  %v7556_v59 = vpop.f32.mrb[83].mxu0  ;;  %v5492_v29 = vadd.f32 %v12262_v55, %v5474_v58  ;;  %v5941_v62 = vld [vmem:[%s12432_s2 + $0xe0] sm:$0xff]  ;;  %v5942_v58 = vld [vmem:[%s12432_s2 + $0xe8] sm:$0xff] }
 0xab8   :  { %v9144_v41 = vadd.f32 %v5405_v22, %v11150_v1  ;;  %v9091_v22 = vpack.c.bf16 %v5942_v58, %v5941_v62  ;;  %v5925_v59 = vld [vmem:[%s12432_s2 + $0x60] sm:$0xff] }
 0xab9   :  { %v6202_v39 = vmul.f32 -1.442695, %v9143_v47  ;;  %9030 = vmatpush1.bf16.msra.mxu1 %v12805_v63  ;;  %9057 = vmatpush3.bf16.msra.mxu0 %v12959_v42  ;;  %v5929_v63 = vld [vmem:[%s12432_s2 + $0x80] sm:$0xff]  ;;  %v9089_v47 = vpack.c.bf16 %v5924_v40, %v5923_v60 }
 0xaba   :  { %9032 = vmatprep.subr.bf16.mxu1 %v12960_v54  ;;  %9058 = vmatprep.subr.bf16.mxu0 %v12675_v44  ;;  %v9067_v7 = vpack.c.bf16 %v5930_v16, %v5929_v63  ;;  %v6203_v61 = vmul.f32 -1.442695, %v9144_v41  ;;  %v5943_v41 = vld [vmem:[%s12432_s2 + $0xf0] sm:$0xff]  ;;  %v5944_v63 = vld [vmem:[%s12432_s2 + $0xf8] sm:$0xff] }
 0xabb   :  { %9348 = vpow2.f32 %v6202_v39  ;;  %v5926_v39 = vld [vmem:[%s12432_s2 + $0x68] sm:$0xff] }
 0xabc   :  { %9350 = vpow2.f32 %v6203_v61  ;;  %v9093_v16 = vpack.c.bf16 %v5926_v39, %v5925_v59  ;;  %v5927_v61 = vld [vmem:[%s12432_s2 + $0x70] sm:$0xff] }
 0xabd   :  { %9034 = vmatpush1.bf16.msra.mxu1 %v12961_v49  ;;  %9060 = vmatpush3.bf16.msra.mxu0 %v12962_v26 }
 0xabe   :  { %9036 = vmatprep.subr.bf16.mxu1 %v12963_v31  ;;  %9061 = vmatprep.subr.bf16.mxu0 %v12675_v44 }
 0xac1   :  { %9038 = vmatpush1.bf16.msra.mxu1 %v12964_v20  ;;  %9063 = vmatpush3.bf16.msra.mxu0 %v12965_v46  ;;  %v5914_v20 = vld [vmem:[%s12432_s2 + $0x8] sm:$0xff] }
 0xac2   :  { %9040 = vmatprep.subr.bf16.mxu1 %v12966_v35  ;;  %9064 = vmatprep.subr.bf16.mxu0 %v12675_v44  ;;  %v5931_v35 = vld [vmem:[%s12432_s2 + $0x90] sm:$0xff]  ;;  %v9069_v57 = vpack.c.bf16 %v5914_v20, %v5913_v21 }
 0xac5   :  { %v9349_v53 = vpop.eup %9348  ;;  %9042 = vmatpush1.bf16.msra.mxu1 %v12968_v28  ;;  %9066 = vmatpush3.bf16.msra.mxu0 %v12969_v17  ;;  %v9071_v17 = vpack.c.bf16 %v5932_v0, %v5931_v35 }
 0xac6   :  { %v5486_v38 = vadd.f32 1.0, %v9349_v53  ;;  %9068 = vmatprep.subr.bf16.mxu1 %v9067_v7  ;;  %v9351_v36 = vpop.eup %9350  ;;  %v9095_v7 = vpack.c.bf16 %v5944_v63, %v5943_v41  ;;  %v5928_v53 = vld [vmem:[%s12432_s2 + $0x78] sm:$0xff] }
 0xac7   :  { %v5487_v49 = vadd.f32 1.0, %v9351_v36  ;;  %v12975_v36 = vld [vmem:[#allocation46_spill] sm:$0xff] }
 0xac8   :  { %9352 = vrcp.f32 %v5486_v38  ;;  %v9097_v38 = vpack.c.bf16 %v5928_v53, %v5927_v61 }
 0xad2   :  { %v9353_v44 = vpop.eup %9352 }
 0xad3   :  { %v5493_v42 = vmul.f32 %v9353_v44, %v5492_v29  ;;  %v12976_v29 = vld [vmem:[#allocation73_spill] sm:$0xff]  ;;  %v12977_v44 = vld [vmem:[#allocation60_spill] sm:$0xff] }
 0xad5   :  { %v5494_v54 = vadd.f32 %v5493_v42, %v5286_v27 }
 0xad7   :  { %9354 = vtanh.f32 %v5494_v54 }
 0xad8   :  { %9356 = vrcp.f32 %v5487_v49 }
 0xae1   :  { %v9355_v26 = vpop.eup %9354 }
 0xae2   :  { %v5496_v31 = vsub.f32 %v12170_v52, %v9355_v26  ;;  %v9357_v46 = vpop.eup %9356 }
 0xae4   :  { %v5497_v34 = vmul.f32 %v9357_v46, %v5496_v31 }
 0xae6   :  { %v12280_v28 = vadd.f32 %v9355_v26, %v5497_v34 }
 0xae8   :  { %5803 = vmatmul.mubr.f32.vlgmr.msra.gmra.mrb[30].mxu1 %v12280_v28  ;;  %7625 = vmatmul.mubr.f32.vlgmr.msra.gmra.mrb[86].mxu0 %v12280_v28 }
 0xae9   :  { %9070 = vmatpush3.bf16.xpose.msra.mxu1 %v9069_v57  ;;  %6727 = vmatprep.mubr.f32.mxu1 %v12974_v56 }
 0xaea   :  { %9072 = vmatprep.subr.bf16.mxu1 %v9071_v17 }
 0xaf1   :  { %9074 = vmatpush3.bf16.xpose.msra.mxu1 %v9073_v6 }
 0xaf2   :  { %9076 = vmatprep.subr.bf16.mxu1 %v9075_v9  ;;  %v12978_v9 = vld [vmem:[#allocation83_spill] sm:$0xff] }
 0xaf9   :  { %9078 = vmatpush3.bf16.xpose.msra.mxu1 %v9077_v15 }
 0xafa   :  { %9080 = vmatprep.subr.bf16.mxu1 %v9079_v8 }
 0xb01   :  { %9082 = vmatpush3.bf16.xpose.msra.mxu1 %v9081_v48 }
 0xb02   :  { %9084 = vmatprep.subr.bf16.mxu1 %v9083_v24 }
 0xb09   :  { %9086 = vmatpush3.bf16.xpose.msra.mxu1 %v9085_v23 }
 0xb0a   :  { %9088 = vmatprep.subr.bf16.mxu1 %v9087_v37 }
 0xb11   :  { %9090 = vmatpush3.bf16.xpose.msra.mxu1 %v9089_v47 }
 0xb12   :  { %9092 = vmatprep.subr.bf16.mxu1 %v9091_v22 }
 0xb19   :  { %9094 = vmatpush3.bf16.xpose.msra.mxu1 %v9093_v16 }
 0xb1a   :  { %9096 = vmatprep.subr.bf16.mxu1 %v9095_v7 }
 0xb21   :  { %9098 = vmatpush3.bf16.xpose.msra.mxu1 %v9097_v38 }
 0xb28   :  { %6728 = vmatmul.mubr.f32.vlgmr.msra.gmra.mrb[32].mxu1 %v12974_v56 }
 0xb29   :  { %6729 = vmatprep.mubr.f32.mxu1 %v12975_v36 }
 0xb2c   :  { %6730 = vmatmul.mubr.f32.gmra.mrb[34].mxu1 %v12975_v36 }
 0xb2d   :  { %6731 = vmatprep.mubr.f32.mxu1 %v12976_v29 }
 0xb30   :  { %6732 = vmatmul.mubr.f32.gmra.mrb[36].mxu1 %v12976_v29 }
 0xb31   :  { %6733 = vmatprep.mubr.f32.mxu1 %v12977_v44 }
 0xb34   :  { %6734 = vmatmul.mubr.f32.gmra.mrb[38].mxu1 %v12977_v44 }
 0xb35   :  { %6735 = vmatprep.mubr.f32.mxu1 %v12967_v50 }
 0xb38   :  { %6736 = vmatmul.mubr.f32.gmra.mrb[40].mxu1 %v12967_v50 }
 0xb39   :  { %6737 = vmatprep.mubr.f32.mxu1 %v12170_v52 }
 0xb3c   :  { %6738 = vmatmul.mubr.f32.gmra.mrb[42].mxu1 %v12170_v52 }
 0xb3d   :  { %6739 = vmatprep.mubr.f32.mxu1 %v12280_v28 }
 0xb40   :  { %6740 = vmatmul.mubr.f32.gmra.mrb[44].mxu1 %v12280_v28 }
 0xb7b   :  { %v5686_v27 = vpop.f32.mrb[84].mxu0 }
 0xb7c   :  { %v7591_v42 = vpop.f32.mrb[85].mxu0  ;;  %v5687_v17 = vadd.f32 %v5686_v27, %v11185_v18 }
 0xbbb   :  { %v5804_v54 = vpop.f32.mrb[30].mxu1  ;;  %v5875_v49 = vpop.f32.mrb[86].mxu0 }
 0xbbc   :  { %v9145_v26 = vadd.f32 %v5804_v54, %v11138_v33  ;;  %v5806_v31 = vpop.f32.mrb[31].mxu1  ;;  %v7626_v21 = vpop.f32.mrb[87].mxu0  ;;  %v5893_v34 = vadd.f32 %v12262_v55, %v5875_v49  ;;  %v5945_v55 = vld [vmem:[%s12440_s10] sm:$0x3]  ;;  %s9425_s10 = smov [#allocation8]  }
 0xbbd   :  { %v9146_v50 = vadd.f32 %v5806_v31, %v11150_v1  ;;  %v12385_v18 = vrot.slane %v5945_v55, %v12978_v9  ;;  %v12388_v12 = vrot.slane %v5945_v55, %v12979_v13  ;;  %s6103_s22 = sshll.u32 %s9425_s10, 4  ;;  %s6104_s22 = int_to_ptr.vmem [resolvable:$true] %s6103_s22 }
 0xbbe   :  { %v6204_v20 = vmul.f32 -1.442695, %v9145_v26  ;;  %s9370_s23 = scalar_lea.vmem %s6104_s22, 256  ;;  %p9375_p1 = scmp.lt.s32.totalorder %s6104_s22, %s6104_s22 }
 0xbbf   :  { %v6205_v46 = vmul.f32 -1.442695, %v9146_v50  ;;  %p9371_p0 = scmp.ne.s32.totalorder %s6104_s22, %s9370_s23  ;;  %p9376_p2 = scmp.lt.s32.totalorder %s9370_s23, %s9370_s23 }
 0xbc0   :  { %9358 = vpow2.f32 %v6204_v20 }
 0xbc1   :  { %9360 = vpow2.f32 %v6205_v46  ;;  %p9377_p3 = por %p9376_p2, %p9375_p1 }
 0xbc3   :  { %p9378_p4 = pnand %p9377_p3, %p9371_p0 }
 0xbca   :  { %v9359_v35 = vpop.eup %9358 }
 0xbcb   :  { %v5887_v0 = vadd.f32 1.0, %v9359_v35  ;;  %v9361_v52 = vpop.eup %9360 }
 0xbcc   :  { %v5888_v33 = vadd.f32 1.0, %v9361_v52 }
 0xbcd   :  { %9362 = vrcp.f32 %v5887_v0 }
 0xbd7   :  { %v9363_v57 = vpop.eup %9362 }
 0xbd8   :  { %v5894_v56 = vmul.f32 %v9363_v57, %v5893_v34 }
 0xbda   :  { %v5895_v51 = vadd.f32 %v5894_v56, %v5687_v17 }
 0xbdc   :  { %9364 = vtanh.f32 %v5895_v51 }
 0xbdd   :  { %9366 = vrcp.f32 %v5888_v33 }
 0xbe6   :  { %v9365_v4 = vpop.eup %9364 }
 0xbe7   :  { %v5897_v3 = vsub.f32 %v12280_v28, %v9365_v4  ;;  %v9367_v1 = vpop.eup %9366 }
 0xbe9   :  { %v5898_v10 = vmul.f32 %v9367_v1, %v5897_v3 }
 0xbeb   :  { %v5899_v6 = vadd.f32 %v9365_v4, %v5898_v10 }
 0xbed   :  { %6741 = vmatprep.mubr.f32.mxu1 %v5899_v6  ;;  %5904 = vst [vmem:[#allocation8 + $0x8] sm:$0xff] %v5899_v6 }
 0xbee   :  { %6742 = vmatmul.mubr.f32.gmra.mrb[46].mxu1 %v5899_v6 }
 0xbfb   :  { %v6023_v2 = vpop.f32.mrb[32].mxu1 }
 0xbfc   :  { %v6024_v5 = vadd.f32 %v6023_v2, %v12385_v18  ;;  %v6025_v28 = vpop.f32.mrb[33].mxu1 }
 0xbfd   :  { %v6026_v15 = vadd.f32 %v6025_v28, %v12388_v12 }
 0xbfe   :  { %6070 = vst [vmem:[#allocation6] sm:$0xff] %v6024_v5 }
 0xbff   :  { %6071 = vst [vmem:[#allocation6 + $0x8] sm:$0xff] %v6026_v15  ;;  %v6029_v8 = vpop.f32.mrb[34].mxu1 }
 0xc00   :  { %v6030_v11 = vadd.f32 %v6029_v8, %v12385_v18  ;;  %v6031_v19 = vpop.f32.mrb[35].mxu1 }
 0xc01   :  { %v6032_v14 = vadd.f32 %v6031_v19, %v12388_v12 }
 0xc02   :  { %6072 = vst [vmem:[#allocation6 + $0x10] sm:$0xff] %v6030_v11 }
 0xc03   :  { %6073 = vst [vmem:[#allocation6 + $0x18] sm:$0xff] %v6032_v14  ;;  %v6035_v25 = vpop.f32.mrb[36].mxu1 }
 0xc04   :  { %v6036_v48 = vadd.f32 %v6035_v25, %v12385_v18  ;;  %v6037_v24 = vpop.f32.mrb[37].mxu1 }
 0xc05   :  { %v6038_v30 = vadd.f32 %v6037_v24, %v12388_v12 }
 0xc06   :  { %6074 = vst [vmem:[#allocation6 + $0x20] sm:$0xff] %v6036_v48 }
 0xc07   :  { %6075 = vst [vmem:[#allocation6 + $0x28] sm:$0xff] %v6038_v30  ;;  %v6041_v43 = vpop.f32.mrb[38].mxu1 }
 0xc08   :  { %v6042_v32 = vadd.f32 %v6041_v43, %v12385_v18  ;;  %v6043_v45 = vpop.f32.mrb[39].mxu1 }
 0xc09   :  { %v6044_v23 = vadd.f32 %v6043_v45, %v12388_v12 }
 0xc0a   :  { %6076 = vst [vmem:[#allocation6 + $0x30] sm:$0xff] %v6042_v32 }
 0xc0b   :  { %6077 = vst [vmem:[#allocation6 + $0x38] sm:$0xff] %v6044_v23  ;;  %v6047_v37 = vpop.f32.mrb[40].mxu1 }
 0xc0c   :  { %v6048_v60 = vadd.f32 %v6047_v37, %v12385_v18  ;;  %v6049_v40 = vpop.f32.mrb[41].mxu1 }
 0xc0d   :  { %v6050_v62 = vadd.f32 %v6049_v40, %v12388_v12 }
 0xc0e   :  { %6078 = vst [vmem:[#allocation6 + $0x40] sm:$0xff] %v6048_v60 }
 0xc0f   :  { %6079 = vst [vmem:[#allocation6 + $0x48] sm:$0xff] %v6050_v62  ;;  %v6053_v58 = vpop.f32.mrb[42].mxu1 }
 0xc10   :  { %v6054_v47 = vadd.f32 %v6053_v58, %v12385_v18  ;;  %v6055_v22 = vpop.f32.mrb[43].mxu1 }
 0xc11   :  { %v6056_v59 = vadd.f32 %v6055_v22, %v12388_v12 }
 0xc12   :  { %6080 = vst [vmem:[#allocation6 + $0x50] sm:$0xff] %v6054_v47 }
 0xc13   :  { %6081 = vst [vmem:[#allocation6 + $0x58] sm:$0xff] %v6056_v59  ;;  %v6059_v39 = vpop.f32.mrb[44].mxu1 }
 0xc14   :  { %v6060_v41 = vadd.f32 %v6059_v39, %v12385_v18  ;;  %v6061_v63 = vpop.f32.mrb[45].mxu1 }
 0xc15   :  { %v6062_v16 = vadd.f32 %v6061_v63, %v12388_v12 }
 0xc16   :  { %6082 = vst [vmem:[#allocation6 + $0x60] sm:$0xff] %v6060_v41 }
 0xc17   :  { %6083 = vst [vmem:[#allocation6 + $0x68] sm:$0xff] %v6062_v16 }
 0xc18   :  { %9381 = shalt.err (!%p9378_p4)
}
 0xc19   :  { %s9382_s26 = scalar_lea.hbm %s12442_s12, 256 }
 0xc1a   :  { %p9383_p5 = scmp.ne.s32.totalorder %s12442_s12, %s9382_s26  ;;  %p9386_p6 = scmp.lt.u32.totalorder %s9382_s26, %s12442_s12 }
 0xc1c   :  { %p9388_p7 = pnand %p9386_p6, %p9383_p5 }
 0xc1e   :  { %9391 = shalt.err (!%p9388_p7)
}
 0xc1f   :  { %s9426_s29 = smov 128   ;;  %s9427_s6 = smov 8  }
 0xc20   :  { %6109 = dma.vmem_to_hbm [thread:$0]  %s6104_s22, 256, %s12442_s12, [#allocation9], %s9426_s29, %s9426_s29, %s9427_s6  }
 0xc21   :  { %s9428_s14 = smov [#allocation6]  }
 0xc22   :  { %s6091_s4 = sshll.u32 %s9428_s14, 4  ;;  %s6092_s4 = int_to_ptr.vmem [resolvable:$true] %s6091_s4 }
 0xc23   :  { %s9392_s15 = scalar_lea.vmem %s6092_s4, 2048  ;;  %p9397_p9 = scmp.lt.s32.totalorder %s6092_s4, %s6092_s4 }
 0xc24   :  { %p9393_p8 = scmp.ne.s32.totalorder %s6092_s4, %s9392_s15  ;;  %p9398_p10 = scmp.lt.s32.totalorder %s9392_s15, %s9392_s15 }
 0xc26   :  { %p9399_p11 = por %p9398_p10, %p9397_p9 }
 0xc28   :  { %p9400_p12 = pnand %p9399_p11, %p9393_p8 }
 0xcc1   :  { %v6065_v7 = vpop.f32.mrb[46].mxu1 }
 0xcc2   :  { %v6066_v61 = vadd.f32 %v6065_v7, %v12385_v18  ;;  %v6067_v53 = vpop.f32.mrb[47].mxu1 }
 0xcc3   :  { %v6068_v38 = vadd.f32 %v6067_v53, %v12388_v12 }
 0xcc4   :  { %6084 = vst [vmem:[#allocation6 + $0x70] sm:$0xff] %v6066_v61 }
 0xcc5   :  { %6085 = vst [vmem:[#allocation6 + $0x78] sm:$0xff] %v6068_v38 }
 0xcc6   :  { %9403 = shalt.err (!%p9400_p12)
}
 0xcc7   :  { %s9404_s1 = scalar_lea.hbm %s12441_s11, 2048 }
 0xcc8   :  { %p9405_p13 = scmp.ne.s32.totalorder %s12441_s11, %s9404_s1  ;;  %p9408_p0 = scmp.lt.u32.totalorder %s9404_s1, %s12441_s11 }
 0xcca   :  { %p9410_p1 = pnand %p9408_p0, %p9405_p13 }
 0xccc   :  { %9413 = shalt.err (!%p9410_p1)
}
 0xccd   :  { %s9429_s9 = smov 256   ;;  %s9430_s19 = smov 16  }
 0xcce   :  { %6097 = dma.vmem_to_hbm [thread:$0]  %s6092_s4, 2048, %s12441_s11, [#allocation7], %s9429_s9, %s9429_s9, %s9430_s19  }
 0xccf   :  { %9416 = dma.done.wait [#allocation7], 2048  }
 0xcd0   :  { %9417 = vsyncadd [#allocation7], 4294965248 }
 0xcd1   :  { %9418 = dma.done.wait [#allocation9], 256  }
 0xcd2   :  { %9419 = vsyncadd [#allocation9], 4294967040 }
 0xcd3   :  { %6116 = vsyncpa [#allocation7], 1 }
 0xcd4   :  { %6117 = vsyncpa [#allocation9], 1 }
 0xcd5   :  { %6118 = vsyncmov [#allocation5] }
 0xcd8   :  { %s6119_s2 = vpop.sfrf %6118 }
 0xcd9   :  { %p6206_p2 = scmp.ne.s32.totalorder %s6119_s2, 0 }
 0xcdb   :  { %6123 = shalt.err (%p6206_p2)  }

</bundles_post_ra>
